<compile_context>
chip_gen: v5e
topology: v5e:2x2
jax: 0.10.0
libtpu: 0.0.40
codegen_flags: <defaults>
</compile_context>

<pallas_src>
import math
import functools

import jax
import jax.numpy as jnp
from jax import lax
from jax.experimental import pallas as pl
from jax.experimental.pallas import tpu as pltpu


# ----------------------------- Pallas kernel --------------------------------

def _make_kernel(nhead):
    def kernel(x_ref, pe_ref, enc_w_ref, vec_ref, f1b_ref, wattn_ref, wffn_ref,
               out_ref):
        S, I = x_ref.shape                      # (seq, input_dim) - last batch slice
        D = pe_ref.shape[1]
        L = wattn_ref.shape[0]                  # static -> layer loop unrolls
        H = nhead
        hd = D // H
        scale = 1.0 / math.sqrt(hd)
        eps = 1e-5
        f32, bf16 = jnp.float32, jnp.bfloat16

        # vector-slab row map (all f32): 0 enc_b, 1 dec_w, 2 dec_b(bcast),
        # then per layer l (base = 3 + 9*l):
        #   +0 q_b  +1 k_b  +2 v_b  +3 out_b  +4 ln1_w  +5 ln1_b
        #   +6 ln2_w  +7 ln2_b  +8 f2_b
        def vrow(r):
            return vec_ref[r:r + 1, :]          # (1, D)

        def layer_norm(v, w, b):
            mu = jnp.mean(v, axis=-1, keepdims=True)
            var = jnp.mean((v - mu) ** 2, axis=-1, keepdims=True)
            return (v - mu) * lax.rsqrt(var + eps) * w + b

        # ---- encoder Linear(input_dim -> D) + positional encoding ----------
        if I == 1:    # static: Linear(1 -> D) is exactly a broadcast multiply
            h = x_ref[...] * enc_w_ref[...] + vrow(0)
        else:
            h = jnp.dot(x_ref[...], enc_w_ref[...],
                        preferred_element_type=f32) + vrow(0)
        h = h + pe_ref[...]                     # Dropout == identity (eval mode)

        # ---------------- encoder layers, statically unrolled ----------------
        for l in range(L):
            base = 3 + 9 * l

            # fused QKV projection: one (S,D)@(D,3D) bf16 MXU matmul
            h16 = h.astype(bf16)
            qkv = jnp.dot(h16, wattn_ref[l, :, :3 * D],
                          preferred_element_type=f32)                 # (S, 3D)
            q = qkv[:, 0 * D:1 * D] + vrow(base + 0)
            k = qkv[:, 1 * D:2 * D] + vrow(base + 1)
            v = qkv[:, 2 * D:3 * D] + vrow(base + 2)

            # per-head attention entirely in vregs; head re-merge folded into a
            # per-head out-projection accumulate (no VMEM bounce, no concat).
            out_w_l = wattn_ref[l, :, 3 * D:]                          # (D, D) bf16
            acc = jnp.zeros((S, D), f32)
            for hh in range(H):
                lo = hh * hd
                qh = q[:, lo:lo + hd]                                  # (S, hd) f32
                kh = k[:, lo:lo + hd]
                vh = v[:, lo:lo + hd]
                s = lax.dot_general(qh, kh, (((1,), (1,)), ((), ())),
                                    preferred_element_type=f32) * scale   # (S, S)
                m = jnp.max(s, axis=-1, keepdims=True)
                e = jnp.exp(s - m)
                p = e * pl.reciprocal(jnp.sum(e, axis=-1, keepdims=True),
                                      approx=False)
                oh = jnp.dot(p, vh, preferred_element_type=f32)        # (S, hd)
                acc = acc + jnp.dot(oh.astype(bf16), out_w_l[lo:lo + hd, :],
                                    preferred_element_type=f32)        # (S, D)
            attn = acc + vrow(base + 3)
            h = layer_norm(h + attn, vrow(base + 4), vrow(base + 5))

            # ----------------------- feed-forward ---------------------------
            f = jnp.dot(h.astype(bf16), wffn_ref[l, 0:D, :],
                        preferred_element_type=f32) + f1b_ref[l:l + 1, :]
            f = jnp.maximum(f, 0.0)                                    # relu
            # f2_w lane-dense (D, F): contract last dim of both operands
            f = lax.dot_general(f.astype(bf16), wffn_ref[l, D:2 * D, :],
                                (((1,), (1,)), ((), ())),
                                preferred_element_type=f32) + vrow(base + 8)
            h = layer_norm(h + f, vrow(base + 6), vrow(base + 7))

        # ---- decoder Linear(D -> 1): VPU broadcast-multiply + lane reduce ----
        out_ref[...] = (jnp.sum(h * vrow(1), axis=-1, keepdims=True)
                        + vec_ref[2:3, 0:1])

    return kernel


# ----------------------------- wrapper / glue --------------------------------

def _full_spec(shape):
    if len(shape) == 2:
        return pl.BlockSpec(shape, lambda i: (0, 0))
    return pl.BlockSpec(shape, lambda i: (0, 0, 0))


def transformer_forward(x_sbi, packed, pe, *, nhead=4):
    S, B, I = x_sbi.shape
    D = pe.shape[1]
    L = packed["w_attn"].shape[0]
    F = packed["w_ffn"].shape[2]
    NR = packed["vec_d"].shape[0]

    # Only batch slice B-1 reaches the output (decoder(x[:, -1, :]) with
    # batch_first=False picks the last *batch* element; self-attention never
    # mixes batch elements), so everything else is dead work.
    x_last = x_sbi[:, B - 1, :]                                     # (S, I)

    grid_spec = pltpu.PrefetchScalarGridSpec(
        num_scalar_prefetch=0,
        grid=(1,),                       # single step: all weights resident
        in_specs=[
            _full_spec((S, I)),          # x (last batch slice)
            _full_spec((S, D)),          # pe
            _full_spec((I, D)),          # enc_w            f32
            _full_spec((NR, D)),         # bias / LN slab   f32
            _full_spec((L, F)),          # f1_b             f32
            _full_spec((L, D, 4 * D)),   # [qkv_w | out_w]  bf16
            _full_spec((L, 2 * D, F)),   # [f1_w ; f2_w]    bf16 (f2 lane-dense)
        ],
        out_specs=_full_spec((S, 1)),
        scratch_shapes=[],
    )
    return pl.pallas_call(
        _make_kernel(nhead),
        out_shape=jax.ShapeDtypeStruct((S, 1), jnp.float32),
        grid_spec=grid_spec,
        compiler_params=pltpu.CompilerParams(
            dimension_semantics=("arbitrary",)),
    )(x_last, pe, packed["enc_w"], packed["vec_d"], packed["f1_b"],
      packed["w_attn"], packed["w_ffn"])


def positional_encoding(S, D):
    pos = jnp.arange(S, dtype=jnp.float32)[:, None]
    div = jnp.exp(jnp.arange(0, D, 2, dtype=jnp.float32) * (-math.log(10000.0) / D))
    pe = jnp.zeros((S, D), jnp.float32)
    pe = pe.at[:, 0::2].set(jnp.sin(pos * div))
    pe = pe.at[:, 1::2].set(jnp.cos(pos * div))
    return pe


def init_params(key, *, input_dim=1, d_model=64, num_layers=2, dim_ff=2048):
    """Weights of the heavy matmuls stored bf16 (halves weight DMA); everything
    else f32.  Matmul weights are pre-transposed to (K, N); f2_w is stored
    lane-dense as (D_out, F_in)."""
    D, L, F = d_model, num_layers, dim_ff
    ks = jax.random.split(key, 12)
    bf16 = jnp.bfloat16

    def u(k, shape, fan_in):
        b = 1.0 / math.sqrt(fan_in)
        return jax.random.uniform(k, shape, jnp.float32, -b, b)

    return dict(
        enc_w=u(ks[0], (input_dim, D), input_dim),          # (I, D) f32
        enc_b=u(ks[1], (D,), input_dim),
        qkv_w=u(ks[2], (L, D, 3 * D), D).astype(bf16),      # in_proj (K=D, N=3D)
        qkv_b=u(ks[3], (L, 3 * D), D),
        out_w=u(ks[4], (L, D, D), D).astype(bf16),          # out_proj (K=D, N=D)
        out_b=u(ks[5], (L, D), D),
        ln1_w=jnp.ones((L, D), jnp.float32),
        ln1_b=jnp.zeros((L, D), jnp.float32),
        ln2_w=jnp.ones((L, D), jnp.float32),
        ln2_b=jnp.zeros((L, D), jnp.float32),
        f1_w=u(ks[6], (L, D, F), D).astype(bf16),           # linear1 (K=D, N=F)
        f1_b=u(ks[7], (L, F), D),
        f2_w=u(ks[8], (L, D, F), F).astype(bf16),           # linear2 lane-dense (D, F)
        f2_b=u(ks[9], (L, D), F),
        dec_w=u(ks[10], (D,), D),                           # decoder Linear(D -> 1)
        dec_b=u(ks[11], (1,), D),
    )


def pack_params(params):
    """One-time packing (outside jit) into the kernel's consolidated slabs."""
    D = params["enc_w"].shape[1]
    L = params["qkv_w"].shape[0]
    bf16 = jnp.bfloat16

    rows = [params["enc_b"].reshape(1, D),
            params["dec_w"].reshape(1, D),
            jnp.broadcast_to(params["dec_b"].reshape(1, 1), (1, D))]
    for l in range(L):
        qb = params["qkv_b"][l]
        rows += [qb[0:D].reshape(1, D), qb[D:2 * D].reshape(1, D),
                 qb[2 * D:3 * D].reshape(1, D),
                 params["out_b"][l].reshape(1, D),
                 params["ln1_w"][l].reshape(1, D), params["ln1_b"][l].reshape(1, D),
                 params["ln2_w"][l].reshape(1, D), params["ln2_b"][l].reshape(1, D),
                 params["f2_b"][l].reshape(1, D)]
    vec_d = jnp.concatenate(rows, axis=0).astype(jnp.float32)       # (3+9L, D)

    w_attn = jnp.concatenate([params["qkv_w"], params["out_w"]],
                             axis=-1).astype(bf16)                   # (L, D, 4D)
    w_ffn = jnp.concatenate([params["f1_w"], params["f2_w"]],
                            axis=1).astype(bf16)                     # (L, 2D, F)
    return dict(enc_w=params["enc_w"].astype(jnp.float32),
                vec_d=vec_d,
                f1_b=params["f1_b"].astype(jnp.float32),
                w_attn=w_attn, w_ffn=w_ffn)


# ------------------------- pure-JAX reference check --------------------------
# Mirrors the kernel's mixed precision (bf16 weights, bf16 casts at the four
# weight matmuls, f32 everywhere else) so the 5e-3 check validates the kernel
# implementation rather than the (intentional) bf16 quantization.

def reference_forward(x_sbi, params, pe, *, nhead=4):
    S, B, _ = x_sbi.shape
    D = pe.shape[1]
    H, hd = nhead, D // nhead
    L = params["qkv_w"].shape[0]
    eps = 1e-5
    f32, bf16 = jnp.float32, jnp.bfloat16

    def ln(v, w, b):
        mu = jnp.mean(v, axis=-1, keepdims=True)
        var = jnp.mean((v - mu) ** 2, axis=-1, keepdims=True)
        return (v - mu) / jnp.sqrt(var + eps) * w + b

    h = jnp.einsum("sbi,id->sbd", x_sbi, params["enc_w"]) + params["enc_b"]
    h = h + pe[:, None, :]
    for l in range(L):
        qkv = jnp.einsum("sbd,de->sbe", h.astype(bf16), params["qkv_w"][l],
                         preferred_element_type=f32) + params["qkv_b"][l]
        q, k, v = qkv[..., :D], qkv[..., D:2 * D], qkv[..., 2 * D:]
        qh, kh, vh = (t.reshape(S, B, H, hd) for t in (q, k, v))
        sc = jnp.einsum("sbhe,tbhe->bhst", qh, kh) / math.sqrt(hd)
        a = jax.nn.softmax(sc, axis=-1)
        o = jnp.einsum("bhst,tbhe->sbhe", a, vh).reshape(S, B, D)
        o = jnp.einsum("sbd,de->sbe", o.astype(bf16), params["out_w"][l],
                       preferred_element_type=f32) + params["out_b"][l]
        h = ln(h + o, params["ln1_w"][l], params["ln1_b"][l])
        f = jax.nn.relu(jnp.einsum("sbd,df->sbf", h.astype(bf16), params["f1_w"][l],
                                   preferred_element_type=f32) + params["f1_b"][l])
        f = jnp.einsum("sbf,df->sbd", f.astype(bf16), params["f2_w"][l],
                       preferred_element_type=f32) + params["f2_b"][l]
        h = ln(h + f, params["ln2_w"][l], params["ln2_b"][l])
    last = h[:, -1, :]                      # x[:, -1, :] exactly as in the module
    return last @ params["dec_w"].reshape(D, 1) + params["dec_b"]


# ---------------------------------- main -------------------------------------

if __name__ == "__main__":
    S, B, I = 8, 2, 1                # seq, batch, input_dim
    D, H, L, F = 64, 4, 2, 2048      # module defaults (d_model, nhead, layers, ffn)

    key = jax.random.PRNGKey(0)
    kx, kp = jax.random.split(key)
    x = jax.random.normal(kx, (S, B, I), jnp.float32)
    params = init_params(kp, input_dim=I, d_model=D, num_layers=L, dim_ff=F)
    packed = pack_params(params)     # one-time slab packing, outside the jit
    pe = positional_encoding(S, D)

    fwd = jax.jit(functools.partial(transformer_forward, nhead=H))
    out = jax.block_until_ready(fwd(x, packed, pe))
    assert out.shape == (S, 1)

    ref = reference_forward(x, params, pe, nhead=H)
    if not jnp.allclose(out, ref, atol=5e-3, rtol=5e-3):
        raise AssertionError(
            f"kernel/reference mismatch, max abs err = {float(jnp.max(jnp.abs(out - ref)))}")

    print("KERNEL_OK")
</pallas_src>

<mosaic_0001>
module attributes {stable_mosaic.version = 11 : i64} {
  func.func @kernel(%arg0: i32, %arg1: memref<8x1xf32, #tpu.memory_space<vmem>>, %arg2: memref<8x64xf32, #tpu.memory_space<vmem>>, %arg3: memref<1x64xf32, #tpu.memory_space<vmem>>, %arg4: memref<21x64xf32, #tpu.memory_space<vmem>>, %arg5: memref<2x2048xf32, #tpu.memory_space<vmem>>, %arg6: memref<2x64x256xbf16, #tpu.memory_space<vmem>>, %arg7: memref<2x128x2048xbf16, #tpu.memory_space<vmem>>, %arg8: memref<8x1xf32, #tpu.memory_space<vmem>>) attributes {dimension_semantics = [#tpu.dimension_semantics<arbitrary>], iteration_bounds = array<i64: 1>, scalar_prefetch = 0 : i64, scratch_operands = 0 : i64, tpu.core_type = #tpu.core_type<tc>, window_params = [{pipeline_mode = #tpu.pipeline_mode<synchronous>, transform_indices = @transform_0, window_bounds = array<i64: 8, 1>}, {pipeline_mode = #tpu.pipeline_mode<synchronous>, transform_indices = @transform_1, window_bounds = array<i64: 8, 64>}, {pipeline_mode = #tpu.pipeline_mode<synchronous>, transform_indices = @transform_2, window_bounds = array<i64: 1, 64>}, {pipeline_mode = #tpu.pipeline_mode<synchronous>, transform_indices = @transform_3, window_bounds = array<i64: 21, 64>}, {pipeline_mode = #tpu.pipeline_mode<synchronous>, transform_indices = @transform_4, window_bounds = array<i64: 2, 2048>}, {pipeline_mode = #tpu.pipeline_mode<synchronous>, transform_indices = @transform_5, window_bounds = array<i64: 2, 64, 256>}, {pipeline_mode = #tpu.pipeline_mode<synchronous>, transform_indices = @transform_6, window_bounds = array<i64: 2, 128, 2048>}, {pipeline_mode = #tpu.pipeline_mode<synchronous>, transform_indices = @transform_7, window_bounds = array<i64: 8, 1>}]} {
    %c0 = arith.constant 0 : index
    %c0_0 = arith.constant 0 : index
    %0 = vector.load %arg1[%c0, %c0_0] : memref<8x1xf32, #tpu.memory_space<vmem>>, vector<8x1xf32>
    %c0_1 = arith.constant 0 : index
    %c0_2 = arith.constant 0 : index
    %1 = vector.load %arg3[%c0_1, %c0_2] : memref<1x64xf32, #tpu.memory_space<vmem>>, vector<1x64xf32>
    %2 = vector.broadcast %0 : vector<8x1xf32> to vector<8x64xf32>
    %3 = vector.broadcast %1 : vector<1x64xf32> to vector<8x64xf32>
    %4 = arith.mulf %2, %3 : vector<8x64xf32>
    %c0_3 = arith.constant 0 : index
    %c0_4 = arith.constant 0 : index
    %5 = vector.load %arg4[%c0_3, %c0_4] : memref<21x64xf32, #tpu.memory_space<vmem>>, vector<1x64xf32>
    %6 = vector.broadcast %5 : vector<1x64xf32> to vector<8x64xf32>
    %7 = arith.addf %4, %6 : vector<8x64xf32>
    %c0_5 = arith.constant 0 : index
    %c0_6 = arith.constant 0 : index
    %8 = vector.load %arg2[%c0_5, %c0_6] : memref<8x64xf32, #tpu.memory_space<vmem>>, vector<8x64xf32>
    %9 = arith.addf %7, %8 : vector<8x64xf32>
    %10 = arith.truncf %9 : vector<8x64xf32> to vector<8x64xbf16>
    %c0_7 = arith.constant 0 : index
    %c0_8 = arith.constant 0 : index
    %c0_9 = arith.constant 0 : index
    %11 = vector.load %arg6[%c0_7, %c0_8, %c0_9] : memref<2x64x256xbf16, #tpu.memory_space<vmem>>, vector<1x64x192xbf16>
    %12 = vector.shape_cast %11 : vector<1x64x192xbf16> to vector<64x192xbf16>
    %cst = arith.constant dense<0.000000e+00> : vector<8x192xf32>
    %13 = tpu.matmul %10, %12, %cst {dimension_numbers = #tpu.dot_dimension_numbers<[1], [0], [0], [1], [0, 0, 1, 1], [], []>} : vector<8x64xbf16>, vector<64x192xbf16>, vector<8x192xf32> -> vector<8x192xf32>
    %14 = vector.extract_strided_slice %13 {offsets = [0, 0], sizes = [8, 64], strides = [1, 1]} : vector<8x192xf32> to vector<8x64xf32>
    %c3 = arith.constant 3 : index
    %c0_10 = arith.constant 0 : index
    %15 = vector.load %arg4[%c3, %c0_10] : memref<21x64xf32, #tpu.memory_space<vmem>>, vector<1x64xf32>
    %16 = vector.broadcast %15 : vector<1x64xf32> to vector<8x64xf32>
    %17 = arith.addf %14, %16 : vector<8x64xf32>
    %18 = vector.extract_strided_slice %13 {offsets = [0, 64], sizes = [8, 64], strides = [1, 1]} : vector<8x192xf32> to vector<8x64xf32>
    %c4 = arith.constant 4 : index
    %c0_11 = arith.constant 0 : index
    %19 = vector.load %arg4[%c4, %c0_11] : memref<21x64xf32, #tpu.memory_space<vmem>>, vector<1x64xf32>
    %20 = vector.broadcast %19 : vector<1x64xf32> to vector<8x64xf32>
    %21 = arith.addf %18, %20 : vector<8x64xf32>
    %22 = vector.extract_strided_slice %13 {offsets = [0, 128], sizes = [8, 64], strides = [1, 1]} : vector<8x192xf32> to vector<8x64xf32>
    %c5 = arith.constant 5 : index
    %c0_12 = arith.constant 0 : index
    %23 = vector.load %arg4[%c5, %c0_12] : memref<21x64xf32, #tpu.memory_space<vmem>>, vector<1x64xf32>
    %24 = vector.broadcast %23 : vector<1x64xf32> to vector<8x64xf32>
    %25 = arith.addf %22, %24 : vector<8x64xf32>
    %c0_13 = arith.constant 0 : index
    %c0_14 = arith.constant 0 : index
    %c192 = arith.constant 192 : index
    %26 = vector.load %arg6[%c0_13, %c0_14, %c192] : memref<2x64x256xbf16, #tpu.memory_space<vmem>>, vector<1x64x64xbf16>
    %27 = vector.shape_cast %26 : vector<1x64x64xbf16> to vector<64x64xbf16>
    %cst_15 = arith.constant 0.000000e+00 : f32
    %28 = vector.broadcast %cst_15 : f32 to vector<8x64xf32>
    %29 = vector.extract_strided_slice %17 {offsets = [0, 0], sizes = [8, 16], strides = [1, 1]} : vector<8x64xf32> to vector<8x16xf32>
    %30 = vector.extract_strided_slice %21 {offsets = [0, 0], sizes = [8, 16], strides = [1, 1]} : vector<8x64xf32> to vector<8x16xf32>
    %31 = vector.extract_strided_slice %25 {offsets = [0, 0], sizes = [8, 16], strides = [1, 1]} : vector<8x64xf32> to vector<8x16xf32>
    %cst_16 = arith.constant dense<0.000000e+00> : vector<8x8xf32>
    %32 = tpu.matmul %29, %30, %cst_16 {dimension_numbers = #tpu.dot_dimension_numbers<[1], [1], [0], [0], [0, 0, 1, 0], [], []>} : vector<8x16xf32>, vector<8x16xf32>, vector<8x8xf32> -> vector<8x8xf32>
    %cst_17 = arith.constant 2.500000e-01 : f32
    %33 = vector.broadcast %cst_17 : f32 to vector<8x8xf32>
    %34 = arith.mulf %32, %33 : vector<8x8xf32>
    %cst_18 = arith.constant dense<0xFF800000> : vector<8xf32>
    %35 = vector.multi_reduction <maximumf>, %34, %cst_18 [1] : vector<8x8xf32> to vector<8xf32>
    %36 = vector.shape_cast %35 : vector<8xf32> to vector<8x1xf32>
    %37 = vector.broadcast %36 : vector<8x1xf32> to vector<8x8xf32>
    %38 = arith.subf %34, %37 : vector<8x8xf32>
    %39 = math.exp %38 : vector<8x8xf32>
    %cst_19 = arith.constant dense<0.000000e+00> : vector<8xf32>
    %40 = vector.multi_reduction <add>, %39, %cst_19 [1] : vector<8x8xf32> to vector<8xf32>
    %41 = vector.shape_cast %40 : vector<8xf32> to vector<8x1xf32>
    %42 = tpu.reciprocal %41 : vector<8x1xf32> -> vector<8x1xf32>
    %43 = vector.broadcast %42 : vector<8x1xf32> to vector<8x8xf32>
    %44 = arith.mulf %39, %43 : vector<8x8xf32>
    %cst_20 = arith.constant dense<0.000000e+00> : vector<8x16xf32>
    %45 = tpu.matmul %44, %31, %cst_20 {dimension_numbers = #tpu.dot_dimension_numbers<[1], [0], [0], [1], [0, 0, 1, 1], [], []>} : vector<8x8xf32>, vector<8x16xf32>, vector<8x16xf32> -> vector<8x16xf32>
    %46 = arith.truncf %45 : vector<8x16xf32> to vector<8x16xbf16>
    %47 = vector.extract_strided_slice %27 {offsets = [0, 0], sizes = [16, 64], strides = [1, 1]} : vector<64x64xbf16> to vector<16x64xbf16>
    %cst_21 = arith.constant dense<0.000000e+00> : vector<8x64xf32>
    %48 = tpu.matmul %46, %47, %cst_21 {dimension_numbers = #tpu.dot_dimension_numbers<[1], [0], [0], [1], [0, 0, 1, 1], [], []>} : vector<8x16xbf16>, vector<16x64xbf16>, vector<8x64xf32> -> vector<8x64xf32>
    %49 = arith.addf %28, %48 : vector<8x64xf32>
    %50 = vector.extract_strided_slice %17 {offsets = [0, 16], sizes = [8, 16], strides = [1, 1]} : vector<8x64xf32> to vector<8x16xf32>
    %51 = vector.extract_strided_slice %21 {offsets = [0, 16], sizes = [8, 16], strides = [1, 1]} : vector<8x64xf32> to vector<8x16xf32>
    %52 = vector.extract_strided_slice %25 {offsets = [0, 16], sizes = [8, 16], strides = [1, 1]} : vector<8x64xf32> to vector<8x16xf32>
    %cst_22 = arith.constant dense<0.000000e+00> : vector<8x8xf32>
    %53 = tpu.matmul %50, %51, %cst_22 {dimension_numbers = #tpu.dot_dimension_numbers<[1], [1], [0], [0], [0, 0, 1, 0], [], []>} : vector<8x16xf32>, vector<8x16xf32>, vector<8x8xf32> -> vector<8x8xf32>
    %cst_23 = arith.constant 2.500000e-01 : f32
    %54 = vector.broadcast %cst_23 : f32 to vector<8x8xf32>
    %55 = arith.mulf %53, %54 : vector<8x8xf32>
    %cst_24 = arith.constant dense<0xFF800000> : vector<8xf32>
    %56 = vector.multi_reduction <maximumf>, %55, %cst_24 [1] : vector<8x8xf32> to vector<8xf32>
    %57 = vector.shape_cast %56 : vector<8xf32> to vector<8x1xf32>
    %58 = vector.broadcast %57 : vector<8x1xf32> to vector<8x8xf32>
    %59 = arith.subf %55, %58 : vector<8x8xf32>
    %60 = math.exp %59 : vector<8x8xf32>
    %cst_25 = arith.constant dense<0.000000e+00> : vector<8xf32>
    %61 = vector.multi_reduction <add>, %60, %cst_25 [1] : vector<8x8xf32> to vector<8xf32>
    %62 = vector.shape_cast %61 : vector<8xf32> to vector<8x1xf32>
    %63 = tpu.reciprocal %62 : vector<8x1xf32> -> vector<8x1xf32>
    %64 = vector.broadcast %63 : vector<8x1xf32> to vector<8x8xf32>
    %65 = arith.mulf %60, %64 : vector<8x8xf32>
    %cst_26 = arith.constant dense<0.000000e+00> : vector<8x16xf32>
    %66 = tpu.matmul %65, %52, %cst_26 {dimension_numbers = #tpu.dot_dimension_numbers<[1], [0], [0], [1], [0, 0, 1, 1], [], []>} : vector<8x8xf32>, vector<8x16xf32>, vector<8x16xf32> -> vector<8x16xf32>
    %67 = arith.truncf %66 : vector<8x16xf32> to vector<8x16xbf16>
    %68 = vector.extract_strided_slice %27 {offsets = [16, 0], sizes = [16, 64], strides = [1, 1]} : vector<64x64xbf16> to vector<16x64xbf16>
    %cst_27 = arith.constant dense<0.000000e+00> : vector<8x64xf32>
    %69 = tpu.matmul %67, %68, %cst_27 {dimension_numbers = #tpu.dot_dimension_numbers<[1], [0], [0], [1], [0, 0, 1, 1], [], []>} : vector<8x16xbf16>, vector<16x64xbf16>, vector<8x64xf32> -> vector<8x64xf32>
    %70 = arith.addf %49, %69 : vector<8x64xf32>
    %71 = vector.extract_strided_slice %17 {offsets = [0, 32], sizes = [8, 16], strides = [1, 1]} : vector<8x64xf32> to vector<8x16xf32>
    %72 = vector.extract_strided_slice %21 {offsets = [0, 32], sizes = [8, 16], strides = [1, 1]} : vector<8x64xf32> to vector<8x16xf32>
    %73 = vector.extract_strided_slice %25 {offsets = [0, 32], sizes = [8, 16], strides = [1, 1]} : vector<8x64xf32> to vector<8x16xf32>
    %cst_28 = arith.constant dense<0.000000e+00> : vector<8x8xf32>
    %74 = tpu.matmul %71, %72, %cst_28 {dimension_numbers = #tpu.dot_dimension_numbers<[1], [1], [0], [0], [0, 0, 1, 0], [], []>} : vector<8x16xf32>, vector<8x16xf32>, vector<8x8xf32> -> vector<8x8xf32>
    %cst_29 = arith.constant 2.500000e-01 : f32
    %75 = vector.broadcast %cst_29 : f32 to vector<8x8xf32>
    %76 = arith.mulf %74, %75 : vector<8x8xf32>
    %cst_30 = arith.constant dense<0xFF800000> : vector<8xf32>
    %77 = vector.multi_reduction <maximumf>, %76, %cst_30 [1] : vector<8x8xf32> to vector<8xf32>
    %78 = vector.shape_cast %77 : vector<8xf32> to vector<8x1xf32>
    %79 = vector.broadcast %78 : vector<8x1xf32> to vector<8x8xf32>
    %80 = arith.subf %76, %79 : vector<8x8xf32>
    %81 = math.exp %80 : vector<8x8xf32>
    %cst_31 = arith.constant dense<0.000000e+00> : vector<8xf32>
    %82 = vector.multi_reduction <add>, %81, %cst_31 [1] : vector<8x8xf32> to vector<8xf32>
    %83 = vector.shape_cast %82 : vector<8xf32> to vector<8x1xf32>
    %84 = tpu.reciprocal %83 : vector<8x1xf32> -> vector<8x1xf32>
    %85 = vector.broadcast %84 : vector<8x1xf32> to vector<8x8xf32>
    %86 = arith.mulf %81, %85 : vector<8x8xf32>
    %cst_32 = arith.constant dense<0.000000e+00> : vector<8x16xf32>
    %87 = tpu.matmul %86, %73, %cst_32 {dimension_numbers = #tpu.dot_dimension_numbers<[1], [0], [0], [1], [0, 0, 1, 1], [], []>} : vector<8x8xf32>, vector<8x16xf32>, vector<8x16xf32> -> vector<8x16xf32>
    %88 = arith.truncf %87 : vector<8x16xf32> to vector<8x16xbf16>
    %89 = vector.extract_strided_slice %27 {offsets = [32, 0], sizes = [16, 64], strides = [1, 1]} : vector<64x64xbf16> to vector<16x64xbf16>
    %cst_33 = arith.constant dense<0.000000e+00> : vector<8x64xf32>
    %90 = tpu.matmul %88, %89, %cst_33 {dimension_numbers = #tpu.dot_dimension_numbers<[1], [0], [0], [1], [0, 0, 1, 1], [], []>} : vector<8x16xbf16>, vector<16x64xbf16>, vector<8x64xf32> -> vector<8x64xf32>
    %91 = arith.addf %70, %90 : vector<8x64xf32>
    %92 = vector.extract_strided_slice %17 {offsets = [0, 48], sizes = [8, 16], strides = [1, 1]} : vector<8x64xf32> to vector<8x16xf32>
    %93 = vector.extract_strided_slice %21 {offsets = [0, 48], sizes = [8, 16], strides = [1, 1]} : vector<8x64xf32> to vector<8x16xf32>
    %94 = vector.extract_strided_slice %25 {offsets = [0, 48], sizes = [8, 16], strides = [1, 1]} : vector<8x64xf32> to vector<8x16xf32>
    %cst_34 = arith.constant dense<0.000000e+00> : vector<8x8xf32>
    %95 = tpu.matmul %92, %93, %cst_34 {dimension_numbers = #tpu.dot_dimension_numbers<[1], [1], [0], [0], [0, 0, 1, 0], [], []>} : vector<8x16xf32>, vector<8x16xf32>, vector<8x8xf32> -> vector<8x8xf32>
    %cst_35 = arith.constant 2.500000e-01 : f32
    %96 = vector.broadcast %cst_35 : f32 to vector<8x8xf32>
    %97 = arith.mulf %95, %96 : vector<8x8xf32>
    %cst_36 = arith.constant dense<0xFF800000> : vector<8xf32>
    %98 = vector.multi_reduction <maximumf>, %97, %cst_36 [1] : vector<8x8xf32> to vector<8xf32>
    %99 = vector.shape_cast %98 : vector<8xf32> to vector<8x1xf32>
    %100 = vector.broadcast %99 : vector<8x1xf32> to vector<8x8xf32>
    %101 = arith.subf %97, %100 : vector<8x8xf32>
    %102 = math.exp %101 : vector<8x8xf32>
    %cst_37 = arith.constant dense<0.000000e+00> : vector<8xf32>
    %103 = vector.multi_reduction <add>, %102, %cst_37 [1] : vector<8x8xf32> to vector<8xf32>
    %104 = vector.shape_cast %103 : vector<8xf32> to vector<8x1xf32>
    %105 = tpu.reciprocal %104 : vector<8x1xf32> -> vector<8x1xf32>
    %106 = vector.broadcast %105 : vector<8x1xf32> to vector<8x8xf32>
    %107 = arith.mulf %102, %106 : vector<8x8xf32>
    %cst_38 = arith.constant dense<0.000000e+00> : vector<8x16xf32>
    %108 = tpu.matmul %107, %94, %cst_38 {dimension_numbers = #tpu.dot_dimension_numbers<[1], [0], [0], [1], [0, 0, 1, 1], [], []>} : vector<8x8xf32>, vector<8x16xf32>, vector<8x16xf32> -> vector<8x16xf32>
    %109 = arith.truncf %108 : vector<8x16xf32> to vector<8x16xbf16>
    %110 = vector.extract_strided_slice %27 {offsets = [48, 0], sizes = [16, 64], strides = [1, 1]} : vector<64x64xbf16> to vector<16x64xbf16>
    %cst_39 = arith.constant dense<0.000000e+00> : vector<8x64xf32>
    %111 = tpu.matmul %109, %110, %cst_39 {dimension_numbers = #tpu.dot_dimension_numbers<[1], [0], [0], [1], [0, 0, 1, 1], [], []>} : vector<8x16xbf16>, vector<16x64xbf16>, vector<8x64xf32> -> vector<8x64xf32>
    %112 = arith.addf %91, %111 : vector<8x64xf32>
    %c6 = arith.constant 6 : index
    %c0_40 = arith.constant 0 : index
    %113 = vector.load %arg4[%c6, %c0_40] : memref<21x64xf32, #tpu.memory_space<vmem>>, vector<1x64xf32>
    %114 = vector.broadcast %113 : vector<1x64xf32> to vector<8x64xf32>
    %115 = arith.addf %112, %114 : vector<8x64xf32>
    %116 = arith.addf %9, %115 : vector<8x64xf32>
    %c7 = arith.constant 7 : index
    %c0_41 = arith.constant 0 : index
    %117 = vector.load %arg4[%c7, %c0_41] : memref<21x64xf32, #tpu.memory_space<vmem>>, vector<1x64xf32>
    %c8 = arith.constant 8 : index
    %c0_42 = arith.constant 0 : index
    %118 = vector.load %arg4[%c8, %c0_42] : memref<21x64xf32, #tpu.memory_space<vmem>>, vector<1x64xf32>
    %cst_43 = arith.constant dense<0.000000e+00> : vector<8xf32>
    %119 = vector.multi_reduction <add>, %116, %cst_43 [1] : vector<8x64xf32> to vector<8xf32>
    %120 = vector.shape_cast %119 : vector<8xf32> to vector<8x1xf32>
    %cst_44 = arith.constant 6.400000e+01 : f32
    %121 = vector.broadcast %cst_44 : f32 to vector<8x1xf32>
    %122 = arith.divf %120, %121 : vector<8x1xf32>
    %123 = vector.broadcast %122 : vector<8x1xf32> to vector<8x64xf32>
    %124 = arith.subf %116, %123 : vector<8x64xf32>
    %125 = arith.mulf %124, %124 : vector<8x64xf32>
    %cst_45 = arith.constant dense<0.000000e+00> : vector<8xf32>
    %126 = vector.multi_reduction <add>, %125, %cst_45 [1] : vector<8x64xf32> to vector<8xf32>
    %127 = vector.shape_cast %126 : vector<8xf32> to vector<8x1xf32>
    %cst_46 = arith.constant 6.400000e+01 : f32
    %128 = vector.broadcast %cst_46 : f32 to vector<8x1xf32>
    %129 = arith.divf %127, %128 : vector<8x1xf32>
    %130 = vector.broadcast %122 : vector<8x1xf32> to vector<8x64xf32>
    %131 = arith.subf %116, %130 : vector<8x64xf32>
    %cst_47 = arith.constant 9.99999974E-6 : f32
    %132 = vector.broadcast %cst_47 : f32 to vector<8x1xf32>
    %133 = arith.addf %129, %132 : vector<8x1xf32>
    %134 = math.rsqrt %133 : vector<8x1xf32>
    %135 = vector.broadcast %134 : vector<8x1xf32> to vector<8x64xf32>
    %136 = arith.mulf %131, %135 : vector<8x64xf32>
    %137 = vector.broadcast %117 : vector<1x64xf32> to vector<8x64xf32>
    %138 = arith.mulf %136, %137 : vector<8x64xf32>
    %139 = vector.broadcast %118 : vector<1x64xf32> to vector<8x64xf32>
    %140 = arith.addf %138, %139 : vector<8x64xf32>
    %141 = arith.truncf %140 : vector<8x64xf32> to vector<8x64xbf16>
    %c0_48 = arith.constant 0 : index
    %c0_49 = arith.constant 0 : index
    %c0_50 = arith.constant 0 : index
    %142 = vector.load %arg7[%c0_48, %c0_49, %c0_50] : memref<2x128x2048xbf16, #tpu.memory_space<vmem>>, vector<1x64x2048xbf16>
    %143 = vector.shape_cast %142 : vector<1x64x2048xbf16> to vector<64x2048xbf16>
    %cst_51 = arith.constant dense<0.000000e+00> : vector<8x2048xf32>
    %144 = tpu.matmul %141, %143, %cst_51 {dimension_numbers = #tpu.dot_dimension_numbers<[1], [0], [0], [1], [0, 0, 1, 1], [], []>} : vector<8x64xbf16>, vector<64x2048xbf16>, vector<8x2048xf32> -> vector<8x2048xf32>
    %c0_52 = arith.constant 0 : index
    %c0_53 = arith.constant 0 : index
    %145 = vector.load %arg5[%c0_52, %c0_53] : memref<2x2048xf32, #tpu.memory_space<vmem>>, vector<1x2048xf32>
    %146 = vector.broadcast %145 : vector<1x2048xf32> to vector<8x2048xf32>
    %147 = arith.addf %144, %146 : vector<8x2048xf32>
    %cst_54 = arith.constant 0.000000e+00 : f32
    %148 = vector.broadcast %cst_54 : f32 to vector<8x2048xf32>
    %149 = arith.maximumf %147, %148 : vector<8x2048xf32>
    %150 = arith.truncf %149 : vector<8x2048xf32> to vector<8x2048xbf16>
    %c0_55 = arith.constant 0 : index
    %c64 = arith.constant 64 : index
    %c0_56 = arith.constant 0 : index
    %151 = vector.load %arg7[%c0_55, %c64, %c0_56] : memref<2x128x2048xbf16, #tpu.memory_space<vmem>>, vector<1x64x2048xbf16>
    %152 = vector.shape_cast %151 : vector<1x64x2048xbf16> to vector<64x2048xbf16>
    %cst_57 = arith.constant dense<0.000000e+00> : vector<8x64xf32>
    %153 = tpu.matmul %150, %152, %cst_57 {dimension_numbers = #tpu.dot_dimension_numbers<[1], [1], [0], [0], [0, 0, 1, 0], [], []>} : vector<8x2048xbf16>, vector<64x2048xbf16>, vector<8x64xf32> -> vector<8x64xf32>
    %c11 = arith.constant 11 : index
    %c0_58 = arith.constant 0 : index
    %154 = vector.load %arg4[%c11, %c0_58] : memref<21x64xf32, #tpu.memory_space<vmem>>, vector<1x64xf32>
    %155 = vector.broadcast %154 : vector<1x64xf32> to vector<8x64xf32>
    %156 = arith.addf %153, %155 : vector<8x64xf32>
    %157 = arith.addf %140, %156 : vector<8x64xf32>
    %c9 = arith.constant 9 : index
    %c0_59 = arith.constant 0 : index
    %158 = vector.load %arg4[%c9, %c0_59] : memref<21x64xf32, #tpu.memory_space<vmem>>, vector<1x64xf32>
    %c10 = arith.constant 10 : index
    %c0_60 = arith.constant 0 : index
    %159 = vector.load %arg4[%c10, %c0_60] : memref<21x64xf32, #tpu.memory_space<vmem>>, vector<1x64xf32>
    %cst_61 = arith.constant dense<0.000000e+00> : vector<8xf32>
    %160 = vector.multi_reduction <add>, %157, %cst_61 [1] : vector<8x64xf32> to vector<8xf32>
    %161 = vector.shape_cast %160 : vector<8xf32> to vector<8x1xf32>
    %cst_62 = arith.constant 6.400000e+01 : f32
    %162 = vector.broadcast %cst_62 : f32 to vector<8x1xf32>
    %163 = arith.divf %161, %162 : vector<8x1xf32>
    %164 = vector.broadcast %163 : vector<8x1xf32> to vector<8x64xf32>
    %165 = arith.subf %157, %164 : vector<8x64xf32>
    %166 = arith.mulf %165, %165 : vector<8x64xf32>
    %cst_63 = arith.constant dense<0.000000e+00> : vector<8xf32>
    %167 = vector.multi_reduction <add>, %166, %cst_63 [1] : vector<8x64xf32> to vector<8xf32>
    %168 = vector.shape_cast %167 : vector<8xf32> to vector<8x1xf32>
    %cst_64 = arith.constant 6.400000e+01 : f32
    %169 = vector.broadcast %cst_64 : f32 to vector<8x1xf32>
    %170 = arith.divf %168, %169 : vector<8x1xf32>
    %171 = vector.broadcast %163 : vector<8x1xf32> to vector<8x64xf32>
    %172 = arith.subf %157, %171 : vector<8x64xf32>
    %cst_65 = arith.constant 9.99999974E-6 : f32
    %173 = vector.broadcast %cst_65 : f32 to vector<8x1xf32>
    %174 = arith.addf %170, %173 : vector<8x1xf32>
    %175 = math.rsqrt %174 : vector<8x1xf32>
    %176 = vector.broadcast %175 : vector<8x1xf32> to vector<8x64xf32>
    %177 = arith.mulf %172, %176 : vector<8x64xf32>
    %178 = vector.broadcast %158 : vector<1x64xf32> to vector<8x64xf32>
    %179 = arith.mulf %177, %178 : vector<8x64xf32>
    %180 = vector.broadcast %159 : vector<1x64xf32> to vector<8x64xf32>
    %181 = arith.addf %179, %180 : vector<8x64xf32>
    %182 = arith.truncf %181 : vector<8x64xf32> to vector<8x64xbf16>
    %c1 = arith.constant 1 : index
    %c0_66 = arith.constant 0 : index
    %c0_67 = arith.constant 0 : index
    %183 = vector.load %arg6[%c1, %c0_66, %c0_67] : memref<2x64x256xbf16, #tpu.memory_space<vmem>>, vector<1x64x192xbf16>
    %184 = vector.shape_cast %183 : vector<1x64x192xbf16> to vector<64x192xbf16>
    %cst_68 = arith.constant dense<0.000000e+00> : vector<8x192xf32>
    %185 = tpu.matmul %182, %184, %cst_68 {dimension_numbers = #tpu.dot_dimension_numbers<[1], [0], [0], [1], [0, 0, 1, 1], [], []>} : vector<8x64xbf16>, vector<64x192xbf16>, vector<8x192xf32> -> vector<8x192xf32>
    %186 = vector.extract_strided_slice %185 {offsets = [0, 0], sizes = [8, 64], strides = [1, 1]} : vector<8x192xf32> to vector<8x64xf32>
    %c12 = arith.constant 12 : index
    %c0_69 = arith.constant 0 : index
    %187 = vector.load %arg4[%c12, %c0_69] : memref<21x64xf32, #tpu.memory_space<vmem>>, vector<1x64xf32>
    %188 = vector.broadcast %187 : vector<1x64xf32> to vector<8x64xf32>
    %189 = arith.addf %186, %188 : vector<8x64xf32>
    %190 = vector.extract_strided_slice %185 {offsets = [0, 64], sizes = [8, 64], strides = [1, 1]} : vector<8x192xf32> to vector<8x64xf32>
    %c13 = arith.constant 13 : index
    %c0_70 = arith.constant 0 : index
    %191 = vector.load %arg4[%c13, %c0_70] : memref<21x64xf32, #tpu.memory_space<vmem>>, vector<1x64xf32>
    %192 = vector.broadcast %191 : vector<1x64xf32> to vector<8x64xf32>
    %193 = arith.addf %190, %192 : vector<8x64xf32>
    %194 = vector.extract_strided_slice %185 {offsets = [0, 128], sizes = [8, 64], strides = [1, 1]} : vector<8x192xf32> to vector<8x64xf32>
    %c14 = arith.constant 14 : index
    %c0_71 = arith.constant 0 : index
    %195 = vector.load %arg4[%c14, %c0_71] : memref<21x64xf32, #tpu.memory_space<vmem>>, vector<1x64xf32>
    %196 = vector.broadcast %195 : vector<1x64xf32> to vector<8x64xf32>
    %197 = arith.addf %194, %196 : vector<8x64xf32>
    %c1_72 = arith.constant 1 : index
    %c0_73 = arith.constant 0 : index
    %c192_74 = arith.constant 192 : index
    %198 = vector.load %arg6[%c1_72, %c0_73, %c192_74] : memref<2x64x256xbf16, #tpu.memory_space<vmem>>, vector<1x64x64xbf16>
    %199 = vector.shape_cast %198 : vector<1x64x64xbf16> to vector<64x64xbf16>
    %cst_75 = arith.constant 0.000000e+00 : f32
    %200 = vector.broadcast %cst_75 : f32 to vector<8x64xf32>
    %201 = vector.extract_strided_slice %189 {offsets = [0, 0], sizes = [8, 16], strides = [1, 1]} : vector<8x64xf32> to vector<8x16xf32>
    %202 = vector.extract_strided_slice %193 {offsets = [0, 0], sizes = [8, 16], strides = [1, 1]} : vector<8x64xf32> to vector<8x16xf32>
    %203 = vector.extract_strided_slice %197 {offsets = [0, 0], sizes = [8, 16], strides = [1, 1]} : vector<8x64xf32> to vector<8x16xf32>
    %cst_76 = arith.constant dense<0.000000e+00> : vector<8x8xf32>
    %204 = tpu.matmul %201, %202, %cst_76 {dimension_numbers = #tpu.dot_dimension_numbers<[1], [1], [0], [0], [0, 0, 1, 0], [], []>} : vector<8x16xf32>, vector<8x16xf32>, vector<8x8xf32> -> vector<8x8xf32>
    %cst_77 = arith.constant 2.500000e-01 : f32
    %205 = vector.broadcast %cst_77 : f32 to vector<8x8xf32>
    %206 = arith.mulf %204, %205 : vector<8x8xf32>
    %cst_78 = arith.constant dense<0xFF800000> : vector<8xf32>
    %207 = vector.multi_reduction <maximumf>, %206, %cst_78 [1] : vector<8x8xf32> to vector<8xf32>
    %208 = vector.shape_cast %207 : vector<8xf32> to vector<8x1xf32>
    %209 = vector.broadcast %208 : vector<8x1xf32> to vector<8x8xf32>
    %210 = arith.subf %206, %209 : vector<8x8xf32>
    %211 = math.exp %210 : vector<8x8xf32>
    %cst_79 = arith.constant dense<0.000000e+00> : vector<8xf32>
    %212 = vector.multi_reduction <add>, %211, %cst_79 [1] : vector<8x8xf32> to vector<8xf32>
    %213 = vector.shape_cast %212 : vector<8xf32> to vector<8x1xf32>
    %214 = tpu.reciprocal %213 : vector<8x1xf32> -> vector<8x1xf32>
    %215 = vector.broadcast %214 : vector<8x1xf32> to vector<8x8xf32>
    %216 = arith.mulf %211, %215 : vector<8x8xf32>
    %cst_80 = arith.constant dense<0.000000e+00> : vector<8x16xf32>
    %217 = tpu.matmul %216, %203, %cst_80 {dimension_numbers = #tpu.dot_dimension_numbers<[1], [0], [0], [1], [0, 0, 1, 1], [], []>} : vector<8x8xf32>, vector<8x16xf32>, vector<8x16xf32> -> vector<8x16xf32>
    %218 = arith.truncf %217 : vector<8x16xf32> to vector<8x16xbf16>
    %219 = vector.extract_strided_slice %199 {offsets = [0, 0], sizes = [16, 64], strides = [1, 1]} : vector<64x64xbf16> to vector<16x64xbf16>
    %cst_81 = arith.constant dense<0.000000e+00> : vector<8x64xf32>
    %220 = tpu.matmul %218, %219, %cst_81 {dimension_numbers = #tpu.dot_dimension_numbers<[1], [0], [0], [1], [0, 0, 1, 1], [], []>} : vector<8x16xbf16>, vector<16x64xbf16>, vector<8x64xf32> -> vector<8x64xf32>
    %221 = arith.addf %200, %220 : vector<8x64xf32>
    %222 = vector.extract_strided_slice %189 {offsets = [0, 16], sizes = [8, 16], strides = [1, 1]} : vector<8x64xf32> to vector<8x16xf32>
    %223 = vector.extract_strided_slice %193 {offsets = [0, 16], sizes = [8, 16], strides = [1, 1]} : vector<8x64xf32> to vector<8x16xf32>
    %224 = vector.extract_strided_slice %197 {offsets = [0, 16], sizes = [8, 16], strides = [1, 1]} : vector<8x64xf32> to vector<8x16xf32>
    %cst_82 = arith.constant dense<0.000000e+00> : vector<8x8xf32>
    %225 = tpu.matmul %222, %223, %cst_82 {dimension_numbers = #tpu.dot_dimension_numbers<[1], [1], [0], [0], [0, 0, 1, 0], [], []>} : vector<8x16xf32>, vector<8x16xf32>, vector<8x8xf32> -> vector<8x8xf32>
    %cst_83 = arith.constant 2.500000e-01 : f32
    %226 = vector.broadcast %cst_83 : f32 to vector<8x8xf32>
    %227 = arith.mulf %225, %226 : vector<8x8xf32>
    %cst_84 = arith.constant dense<0xFF800000> : vector<8xf32>
    %228 = vector.multi_reduction <maximumf>, %227, %cst_84 [1] : vector<8x8xf32> to vector<8xf32>
    %229 = vector.shape_cast %228 : vector<8xf32> to vector<8x1xf32>
    %230 = vector.broadcast %229 : vector<8x1xf32> to vector<8x8xf32>
    %231 = arith.subf %227, %230 : vector<8x8xf32>
    %232 = math.exp %231 : vector<8x8xf32>
    %cst_85 = arith.constant dense<0.000000e+00> : vector<8xf32>
    %233 = vector.multi_reduction <add>, %232, %cst_85 [1] : vector<8x8xf32> to vector<8xf32>
    %234 = vector.shape_cast %233 : vector<8xf32> to vector<8x1xf32>
    %235 = tpu.reciprocal %234 : vector<8x1xf32> -> vector<8x1xf32>
    %236 = vector.broadcast %235 : vector<8x1xf32> to vector<8x8xf32>
    %237 = arith.mulf %232, %236 : vector<8x8xf32>
    %cst_86 = arith.constant dense<0.000000e+00> : vector<8x16xf32>
    %238 = tpu.matmul %237, %224, %cst_86 {dimension_numbers = #tpu.dot_dimension_numbers<[1], [0], [0], [1], [0, 0, 1, 1], [], []>} : vector<8x8xf32>, vector<8x16xf32>, vector<8x16xf32> -> vector<8x16xf32>
    %239 = arith.truncf %238 : vector<8x16xf32> to vector<8x16xbf16>
    %240 = vector.extract_strided_slice %199 {offsets = [16, 0], sizes = [16, 64], strides = [1, 1]} : vector<64x64xbf16> to vector<16x64xbf16>
    %cst_87 = arith.constant dense<0.000000e+00> : vector<8x64xf32>
    %241 = tpu.matmul %239, %240, %cst_87 {dimension_numbers = #tpu.dot_dimension_numbers<[1], [0], [0], [1], [0, 0, 1, 1], [], []>} : vector<8x16xbf16>, vector<16x64xbf16>, vector<8x64xf32> -> vector<8x64xf32>
    %242 = arith.addf %221, %241 : vector<8x64xf32>
    %243 = vector.extract_strided_slice %189 {offsets = [0, 32], sizes = [8, 16], strides = [1, 1]} : vector<8x64xf32> to vector<8x16xf32>
    %244 = vector.extract_strided_slice %193 {offsets = [0, 32], sizes = [8, 16], strides = [1, 1]} : vector<8x64xf32> to vector<8x16xf32>
    %245 = vector.extract_strided_slice %197 {offsets = [0, 32], sizes = [8, 16], strides = [1, 1]} : vector<8x64xf32> to vector<8x16xf32>
    %cst_88 = arith.constant dense<0.000000e+00> : vector<8x8xf32>
    %246 = tpu.matmul %243, %244, %cst_88 {dimension_numbers = #tpu.dot_dimension_numbers<[1], [1], [0], [0], [0, 0, 1, 0], [], []>} : vector<8x16xf32>, vector<8x16xf32>, vector<8x8xf32> -> vector<8x8xf32>
    %cst_89 = arith.constant 2.500000e-01 : f32
    %247 = vector.broadcast %cst_89 : f32 to vector<8x8xf32>
    %248 = arith.mulf %246, %247 : vector<8x8xf32>
    %cst_90 = arith.constant dense<0xFF800000> : vector<8xf32>
    %249 = vector.multi_reduction <maximumf>, %248, %cst_90 [1] : vector<8x8xf32> to vector<8xf32>
    %250 = vector.shape_cast %249 : vector<8xf32> to vector<8x1xf32>
    %251 = vector.broadcast %250 : vector<8x1xf32> to vector<8x8xf32>
    %252 = arith.subf %248, %251 : vector<8x8xf32>
    %253 = math.exp %252 : vector<8x8xf32>
    %cst_91 = arith.constant dense<0.000000e+00> : vector<8xf32>
    %254 = vector.multi_reduction <add>, %253, %cst_91 [1] : vector<8x8xf32> to vector<8xf32>
    %255 = vector.shape_cast %254 : vector<8xf32> to vector<8x1xf32>
    %256 = tpu.reciprocal %255 : vector<8x1xf32> -> vector<8x1xf32>
    %257 = vector.broadcast %256 : vector<8x1xf32> to vector<8x8xf32>
    %258 = arith.mulf %253, %257 : vector<8x8xf32>
    %cst_92 = arith.constant dense<0.000000e+00> : vector<8x16xf32>
    %259 = tpu.matmul %258, %245, %cst_92 {dimension_numbers = #tpu.dot_dimension_numbers<[1], [0], [0], [1], [0, 0, 1, 1], [], []>} : vector<8x8xf32>, vector<8x16xf32>, vector<8x16xf32> -> vector<8x16xf32>
    %260 = arith.truncf %259 : vector<8x16xf32> to vector<8x16xbf16>
    %261 = vector.extract_strided_slice %199 {offsets = [32, 0], sizes = [16, 64], strides = [1, 1]} : vector<64x64xbf16> to vector<16x64xbf16>
    %cst_93 = arith.constant dense<0.000000e+00> : vector<8x64xf32>
    %262 = tpu.matmul %260, %261, %cst_93 {dimension_numbers = #tpu.dot_dimension_numbers<[1], [0], [0], [1], [0, 0, 1, 1], [], []>} : vector<8x16xbf16>, vector<16x64xbf16>, vector<8x64xf32> -> vector<8x64xf32>
    %263 = arith.addf %242, %262 : vector<8x64xf32>
    %264 = vector.extract_strided_slice %189 {offsets = [0, 48], sizes = [8, 16], strides = [1, 1]} : vector<8x64xf32> to vector<8x16xf32>
    %265 = vector.extract_strided_slice %193 {offsets = [0, 48], sizes = [8, 16], strides = [1, 1]} : vector<8x64xf32> to vector<8x16xf32>
    %266 = vector.extract_strided_slice %197 {offsets = [0, 48], sizes = [8, 16], strides = [1, 1]} : vector<8x64xf32> to vector<8x16xf32>
    %cst_94 = arith.constant dense<0.000000e+00> : vector<8x8xf32>
    %267 = tpu.matmul %264, %265, %cst_94 {dimension_numbers = #tpu.dot_dimension_numbers<[1], [1], [0], [0], [0, 0, 1, 0], [], []>} : vector<8x16xf32>, vector<8x16xf32>, vector<8x8xf32> -> vector<8x8xf32>
    %cst_95 = arith.constant 2.500000e-01 : f32
    %268 = vector.broadcast %cst_95 : f32 to vector<8x8xf32>
    %269 = arith.mulf %267, %268 : vector<8x8xf32>
    %cst_96 = arith.constant dense<0xFF800000> : vector<8xf32>
    %270 = vector.multi_reduction <maximumf>, %269, %cst_96 [1] : vector<8x8xf32> to vector<8xf32>
    %271 = vector.shape_cast %270 : vector<8xf32> to vector<8x1xf32>
    %272 = vector.broadcast %271 : vector<8x1xf32> to vector<8x8xf32>
    %273 = arith.subf %269, %272 : vector<8x8xf32>
    %274 = math.exp %273 : vector<8x8xf32>
    %cst_97 = arith.constant dense<0.000000e+00> : vector<8xf32>
    %275 = vector.multi_reduction <add>, %274, %cst_97 [1] : vector<8x8xf32> to vector<8xf32>
    %276 = vector.shape_cast %275 : vector<8xf32> to vector<8x1xf32>
    %277 = tpu.reciprocal %276 : vector<8x1xf32> -> vector<8x1xf32>
    %278 = vector.broadcast %277 : vector<8x1xf32> to vector<8x8xf32>
    %279 = arith.mulf %274, %278 : vector<8x8xf32>
    %cst_98 = arith.constant dense<0.000000e+00> : vector<8x16xf32>
    %280 = tpu.matmul %279, %266, %cst_98 {dimension_numbers = #tpu.dot_dimension_numbers<[1], [0], [0], [1], [0, 0, 1, 1], [], []>} : vector<8x8xf32>, vector<8x16xf32>, vector<8x16xf32> -> vector<8x16xf32>
    %281 = arith.truncf %280 : vector<8x16xf32> to vector<8x16xbf16>
    %282 = vector.extract_strided_slice %199 {offsets = [48, 0], sizes = [16, 64], strides = [1, 1]} : vector<64x64xbf16> to vector<16x64xbf16>
    %cst_99 = arith.constant dense<0.000000e+00> : vector<8x64xf32>
    %283 = tpu.matmul %281, %282, %cst_99 {dimension_numbers = #tpu.dot_dimension_numbers<[1], [0], [0], [1], [0, 0, 1, 1], [], []>} : vector<8x16xbf16>, vector<16x64xbf16>, vector<8x64xf32> -> vector<8x64xf32>
    %284 = arith.addf %263, %283 : vector<8x64xf32>
    %c15 = arith.constant 15 : index
    %c0_100 = arith.constant 0 : index
    %285 = vector.load %arg4[%c15, %c0_100] : memref<21x64xf32, #tpu.memory_space<vmem>>, vector<1x64xf32>
    %286 = vector.broadcast %285 : vector<1x64xf32> to vector<8x64xf32>
    %287 = arith.addf %284, %286 : vector<8x64xf32>
    %288 = arith.addf %181, %287 : vector<8x64xf32>
    %c16 = arith.constant 16 : index
    %c0_101 = arith.constant 0 : index
    %289 = vector.load %arg4[%c16, %c0_101] : memref<21x64xf32, #tpu.memory_space<vmem>>, vector<1x64xf32>
    %c17 = arith.constant 17 : index
    %c0_102 = arith.constant 0 : index
    %290 = vector.load %arg4[%c17, %c0_102] : memref<21x64xf32, #tpu.memory_space<vmem>>, vector<1x64xf32>
    %cst_103 = arith.constant dense<0.000000e+00> : vector<8xf32>
    %291 = vector.multi_reduction <add>, %288, %cst_103 [1] : vector<8x64xf32> to vector<8xf32>
    %292 = vector.shape_cast %291 : vector<8xf32> to vector<8x1xf32>
    %cst_104 = arith.constant 6.400000e+01 : f32
    %293 = vector.broadcast %cst_104 : f32 to vector<8x1xf32>
    %294 = arith.divf %292, %293 : vector<8x1xf32>
    %295 = vector.broadcast %294 : vector<8x1xf32> to vector<8x64xf32>
    %296 = arith.subf %288, %295 : vector<8x64xf32>
    %297 = arith.mulf %296, %296 : vector<8x64xf32>
    %cst_105 = arith.constant dense<0.000000e+00> : vector<8xf32>
    %298 = vector.multi_reduction <add>, %297, %cst_105 [1] : vector<8x64xf32> to vector<8xf32>
    %299 = vector.shape_cast %298 : vector<8xf32> to vector<8x1xf32>
    %cst_106 = arith.constant 6.400000e+01 : f32
    %300 = vector.broadcast %cst_106 : f32 to vector<8x1xf32>
    %301 = arith.divf %299, %300 : vector<8x1xf32>
    %302 = vector.broadcast %294 : vector<8x1xf32> to vector<8x64xf32>
    %303 = arith.subf %288, %302 : vector<8x64xf32>
    %cst_107 = arith.constant 9.99999974E-6 : f32
    %304 = vector.broadcast %cst_107 : f32 to vector<8x1xf32>
    %305 = arith.addf %301, %304 : vector<8x1xf32>
    %306 = math.rsqrt %305 : vector<8x1xf32>
    %307 = vector.broadcast %306 : vector<8x1xf32> to vector<8x64xf32>
    %308 = arith.mulf %303, %307 : vector<8x64xf32>
    %309 = vector.broadcast %289 : vector<1x64xf32> to vector<8x64xf32>
    %310 = arith.mulf %308, %309 : vector<8x64xf32>
    %311 = vector.broadcast %290 : vector<1x64xf32> to vector<8x64xf32>
    %312 = arith.addf %310, %311 : vector<8x64xf32>
    %313 = arith.truncf %312 : vector<8x64xf32> to vector<8x64xbf16>
    %c1_108 = arith.constant 1 : index
    %c0_109 = arith.constant 0 : index
    %c0_110 = arith.constant 0 : index
    %314 = vector.load %arg7[%c1_108, %c0_109, %c0_110] : memref<2x128x2048xbf16, #tpu.memory_space<vmem>>, vector<1x64x2048xbf16>
    %315 = vector.shape_cast %314 : vector<1x64x2048xbf16> to vector<64x2048xbf16>
    %cst_111 = arith.constant dense<0.000000e+00> : vector<8x2048xf32>
    %316 = tpu.matmul %313, %315, %cst_111 {dimension_numbers = #tpu.dot_dimension_numbers<[1], [0], [0], [1], [0, 0, 1, 1], [], []>} : vector<8x64xbf16>, vector<64x2048xbf16>, vector<8x2048xf32> -> vector<8x2048xf32>
    %c1_112 = arith.constant 1 : index
    %c0_113 = arith.constant 0 : index
    %317 = vector.load %arg5[%c1_112, %c0_113] : memref<2x2048xf32, #tpu.memory_space<vmem>>, vector<1x2048xf32>
    %318 = vector.broadcast %317 : vector<1x2048xf32> to vector<8x2048xf32>
    %319 = arith.addf %316, %318 : vector<8x2048xf32>
    %cst_114 = arith.constant 0.000000e+00 : f32
    %320 = vector.broadcast %cst_114 : f32 to vector<8x2048xf32>
    %321 = arith.maximumf %319, %320 : vector<8x2048xf32>
    %322 = arith.truncf %321 : vector<8x2048xf32> to vector<8x2048xbf16>
    %c1_115 = arith.constant 1 : index
    %c64_116 = arith.constant 64 : index
    %c0_117 = arith.constant 0 : index
    %323 = vector.load %arg7[%c1_115, %c64_116, %c0_117] : memref<2x128x2048xbf16, #tpu.memory_space<vmem>>, vector<1x64x2048xbf16>
    %324 = vector.shape_cast %323 : vector<1x64x2048xbf16> to vector<64x2048xbf16>
    %cst_118 = arith.constant dense<0.000000e+00> : vector<8x64xf32>
    %325 = tpu.matmul %322, %324, %cst_118 {dimension_numbers = #tpu.dot_dimension_numbers<[1], [1], [0], [0], [0, 0, 1, 0], [], []>} : vector<8x2048xbf16>, vector<64x2048xbf16>, vector<8x64xf32> -> vector<8x64xf32>
    %c20 = arith.constant 20 : index
    %c0_119 = arith.constant 0 : index
    %326 = vector.load %arg4[%c20, %c0_119] : memref<21x64xf32, #tpu.memory_space<vmem>>, vector<1x64xf32>
    %327 = vector.broadcast %326 : vector<1x64xf32> to vector<8x64xf32>
    %328 = arith.addf %325, %327 : vector<8x64xf32>
    %329 = arith.addf %312, %328 : vector<8x64xf32>
    %c18 = arith.constant 18 : index
    %c0_120 = arith.constant 0 : index
    %330 = vector.load %arg4[%c18, %c0_120] : memref<21x64xf32, #tpu.memory_space<vmem>>, vector<1x64xf32>
    %c19 = arith.constant 19 : index
    %c0_121 = arith.constant 0 : index
    %331 = vector.load %arg4[%c19, %c0_121] : memref<21x64xf32, #tpu.memory_space<vmem>>, vector<1x64xf32>
    %cst_122 = arith.constant dense<0.000000e+00> : vector<8xf32>
    %332 = vector.multi_reduction <add>, %329, %cst_122 [1] : vector<8x64xf32> to vector<8xf32>
    %333 = vector.shape_cast %332 : vector<8xf32> to vector<8x1xf32>
    %cst_123 = arith.constant 6.400000e+01 : f32
    %334 = vector.broadcast %cst_123 : f32 to vector<8x1xf32>
    %335 = arith.divf %333, %334 : vector<8x1xf32>
    %336 = vector.broadcast %335 : vector<8x1xf32> to vector<8x64xf32>
    %337 = arith.subf %329, %336 : vector<8x64xf32>
    %338 = arith.mulf %337, %337 : vector<8x64xf32>
    %cst_124 = arith.constant dense<0.000000e+00> : vector<8xf32>
    %339 = vector.multi_reduction <add>, %338, %cst_124 [1] : vector<8x64xf32> to vector<8xf32>
    %340 = vector.shape_cast %339 : vector<8xf32> to vector<8x1xf32>
    %cst_125 = arith.constant 6.400000e+01 : f32
    %341 = vector.broadcast %cst_125 : f32 to vector<8x1xf32>
    %342 = arith.divf %340, %341 : vector<8x1xf32>
    %343 = vector.broadcast %335 : vector<8x1xf32> to vector<8x64xf32>
    %344 = arith.subf %329, %343 : vector<8x64xf32>
    %cst_126 = arith.constant 9.99999974E-6 : f32
    %345 = vector.broadcast %cst_126 : f32 to vector<8x1xf32>
    %346 = arith.addf %342, %345 : vector<8x1xf32>
    %347 = math.rsqrt %346 : vector<8x1xf32>
    %348 = vector.broadcast %347 : vector<8x1xf32> to vector<8x64xf32>
    %349 = arith.mulf %344, %348 : vector<8x64xf32>
    %350 = vector.broadcast %330 : vector<1x64xf32> to vector<8x64xf32>
    %351 = arith.mulf %349, %350 : vector<8x64xf32>
    %352 = vector.broadcast %331 : vector<1x64xf32> to vector<8x64xf32>
    %353 = arith.addf %351, %352 : vector<8x64xf32>
    %c1_127 = arith.constant 1 : index
    %c0_128 = arith.constant 0 : index
    %354 = vector.load %arg4[%c1_127, %c0_128] : memref<21x64xf32, #tpu.memory_space<vmem>>, vector<1x64xf32>
    %355 = vector.broadcast %354 : vector<1x64xf32> to vector<8x64xf32>
    %356 = arith.mulf %353, %355 : vector<8x64xf32>
    %cst_129 = arith.constant dense<0.000000e+00> : vector<8xf32>
    %357 = vector.multi_reduction <add>, %356, %cst_129 [1] : vector<8x64xf32> to vector<8xf32>
    %358 = vector.shape_cast %357 : vector<8xf32> to vector<8x1xf32>
    %c2 = arith.constant 2 : index
    %c0_130 = arith.constant 0 : index
    %359 = vector.load %arg4[%c2, %c0_130] : memref<21x64xf32, #tpu.memory_space<vmem>>, vector<1x1xf32>
    %360 = vector.broadcast %359 : vector<1x1xf32> to vector<8x1xf32>
    %361 = arith.addf %358, %360 : vector<8x1xf32>
    %c0_131 = arith.constant 0 : index
    %c0_132 = arith.constant 0 : index
    %362 = vector.load %arg8[%c0_131, %c0_132] : memref<8x1xf32, #tpu.memory_space<vmem>>, vector<8x1xf32>
    tpu.vector_store %arg8[%c0_131, %c0_132], %361 {strides = array<i32>} : memref<8x1xf32, #tpu.memory_space<vmem>>, vector<8x1xf32>,
    return
  }
  func.func @transform_0(%arg0: i32) -> (i32, i32) {
    %c0_i32 = arith.constant 0 : i32
    %c0_i32_0 = arith.constant 0 : i32
    %c0_i32_1 = arith.constant 0 : i32
    return %c0_i32, %c0_i32_0 : i32, i32
  }
  func.func @transform_1(%arg0: i32) -> (i32, i32) {
    %c0_i32 = arith.constant 0 : i32
    %c0_i32_0 = arith.constant 0 : i32
    %c0_i32_1 = arith.constant 0 : i32
    return %c0_i32, %c0_i32_0 : i32, i32
  }
  func.func @transform_2(%arg0: i32) -> (i32, i32) {
    %c0_i32 = arith.constant 0 : i32
    %c0_i32_0 = arith.constant 0 : i32
    %c0_i32_1 = arith.constant 0 : i32
    return %c0_i32, %c0_i32_0 : i32, i32
  }
  func.func @transform_3(%arg0: i32) -> (i32, i32) {
    %c0_i32 = arith.constant 0 : i32
    %c0_i32_0 = arith.constant 0 : i32
    %c0_i32_1 = arith.constant 0 : i32
    return %c0_i32, %c0_i32_0 : i32, i32
  }
  func.func @transform_4(%arg0: i32) -> (i32, i32) {
    %c0_i32 = arith.constant 0 : i32
    %c0_i32_0 = arith.constant 0 : i32
    %c0_i32_1 = arith.constant 0 : i32
    return %c0_i32, %c0_i32_0 : i32, i32
  }
  func.func @transform_5(%arg0: i32) -> (i32, i32, i32) {
    %c0_i32 = arith.constant 0 : i32
    %c0_i32_0 = arith.constant 0 : i32
    %c0_i32_1 = arith.constant 0 : i32
    %c0_i32_2 = arith.constant 0 : i32
    return %c0_i32, %c0_i32_0, %c0_i32_1 : i32, i32, i32
  }
  func.func @transform_6(%arg0: i32) -> (i32, i32, i32) {
    %c0_i32 = arith.constant 0 : i32
    %c0_i32_0 = arith.constant 0 : i32
    %c0_i32_1 = arith.constant 0 : i32
    %c0_i32_2 = arith.constant 0 : i32
    return %c0_i32, %c0_i32_0, %c0_i32_1 : i32, i32, i32
  }
  func.func @transform_7(%arg0: i32) -> (i32, i32) {
    %c0_i32 = arith.constant 0 : i32
    %c0_i32_0 = arith.constant 0 : i32
    %c0_i32_1 = arith.constant 0 : i32
    return %c0_i32, %c0_i32_0 : i32, i32
  }
}

</mosaic_0001>

<bundles_post_ra>
// kernel: transformer_forward.1
= control target key start
LH: loop header
LB: loop body
LE: loop exit
PB: predicated region body
PF: predicated region fallthrough
CT: control target
= control target key end

     0   :  { %12 = vsyncpa [#allocation3], 0  ;;  %s5809_s0 = inlined_call_operand.vmem [shape: f32[8,1], index: 0, kind: input, shape index: {}]   ;;  %s5810_s1 = inlined_call_operand.vmem [shape: f32[8,64], index: 1, kind: input, shape index: {}]   ;;  %s5811_s2 = inlined_call_operand.vmem [shape: f32[1,64], index: 2, kind: input, shape index: {}]   ;;  %s5812_s3 = inlined_call_operand.hbm [shape: f32[21,64], index: 3, kind: input, shape index: {}]   ;;  %s5813_s4 = inlined_call_operand.hbm [shape: f32[2,2048], index: 4, kind: input, shape index: {}]   ;;  %s5814_s5 = inlined_call_operand.hbm [shape: bf16[2,64,256], index: 5, kind: input, shape index: {}]   ;;  %s5815_s6 = inlined_call_operand.hbm [shape: bf16[2,128,2048], index: 6, kind: input, shape index: {}]   ;;  %s5816_s7 = inlined_call_operand.vmem [shape: f32[8,1], index: 7, kind: output, shape index: {}]  }
   0x1   :  { %13 = vsyncpa [#allocation5], 0  ;;  %s39_s26 = sshll.u32 %s5813_s4, 4  ;;  %s40_s26 = int_to_ptr.hbm [resolvable:$true] %s39_s26 }
   0x2   :  { %14 = vsyncpa [#allocation8], 0  ;;  %s5456_s27 = smov [#allocation4]   ;;  %s25_s8 = sshll.u32 %s5812_s3, 4  ;;  %s26_s8 = int_to_ptr.hbm [resolvable:$true] %s25_s8 }
   0x3   :  { %s41_s28 = sshll.u32 %s5456_s27, 4  ;;  %s5457_s9 = smov [#allocation2]   ;;  %s42_s28 = int_to_ptr.vmem [resolvable:$true] %s41_s28 }
   0x4   :  { %44 = dma.hbm_to_vmem [thread:$0]  %s40_s26, 512, %s42_s28, [#allocation5]  }
   0x5   :  { %s27_s10 = sshll.u32 %s5457_s9, 4  ;;  %s5458_s11 = smov 128   ;;  %s28_s10 = int_to_ptr.vmem [resolvable:$true] %s27_s10 }
   0x6   :  { %s5459_s12 = smov 8   ;;  %s49_s4 = sshll.u32 %s5814_s5, 4  ;;  %s50_s4 = int_to_ptr.hbm [resolvable:$true] %s49_s4 }
   0x7   :  { %33 = dma.hbm_to_vmem [thread:$0]  %s26_s8, 384, %s28_s10, [#allocation3], %s5458_s11, %s5458_s11, %s5459_s12  }
   0x8   :  { %s5460_s15 = smov [#allocation6]   ;;  %s62_s3 = sshll.u32 %s5815_s6, 4  ;;  %s63_s3 = int_to_ptr.hbm [resolvable:$true] %s62_s3 }
   0x9   :  { %s51_s16 = sshll.u32 %s5460_s15, 4  ;;  %s5461_s19 = smov [#allocation7]   ;;  %s52_s16 = int_to_ptr.vmem [resolvable:$true] %s51_s16 }
   0xa   :  { %57 = dma.hbm_to_vmem [thread:$0]  %s50_s4, 2048, %s52_s16, [#allocation5], %s5458_s11, %s5458_s11, %s5459_s12  }
   0xb   :  { %s64_s20 = sshll.u32 %s5461_s19, 4  ;;  %s5462_s21 = smov 1024   ;;  %s65_s20 = int_to_ptr.vmem [resolvable:$true] %s64_s20 }
   0xc   :  { %s5463_s22 = smov 64  }
   0xd   :  { %70 = dma.hbm_to_vmem [thread:$0]  %s63_s3, 32768, %s65_s20, [#allocation8], %s5462_s21, %s5462_s21, %s5463_s22  }
   0xe   :  { %5450 = dma.done.wait [#allocation3], 384  }
   0xf   :  { %5451 = vsyncadd [#allocation3], 4294966912 }
  0x10   :  { %5452 = dma.done.wait [#allocation5], 2560  }
  0x11   :  { %5453 = vsyncadd [#allocation5], 4294964736 }
  0x12   :  { %5454 = dma.done.wait [#allocation8], 32768  }
  0x13   :  { %5455 = vsyncadd [#allocation8], 4294934528  ;;  %v5464_v0 = vmov 0   ;;  %v88_v1 = vld [vmem:[%s5809_s0] sm:$0xff]  ;;  %v3831_v2 = vld [vmem:[#allocation6 + $0x30] sm:$0xf] }
  0x14   :  { %5289 = vset.pattern.permute.xlu0 %v5464_v0  ;;  %v5000_v3 = vld [vmem:[#allocation6 + $0x34] sm:$0xf0]  ;;  %v4999_v5 = vld [vmem:[#allocation6 + $0x34] sm:$0xf]  ;;  %v3833_v6 = vld [vmem:[#allocation6 + $0x38] sm:$0xf0] }
  0x15   :  { %92 = vperm.xlu0 %5289, %v88_v1   ;;  %v3832_v4 = vor.u32 %v5000_v3, %v3831_v2  ;;  %v3823_v7 = vld [vmem:[#allocation6 + $0x20] sm:$0xf]  ;;  %v3836_v8 = vor.u32 %v4999_v5, %v3833_v6  ;;  %v4998_v9 = vld [vmem:[#allocation6 + $0x24] sm:$0xf0]  ;;  %v4997_v10 = vld [vmem:[#allocation6 + $0x24] sm:$0xf] }
  0x16   :  { %v3825_v11 = vld [vmem:[#allocation6 + $0x28] sm:$0xf0]  ;;  %v3824_v12 = vor.u32 %v4998_v9, %v3823_v7  ;;  %v3815_v14 = vld [vmem:[#allocation6 + $0x10] sm:$0xf]  ;;  %v4996_v15 = vld [vmem:[#allocation6 + $0x14] sm:$0xf0] }
  0x17   :  { %161 = vmatpush.bf16.msra.mxu0 %v3832_v4  ;;  %174 = vmatpush.bf16.msra.mxu1 %v3836_v8  ;;  %v3828_v13 = vor.u32 %v4997_v10, %v3825_v11  ;;  %v4995_v16 = vld [vmem:[#allocation6 + $0x14] sm:$0xf]  ;;  %v3816_v17 = vor.u32 %v4996_v15, %v3815_v14  ;;  %v3817_v18 = vld [vmem:[#allocation6 + $0x18] sm:$0xf0]  ;;  %v3807_v20 = vld [vmem:[#allocation6] sm:$0xf] }
  0x18   :  { %v3820_v19 = vor.u32 %v4995_v16, %v3817_v18  ;;  %v4994_v21 = vld [vmem:[#allocation6 + $0x4] sm:$0xf0]  ;;  %v4993_v22 = vld [vmem:[#allocation6 + $0x4] sm:$0xf]  ;;  %v3809_v24 = vld [vmem:[#allocation6 + $0x8] sm:$0xf0] }
  0x19   :  { %v3808_v23 = vor.u32 %v4994_v21, %v3807_v20  ;;  %v3812_v25 = vor.u32 %v4993_v22, %v3809_v24  ;;  %v5292_v26 = vld [vmem:[#allocation2 + $0x4] ss:$0 sm:$0xff]  ;;  %v5290_v27 = vld [vmem:[%s5811_s2] ss:$0 sm:$0xff]  ;;  %vm153_vm0 = vcmask 523264   ;;  %vm207_vm1 = vcmask 130048  }
  0x1a   :  { %v5291_v28 = vld [vmem:[#allocation2] ss:$0 sm:$0xff]  ;;  %v5293_v35 = vld [vmem:[#allocation2 + $0x3] ss:$0 sm:$0xff]  ;;  %v5294_v36 = vld [vmem:[#allocation2 + $0x5] ss:$0 sm:$0xff] }
  0x1b   :  { %162 = vmatpush.bf16.msra.mxu0 %v3824_v12  ;;  %175 = vmatpush.bf16.msra.mxu1 %v3828_v13  ;;  %v102_v31 = vld [vmem:[%s5810_s1] sm:$0xff]  ;;  %s5465_s1 = smov 112   ;;  %vm234_vm2 = vcmask 64512   ;;  %s5466_s2 = smov 16   ;;  %v3852_v9 = vld [vmem:[#allocation6 + $0x4] sm:$0xf] }
  0x1c   :  { %s5467_s26 = smov 96   ;;  %s5468_s27 = smov 48   ;;  %v5001_v10 = vld [vmem:[#allocation6 + $0x8] sm:$0xf0] }
  0x1d   :  { %189 = vrot.lane.b32.xlu0 %v5292_v26, %s5463_s22  ;;  %v3853_v11 = vor.u32 %v5001_v10, %v3852_v9  ;;  %s5469_s28 = smov 80   ;;  %s5470_s29 = smov 32  }
  0x1f   :  { %163 = vmatpush.bf16.msra.mxu0 %v3816_v17  ;;  %176 = vmatpush.bf16.msra.mxu1 %v3820_v19 }
  0x23   :  { %164 = vmatpush.bf16.msra.mxu0 %v3808_v23  ;;  %177 = vmatpush.bf16.msra.mxu1 %v3812_v25 }
  0x87   :  { %v93_v29 = vpop.permute.xlu0 %92 }
  0x88   :  { %v98_v30 = vmul.f32 %v5290_v27, %v93_v29 }
  0x8a   :  { %v101_v32 = vadd.f32 %v5291_v28, %v98_v30 }
  0x8c   :  { %v5535_v33 = vadd.f32 %v102_v31, %v101_v32 }
  0x8e   :  { %v104_v34 = vpack.c.bf16 %v5535_v33, %v5535_v33 }
  0x8f   :  { %v190_v37 = vpop.permute.xlu0 %189 }
  0x90   :  { %3837 = vmatmul.msk.bf16.vlgmr.msra.gmra.mxu0 %vm153_vm0, %v104_v34  ;;  %3838 = vmatmul.msk.bf16.vlgmr.msra.gmra.mxu1 %vm153_vm0, %v104_v34 }
 0x10d   :  { %v166_v38 = vpop.f32.mrf.mxu0  ;;  %v179_v39 = vpop.f32.mrf.mxu1 }
 0x10e   :  { %v5541_v40 = vadd.f32 %v5293_v35, %v166_v38  ;;  %v5543_v41 = vadd.f32 %v5294_v36, %v179_v39  ;;  %v5545_v42 = vadd.f32 %v190_v37, %v166_v38 }
 0x110   :  { %277 = vmatpush.msra.mxu3 %v5543_v41  ;;  %283 = vrot.lane.b32.xlu0 %v5541_v40, %s5465_s1 }
 0x111   :  { %205 = vrot.lane.b32.xlu1 %v5545_v42, %s5463_s22 }
 0x115   :  { %v168_v43 = vpop.f32.mrf.mxu0  ;;  %v181_v44 = vpop.f32.mrf.mxu1 }
 0x182   :  { %v284_v4 = vpop.permute.xlu0 %283 }
 0x183   :  { %v206_v45 = vpop.permute.xlu1 %205 }
 0x184   :  { %3839 = vmatpush.xpose.msk.msra.mxu2 %vm207_vm1, %v206_v45 }
 0x187   :  { %3840 = vmatmul.msk.f32.vlgmr.msra.gmra.mxu2 %vm207_vm1, %v5541_v40 }
 0x20a   :  { %v230_v46 = vpop.f32.mrf.mxu2 }
 0x20b   :  { %v233_v47 = vmul.f32 0.25, %v230_v46 }
 0x20d   :  { %v235_v48 = vsel %vm234_vm2, %v233_v47, -inf }
 0x20e   :  { %236 = vmax.xlane.f32.xlu1 %v235_v48 }
 0x227   :  { %337 = vrot.lane.b32.xlu1 %v5543_v41, %s5465_s1 }
 0x22f   :  { %519 = vrot.lane.b32.xlu1 %v5545_v42, %s5466_s2 }
 0x237   :  { %412 = vrot.lane.b32.xlu1 %v5541_v40, %s5467_s26 }
 0x281   :  { %v237_v49 = vpop.xlane.xlu1 %236 }
 0x282   :  { %v238_v50 = vsub.f32 %v233_v47, %v237_v49 }
 0x284   :  { %v239_v51 = vmul.f32 1.442695, %v238_v50 }
 0x286   :  { %5312 = vpow2.f32 %v239_v51 }
 0x28c   :  { %v5313_v52 = vpop.eup %5312 }
 0x28d   :  { %v241_v53 = vsel %vm234_vm2, %v5313_v52, 0.0 }
 0x28e   :  { %242 = vadd.xlane.f32.xlu2 %v241_v53 }
 0x299   :  { %v338_v54 = vpop.permute.xlu1 %337 }
 0x29a   :  { %358 = vmatpush.msrb.mxu2 %v338_v54 }
 0x2a1   :  { %v520_v19 = vpop.permute.xlu1 %519 }
 0x2a6   :  { %285 = vrot.lane.b32.xlu2 %v5545_v42, %s5468_s27 }
 0x2a9   :  { %v413_v24 = vpop.permute.xlu1 %412 }
 0x301   :  { %v243_v55 = vpop.xlane.xlu2 %242 }
 0x302   :  { %5314 = vrcp.f32 %v243_v55  ;;  %v255_v60 = vand.u32 2147483648, %v243_v55  ;;  %v253_v62 = vand.u32 2147483647, %v243_v55  ;;  %vm249_vm4 = vweird.f32 %v243_v55 }
 0x304   :  { %v256_v0 = vor.u32 1.1754944e-38, %v255_v60  ;;  %vm254_vm6 = vcmp.eq.f32.partialorder %v253_v62, 8.507059e+37  ;;  %v3860_v60 = vld [vmem:[#allocation6 + $0x24] sm:$0xf] }
 0x308   :  { %v5315_v56 = vpop.eup %5314 }
 0x309   :  { %v245_v57 = vmul.f32 %v5315_v56, %v243_v55  ;;  %v286_v58 = vpop.permute.xlu2 %285  ;;  %vm250_vm3 = vweird.f32 %v5315_v56 }
 0x30a   :  { %3842 = vmatpush.xpose.msk.msrb.mxu3 %vm207_vm1, %v286_v58  ;;  %vm251_vm5 = vmor %vm249_vm4, %vm250_vm3  ;;  %v5002_v58 = vld [vmem:[#allocation6 + $0x18] sm:$0xf0] }
 0x30b   :  { %v246_v59 = vsub.f32 1.0, %v245_v57  ;;  %v3847_v57 = vld [vmem:[#allocation6 + $0x14] sm:$0xf] }
 0x30d   :  { %v247_v61 = vmul.f32 %v5315_v56, %v246_v59  ;;  %v3848_v59 = vor.u32 %v5002_v58, %v3847_v57 }
 0x30f   :  { %v248_v63 = vadd.f32 %v5315_v56, %v247_v61  ;;  %v5003_v61 = vld [vmem:[#allocation6 + $0x28] sm:$0xf0] }
 0x310   :  { %v3861_v62 = vor.u32 %v5003_v61, %v3860_v60  ;;  %v4065_v60 = vld [vmem:[#allocation7 + $0x180] sm:$0xf] }
 0x311   :  { %v252_v1 = vsel %vm251_vm5, %v5315_v56, %v248_v63  ;;  %v5061_v61 = vld [vmem:[#allocation7 + $0x1bc] sm:$0xf0] }
 0x312   :  { %v257_v2 = vsel %vm254_vm6, %v256_v0, %v252_v1 }
 0x313   :  { %v258_v3 = vmul.f32 %v5313_v52, %v257_v2 }
 0x315   :  { %3841 = vmatmul.msk.f32.vlgmr.msra.gmra.mxu3 %vm234_vm2, %v258_v3 }
 0x31d   :  { %3843 = vmatmul.msk.f32.vlgmr.msrb.gmra.mxu3 %vm207_vm1, %v284_v4 }
 0x398   :  { %v279_v5 = vpop.f32.mrf.mxu3 }
 0x399   :  { %v282_v34 = vpack.c.bf16 %v279_v5, %v279_v5 }
 0x3a0   :  { %v308_v6 = vpop.f32.mrf.mxu3 }
 0x3a1   :  { %v311_v7 = vmul.f32 0.25, %v308_v6 }
 0x3a3   :  { %v312_v8 = vsel %vm234_vm2, %v311_v7, -inf }
 0x3a4   :  { %313 = vmax.xlane.f32.xlu0 %v312_v8 }
 0x3b8   :  { %393 = vrot.lane.b32.xlu0 %v3853_v11, %s5463_s22  ;;  %v3868_v11 = vld [vmem:[#allocation6 + $0x34] sm:$0xf] }
 0x3c0   :  { %517 = vrot.lane.b32.xlu0 %v5541_v40, %s5469_s28 }
 0x417   :  { %v314_v12 = vpop.xlane.xlu0 %313 }
 0x418   :  { %v315_v13 = vsub.f32 %v311_v7, %v314_v12  ;;  %v5004_v12 = vld [vmem:[#allocation6 + $0x38] sm:$0xf0] }
 0x41a   :  { %v316_v14 = vmul.f32 1.442695, %v315_v13  ;;  %v3869_v13 = vor.u32 %v5004_v12, %v3868_v11  ;;  %v4003_v11 = vld [vmem:[#allocation7 + $0x140] sm:$0xf0]  ;;  %v4009_v12 = vld [vmem:[#allocation7 + $0x108] sm:$0xf] }
 0x41c   :  { %5316 = vpow2.f32 %v316_v14 }
 0x422   :  { %v5317_v15 = vpop.eup %5316 }
 0x423   :  { %v318_v16 = vsel %vm234_vm2, %v5317_v15, 0.0 }
 0x424   :  { %319 = vadd.xlane.f32.xlu2 %v318_v16 }
 0x42a   :  { %v394_v17 = vpop.permute.xlu0 %393 }
 0x42b   :  { %406 = vmatpush.bf16.msra.mxu2 %v394_v17 }
 0x432   :  { %v518_v35 = vpop.permute.xlu0 %517 }
 0x43c   :  { %414 = vrot.lane.b32.xlu2 %v5545_v42, %s5470_s29 }
 0x497   :  { %v320_v18 = vpop.xlane.xlu2 %319 }
 0x498   :  { %5318 = vrcp.f32 %v320_v18  ;;  %v332_v25 = vand.u32 2147483648, %v320_v18  ;;  %v330_v27 = vand.u32 2147483647, %v320_v18  ;;  %vm326_vm8 = vweird.f32 %v320_v18 }
 0x49a   :  { %v333_v29 = vor.u32 1.1754944e-38, %v332_v25  ;;  %vm331_vm10 = vcmp.eq.f32.partialorder %v330_v27, 8.507059e+37 }
 0x49e   :  { %v5319_v20 = vpop.eup %5318 }
 0x49f   :  { %v322_v21 = vmul.f32 %v5319_v20, %v320_v18  ;;  %v415_v22 = vpop.permute.xlu2 %414  ;;  %vm327_vm7 = vweird.f32 %v5319_v20 }
 0x4a0   :  { %3855 = vmatpush.xpose.msk.msrb.mxu0 %vm207_vm1, %v415_v22  ;;  %vm328_vm9 = vmor %vm326_vm8, %vm327_vm7 }
 0x4a1   :  { %v323_v23 = vsub.f32 1.0, %v322_v21 }
 0x4a3   :  { %v324_v26 = vmul.f32 %v5319_v20, %v323_v23  ;;  %3856 = vmatmul.msk.f32.vlgmr.msrb.gmra.mxu0 %vm207_vm1, %v413_v24 }
 0x4a5   :  { %v325_v28 = vadd.f32 %v5319_v20, %v324_v26 }
 0x4a7   :  { %v329_v30 = vsel %vm328_vm9, %v5319_v20, %v325_v28 }
 0x4a8   :  { %v334_v31 = vsel %vm331_vm10, %v333_v29, %v329_v30 }
 0x4a9   :  { %v335_v32 = vmul.f32 %v5317_v15, %v334_v31 }
 0x4ab   :  { %3844 = vmatmul.msk.f32.vlgmr.msrb.gmra.mxu2 %vm234_vm2, %v335_v32 }
 0x4ac   :  { %3863 = vmatpush.xpose.msk.msrb.mxu2 %vm207_vm1, %v520_v19 }
 0x4b3   :  { %3854 = vmatmul.msk.bf16.vlgmr.msra.gmra.mxu2 %vm207_vm1, %v282_v34 }
 0x4c3   :  { %3864 = vmatmul.msk.f32.vlgmr.msrb.gmra.mxu2 %vm207_vm1, %v518_v35 }
 0x520   :  { %v437_v36 = vpop.f32.mrf.mxu0 }
 0x521   :  { %v440_v37 = vmul.f32 0.25, %v437_v36 }
 0x523   :  { %v441_v38 = vsel %vm234_vm2, %v440_v37, -inf }
 0x524   :  { %442 = vmax.xlane.f32.xlu1 %v441_v38 }
 0x52e   :  { %v5582_v39 = vpop.f32.mrf.mxu2 }
 0x52f   :  { %v363_v27 = vpack.c.bf16 %v5582_v39, %v5582_v39 }
 0x536   :  { %v5584_v40 = vpop.f32.mrf.mxu2 }
 0x53e   :  { %v410_v42 = vpop.f32.mrf.mxu2 }
 0x546   :  { %v542_v43 = vpop.f32.mrf.mxu2 }
 0x547   :  { %v545_v44 = vmul.f32 0.25, %v542_v43  ;;  %v5295_v43 = vld [vmem:[#allocation2 + $0x6] ss:$0 sm:$0xff] }
 0x549   :  { %v546_v45 = vsel %vm234_vm2, %v545_v44, -inf }
 0x54a   :  { %547 = vmax.xlane.f32.xlu0 %v546_v45 }
 0x55e   :  { %465 = vrot.lane.b32.xlu0 %v5543_v41, %s5467_s26 }
 0x566   :  { %497 = vrot.lane.b32.xlu0 %v3861_v62, %s5463_s22  ;;  %v5053_v62 = vld [vmem:[#allocation7 + $0x184] sm:$0xf] }
 0x597   :  { %v443_v46 = vpop.xlane.xlu1 %442 }
 0x598   :  { %v444_v47 = vsub.f32 %v440_v37, %v443_v46 }
 0x59a   :  { %v445_v48 = vmul.f32 1.442695, %v444_v47 }
 0x59c   :  { %5320 = vpow2.f32 %v445_v48 }
 0x5a2   :  { %v5321_v49 = vpop.eup %5320 }
 0x5a3   :  { %v447_v50 = vsel %vm234_vm2, %v5321_v49, 0.0 }
 0x5a4   :  { %448 = vadd.xlane.f32.xlu2 %v447_v50  ;;  %v5471_v50 = vmov 64.0  }
 0x5bc   :  { %570 = vrot.lane.b32.xlu2 %v5543_v41, %s5469_s28 }
 0x5bd   :  { %v548_v51 = vpop.xlane.xlu0 %547 }
 0x5be   :  { %v549_v52 = vsub.f32 %v545_v44, %v548_v51 }
 0x5c0   :  { %v550_v53 = vmul.f32 1.442695, %v549_v52 }
 0x5c2   :  { %5322 = vpow2.f32 %v550_v53 }
 0x5c4   :  { %602 = vrot.lane.b32.xlu2 %v3869_v13, %s5463_s22  ;;  %v5046_v13 = vld [vmem:[#allocation7 + $0x144] sm:$0xf0] }
 0x5c8   :  { %v5323_v54 = vpop.eup %5322 }
 0x5c9   :  { %v552_v55 = vsel %vm234_vm2, %v5323_v54, 0.0 }
 0x5ca   :  { %553 = vadd.xlane.f32.xlu1 %v552_v55 }
 0x5d0   :  { %v466_v56 = vpop.permute.xlu0 %465 }
 0x5d1   :  { %486 = vmatpush.msrb.mxu1 %v466_v56 }
 0x5d8   :  { %v498_v28 = vpop.permute.xlu0 %497 }
 0x5e3   :  { %369 = vrot.lane.b32.xlu1 %v3848_v59, %s5463_s22 }
 0x617   :  { %v449_v41 = vpop.xlane.xlu2 %448 }
 0x618   :  { %5324 = vrcp.f32 %v449_v41  ;;  %v461_v3 = vand.u32 2147483648, %v449_v41  ;;  %v459_v5 = vand.u32 2147483647, %v449_v41  ;;  %vm455_vm12 = vweird.f32 %v449_v41 }
 0x61a   :  { %v462_v7 = vor.u32 1.1754944e-38, %v461_v3  ;;  %vm460_vm14 = vcmp.eq.f32.partialorder %v459_v5, 8.507059e+37  ;;  %v4075_v5 = vld [vmem:[#allocation7 + $0x1c8] sm:$0xf0] }
 0x61e   :  { %v5325_v63 = vpop.eup %5324 }
 0x61f   :  { %v451_v0 = vmul.f32 %v5325_v63, %v449_v41  ;;  %v571_v1 = vpop.permute.xlu2 %570  ;;  %vm456_vm11 = vweird.f32 %v5325_v63  ;;  %v4066_v41 = vor.u32 %v5061_v61, %v4065_v60  ;;  %v5047_v61 = vld [vmem:[#allocation7 + $0x14c] sm:$0xf0] }
 0x620   :  { %591 = vmatpush.msra.mxu0 %v571_v1  ;;  %vm457_vm13 = vmor %vm455_vm12, %vm456_vm11  ;;  %v5062_v1 = vld [vmem:[#allocation7 + $0x1c4] sm:$0xf0] }
 0x621   :  { %v452_v2 = vsub.f32 1.0, %v451_v0  ;;  %v4073_v0 = vld [vmem:[#allocation7 + $0x188] sm:$0xf] }
 0x622   :  { %v4074_v3 = vor.u32 %v5062_v1, %v4073_v0  ;;  %v4025_v1 = vld [vmem:[#allocation7 + $0x118] sm:$0xf] }
 0x623   :  { %v453_v4 = vmul.f32 %v5325_v63, %v452_v2 }
 0x624   :  { %1116 = vmatpush.bf16.msrb.mxu0 %v4074_v3  ;;  %v5040_v3 = vld [vmem:[#allocation7 + $0x11c] sm:$0xf] }
 0x625   :  { %v454_v6 = vadd.f32 %v5325_v63, %v453_v4  ;;  %v5054_v4 = vld [vmem:[#allocation7 + $0x18c] sm:$0xf] }
 0x627   :  { %v458_v8 = vsel %vm457_vm13, %v5325_v63, %v454_v6  ;;  %v603_v29 = vpop.permute.xlu2 %602  ;;  %v4067_v63 = vld [vmem:[#allocation7 + $0x1c0] sm:$0xf0]  ;;  %v4078_v6 = vor.u32 %v5054_v4, %v4075_v5 }
 0x628   :  { %v463_v9 = vsel %vm460_vm14, %v462_v7, %v458_v8  ;;  %615 = vmatpush.bf16.msra.mxu1 %v603_v29  ;;  %v4070_v2 = vor.u32 %v5053_v62, %v4067_v63  ;;  %v4001_v7 = vld [vmem:[#allocation7 + $0x100] sm:$0xf]  ;;  %v3947_v29 = vld [vmem:[#allocation7 + $0xc8] sm:$0xf0]  ;;  %v5039_v62 = vld [vmem:[#allocation7 + $0x114] sm:$0xf] }
 0x629   :  { %v464_v10 = vmul.f32 %v5321_v49, %v463_v9  ;;  %v5045_v8 = vld [vmem:[#allocation7 + $0x13c] sm:$0xf0]  ;;  %v5037_v9 = vld [vmem:[#allocation7 + $0x104] sm:$0xf] }
 0x62a   :  { %1103 = vmatpush.bf16.msra.mxu2 %v4070_v2  ;;  %v5048_v2 = vld [vmem:[#allocation7 + $0x154] sm:$0xf0] }
 0x62b   :  { %3857 = vmatmul.msk.f32.vlgmr.msrb.gmra.mxu1 %vm234_vm2, %v464_v10  ;;  %v4002_v10 = vor.u32 %v5045_v8, %v4001_v7  ;;  %v4026_v5 = vor.u32 %v5048_v2, %v4025_v1  ;;  %v3953_v7 = vld [vmem:[#allocation7 + $0x90] sm:$0xf]  ;;  %v4043_v1 = vld [vmem:[#allocation7 + $0x168] sm:$0xf0] }
 0x62c   :  { %1129 = vmatpush.bf16.msrb.mxu1 %v4078_v6  ;;  %v4027_v6 = vld [vmem:[#allocation7 + $0x158] sm:$0xf0] }
 0x62d   :  { %v4030_v8 = vor.u32 %v5040_v3, %v4027_v6 }
 0x63d   :  { %v554_v14 = vpop.xlane.xlu1 %553 }
 0x63e   :  { %5326 = vrcp.f32 %v554_v14  ;;  %v566_v18 = vand.u32 2147483648, %v554_v14  ;;  %v564_v20 = vand.u32 2147483647, %v554_v14  ;;  %vm560_vm3 = vweird.f32 %v554_v14 }
 0x63f   :  { %5328 = vrcp.f32 %v5471_v50  ;;  %v4083_v50 = vld [vmem:[#allocation7 + $0x1d0] sm:$0xf0] }
 0x640   :  { %v567_v22 = vor.u32 1.1754944e-38, %v566_v18  ;;  %vm565_vm5 = vcmp.eq.f32.partialorder %v564_v20, 8.507059e+37  ;;  %v5029_v20 = vld [vmem:[#allocation7 + $0xbc] sm:$0xf0] }
 0x644   :  { %v5327_v15 = vpop.eup %5326 }
 0x645   :  { %v556_v16 = vmul.f32 %v5327_v15, %v554_v14  ;;  %vm561_vm15 = vweird.f32 %v5327_v15  ;;  %v5329_v51 = vpop.eup %5328  ;;  %v4006_v14 = vor.u32 %v5037_v9, %v4003_v11  ;;  %v5031_v9 = vld [vmem:[#allocation7 + $0xcc] sm:$0xf0]  ;;  %v3955_v11 = vld [vmem:[#allocation7 + $0xd0] sm:$0xf0] }
 0x646   :  { %vm562_vm4 = vmor %vm560_vm3, %vm561_vm15  ;;  %v632_v52 = vmul.f32 64.0, %v5329_v51  ;;  %vm636_vm6 = vweird.f32 %v5329_v51 }
 0x647   :  { %v557_v17 = vsub.f32 1.0, %v556_v16  ;;  %v5038_v16 = vld [vmem:[#allocation7 + $0x10c] sm:$0xf]  ;;  %1104 = vmatpush.bf16.msra.mxu2 %v4006_v14  ;;  %v5032_v14 = vld [vmem:[#allocation7 + $0xd4] sm:$0xf0] }
 0x648   :  { %v633_v53 = vsub.f32 1.0, %v632_v52  ;;  %v5064_v52 = vld [vmem:[#allocation7 + $0x1d4] sm:$0xf0] }
 0x649   :  { %v558_v19 = vmul.f32 %v5327_v15, %v557_v17  ;;  %v4011_v17 = vld [vmem:[#allocation7 + $0x148] sm:$0xf0] }
 0x64a   :  { %v4014_v18 = vor.u32 %v5038_v16, %v4011_v17 }
 0x64b   :  { %v559_v21 = vadd.f32 %v5327_v15, %v558_v19  ;;  %v3937_v19 = vld [vmem:[#allocation7 + $0x80] sm:$0xf] }
 0x64c   :  { %1130 = vmatpush.bf16.msrb.mxu1 %v4014_v18  ;;  %v3963_v18 = vld [vmem:[#allocation7 + $0xd8] sm:$0xf0] }
 0x64d   :  { %v563_v23 = vsel %vm562_vm4, %v5327_v15, %v559_v21  ;;  %v4010_v15 = vor.u32 %v5046_v13, %v4009_v12  ;;  %v5021_v21 = vld [vmem:[#allocation7 + $0x84] sm:$0xf]  ;;  %v3954_v12 = vor.u32 %v5031_v9, %v3953_v7  ;;  %v3961_v13 = vld [vmem:[#allocation7 + $0x98] sm:$0xf] }
 0x64e   :  { %v568_v24 = vsel %vm565_vm5, %v567_v22, %v563_v23  ;;  %v3938_v22 = vor.u32 %v5029_v20, %v3937_v19  ;;  %v3939_v23 = vld [vmem:[#allocation7 + $0xc0] sm:$0xf0]  ;;  %v3962_v17 = vor.u32 %v5032_v14, %v3961_v13  ;;  %v3889_v19 = vld [vmem:[#allocation7 + $0x10] sm:$0xf]  ;;  %v3979_v13 = vld [vmem:[#allocation7 + $0xe8] sm:$0xf0] }
 0x64f   :  { %v569_v25 = vmul.f32 %v5323_v54, %v568_v24  ;;  %v634_v54 = vmul.f32 %v5329_v51, %v633_v53  ;;  %1117 = vmatpush.bf16.msrb.mxu0 %v4010_v15  ;;  %v3945_v24 = vld [vmem:[#allocation7 + $0x88] sm:$0xf]  ;;  %v5024_v15 = vld [vmem:[#allocation7 + $0x9c] sm:$0xf]  ;;  %v5015_v20 = vld [vmem:[#allocation7 + $0x4c] sm:$0xf0] }
 0x650   :  { %v3971_v9 = vld [vmem:[#allocation7 + $0xe0] sm:$0xf0] }
 0x651   :  { %3865 = vmatmul.msk.f32.vlgmr.msra.gmra.mxu0 %vm234_vm2, %v569_v25  ;;  %v635_v55 = vadd.f32 %v5329_v51, %v634_v54  ;;  %v5030_v25 = vld [vmem:[#allocation7 + $0xc4] sm:$0xf0] }
 0x655   :  { %v370_v26 = vpop.permute.xlu1 %369 }
 0x656   :  { %382 = vmatpush.bf16.msra.mxu3 %v370_v26  ;;  %v3942_v26 = vor.u32 %v5021_v21, %v3939_v23  ;;  %v3966_v21 = vor.u32 %v5024_v15, %v3963_v18  ;;  %v3891_v23 = vld [vmem:[#allocation7 + $0x50] sm:$0xf0] }
 0x658   :  { %1105 = vmatpush.bf16.msra.mxu2 %v3942_v26  ;;  %v5008_v26 = vld [vmem:[#allocation7 + $0x1c] sm:$0xf] }
 0x659   :  { %3849 = vmatmul.msk.bf16.vlgmr.msra.gmra.mxu3 %vm207_vm1, %v363_v27  ;;  %v3946_v27 = vor.u32 %v5030_v25, %v3945_v24  ;;  %v3897_v24 = vld [vmem:[#allocation7 + $0x18] sm:$0xf] }
 0x65a   :  { %510 = vmatpush.bf16.msrb.mxu3 %v498_v28  ;;  %v5022_v28 = vld [vmem:[#allocation7 + $0x8c] sm:$0xf]  ;;  %v5016_v25 = vld [vmem:[#allocation7 + $0x54] sm:$0xf0] }
 0x65b   :  { %1118 = vmatpush.bf16.msrb.mxu0 %v3946_v27  ;;  %v3899_v27 = vld [vmem:[#allocation7 + $0x58] sm:$0xf0] }
 0x65e   :  { %1090 = vmatpush.bf16.msra.mxu3 %v4066_v41  ;;  %v4019_v41 = vld [vmem:[#allocation7 + $0x150] sm:$0xf0] }
 0x65f   :  { %v4022_v0 = vor.u32 %v5039_v62, %v4019_v41  ;;  %v4035_v62 = vld [vmem:[#allocation7 + $0x160] sm:$0xf0]  ;;  %v4041_v41 = vld [vmem:[#allocation7 + $0x128] sm:$0xf] }
 0x662   :  { %1091 = vmatpush.bf16.msra.mxu3 %v4002_v10  ;;  %v5023_v10 = vld [vmem:[#allocation7 + $0x94] sm:$0xf] }
 0x663   :  { %v3958_v16 = vor.u32 %v5023_v10, %v3955_v11  ;;  %v3977_v10 = vld [vmem:[#allocation7 + $0xa8] sm:$0xf] }
 0x664   :  { %v5034_v11 = vld [vmem:[#allocation7 + $0xe4] sm:$0xf0] }
 0x665   :  { %v3978_v18 = vor.u32 %v5034_v11, %v3977_v10  ;;  %v5020_v10 = vld [vmem:[#allocation7 + $0x74] sm:$0xf0]  ;;  %v5012_v11 = vld [vmem:[#allocation7 + $0x3c] sm:$0xf] }
 0x666   :  { %1092 = vmatpush.bf16.msra.mxu3 %v3938_v22  ;;  %v5007_v22 = vld [vmem:[#allocation7 + $0x14] sm:$0xf] }
 0x6a8   :  { %v488_v30 = vpop.f32.mrf.mxu1 }
 0x6a9   :  { %v491_v31 = vpack.c.bf16 %v488_v30, %v488_v30  ;;  %v3950_v30 = vor.u32 %v5022_v28, %v3947_v29  ;;  %v3890_v28 = vor.u32 %v5015_v20, %v3889_v19  ;;  %v3894_v29 = vor.u32 %v5007_v22, %v3891_v23  ;;  %v5009_v20 = vld [vmem:[#allocation7 + $0x24] sm:$0xf]  ;;  %v3913_v22 = vld [vmem:[#allocation7 + $0x28] sm:$0xf] }
 0x6aa   :  { %v5018_v23 = vld [vmem:[#allocation7 + $0x64] sm:$0xf0] }
 0x6ab   :  { %3862 = vmatmul.msk.bf16.vlgmr.msrb.gmra.mxu3 %vm207_vm1, %v491_v31  ;;  %v3873_v31 = vld [vmem:[#allocation7] sm:$0xf]  ;;  %1131 = vmatpush.bf16.msrb.mxu1 %v3950_v30  ;;  %v3898_v30 = vor.u32 %v5016_v25, %v3897_v24  ;;  %v5010_v24 = vld [vmem:[#allocation7 + $0x2c] sm:$0xf] }
 0x6ac   :  { %v3915_v25 = vld [vmem:[#allocation7 + $0x68] sm:$0xf0] }
 0x6ce   :  { %v593_v32 = vpop.f32.mrf.mxu0 }
 0x6cf   :  { %v596_v34 = vpack.c.bf16 %v593_v32, %v593_v32  ;;  %v5013_v32 = vld [vmem:[#allocation7 + $0x3c] sm:$0xf0] }
 0x6d1   :  { %3870 = vmatmul.msk.bf16.vlgmr.msra.gmra.mxu1 %vm207_vm1, %v596_v34  ;;  %v5005_v34 = vld [vmem:[#allocation7 + $0x4] sm:$0xf] }
 0x6dc   :  { %v384_v35 = vpop.f32.mrf.mxu3 }
 0x6dd   :  { %v409_v39 = vadd.f32 %v5584_v40, %v384_v35  ;;  %v5606_v40 = vsel %vm636_vm6, %v5329_v51, %v635_v55  ;;  %v3874_v35 = vor.u32 %v5013_v32, %v3873_v31  ;;  %v4089_v51 = vld [vmem:[#allocation7 + $0x198] sm:$0xf]  ;;  %v3902_v32 = vor.u32 %v5008_v26, %v3899_v27 }
 0x6de   :  { %v4090_v55 = vor.u32 %v5064_v52, %v4089_v51  ;;  %v5066_v52 = vld [vmem:[#allocation7 + $0x1e4] sm:$0xf0] }
 0x6df   :  { %1093 = vmatpush.bf16.msra.mxu3 %v3874_v35 }
 0x6e4   :  { %v386_v36 = vpop.f32.mrf.mxu3 }
 0x6e5   :  { %v3875_v36 = vld [vmem:[#allocation7 + $0x40] sm:$0xf0] }
 0x72e   :  { %v512_v37 = vpop.f32.mrf.mxu3 }
 0x72f   :  { %v516_v42 = vadd.f32 %v512_v37, %v409_v39  ;;  %v3881_v37 = vld [vmem:[#allocation7 + $0x8] sm:$0xf]  ;;  %v3878_v39 = vor.u32 %v5005_v34, %v3875_v36 }
 0x731   :  { %1106 = vmatpush.bf16.msra.mxu2 %v3878_v39  ;;  %v5296_v39 = vld [vmem:[#allocation2 + $0x7] ss:$0 sm:$0xff] }
 0x736   :  { %v514_v38 = vpop.f32.mrf.mxu3 }
 0x737   :  { %v5014_v38 = vld [vmem:[#allocation7 + $0x44] sm:$0xf0] }
 0x74e   :  { %v617_v44 = vpop.f32.mrf.mxu1 }
 0x74f   :  { %v621_v45 = vadd.f32 %v617_v44, %v516_v42  ;;  %v3882_v42 = vor.u32 %v5014_v38, %v3881_v37  ;;  %v3883_v44 = vld [vmem:[#allocation7 + $0x48] sm:$0xf0] }
 0x751   :  { %v624_v46 = vadd.f32 %v5295_v43, %v621_v45  ;;  %v5006_v43 = vld [vmem:[#allocation7 + $0xc] sm:$0xf]  ;;  %1119 = vmatpush.bf16.msrb.mxu0 %v3882_v42 }
 0x752   :  { %v3886_v45 = vor.u32 %v5006_v43, %v3883_v44  ;;  %v5297_v43 = vld [vmem:[#allocation2 + $0x8] ss:$0 sm:$0xff] }
 0x753   :  { %v625_v47 = vadd.f32 %v624_v46, %v5535_v33  ;;  %v4081_v46 = vld [vmem:[#allocation7 + $0x190] sm:$0xf] }
 0x754   :  { %1132 = vmatpush.bf16.msrb.mxu1 %v3886_v45 }
 0x755   :  { %v628_v48 = vsel %vm153_vm0, %v625_v47, 0.0  ;;  %1168 = vmatpush.bf16.msra.mxu0 %v4090_v55 }
 0x756   :  { %v619_v49 = vpop.f32.mrf.mxu1  ;;  %629 = vadd.xlane.f32.xlu0 %v628_v48  ;;  %v5055_v48 = vld [vmem:[#allocation7 + $0x194] sm:$0xf] }
 0x757   :  { %v4086_v54 = vor.u32 %v5055_v48, %v4083_v50  ;;  %v5057_v48 = vld [vmem:[#allocation7 + $0x1a4] sm:$0xf]  ;;  %v4105_v50 = vld [vmem:[#allocation7 + $0x1a8] sm:$0xf] }
 0x759   :  { %1155 = vmatpush.bf16.msrb.mxu2 %v4086_v54  ;;  %1169 = vmatpush.bf16.msra.mxu0 %v4026_v5  ;;  %v4107_v54 = vld [vmem:[#allocation7 + $0x1e8] sm:$0xf0]  ;;  %v5033_v5 = vld [vmem:[#allocation7 + $0xdc] sm:$0xf0] }
 0x75d   :  { %1156 = vmatpush.bf16.msrb.mxu2 %v4022_v0  ;;  %1170 = vmatpush.bf16.msra.mxu0 %v3962_v17  ;;  %v5042_v0 = vld [vmem:[#allocation7 + $0x12c] sm:$0xf]  ;;  %v5017_v17 = vld [vmem:[#allocation7 + $0x5c] sm:$0xf0] }
 0x75e   :  { %v4046_v7 = vor.u32 %v5042_v0, %v4043_v1  ;;  %v3995_v0 = vld [vmem:[#allocation7 + $0xf8] sm:$0xf0] }
 0x761   :  { %1157 = vmatpush.bf16.msrb.mxu2 %v3958_v16  ;;  %1171 = vmatpush.bf16.msra.mxu0 %v3898_v30  ;;  %v3905_v16 = vld [vmem:[#allocation7 + $0x20] sm:$0xf]  ;;  %v3914_v30 = vor.u32 %v5018_v23, %v3913_v22  ;;  %v5117_v23 = vld [vmem:[#allocation7 + $0x384] sm:$0xf] }
 0x762   :  { %v3906_v26 = vor.u32 %v5017_v17, %v3905_v16  ;;  %v5126_v16 = vld [vmem:[#allocation7 + $0x3c4] sm:$0xf0]  ;;  %v5125_v22 = vld [vmem:[#allocation7 + $0x3bc] sm:$0xf0] }
 0x765   :  { %1158 = vmatpush.bf16.msrb.mxu2 %v3894_v29  ;;  %v5067_v29 = vld [vmem:[#allocation7 + $0x1ec] sm:$0xf0] }
 0x7c9   :  { %v630_v56 = vpop.xlane.xlu0 %629 }
 0x7ca   :  { %v638_v57 = vmul.f32 %v5606_v40, %v630_v56  ;;  %v5056_v56 = vld [vmem:[#allocation7 + $0x19c] sm:$0xf] }
 0x7cc   :  { %v5609_v58 = vsub.f32 %v625_v47, %v638_v57  ;;  %v5063_v47 = vld [vmem:[#allocation7 + $0x1cc] sm:$0xf0]  ;;  %v4091_v57 = vld [vmem:[#allocation7 + $0x1d8] sm:$0xf0] }
 0x7cd   :  { %v4082_v49 = vor.u32 %v5063_v47, %v4081_v46  ;;  %v4094_v60 = vor.u32 %v5056_v56, %v4091_v57  ;;  %v4097_v46 = vld [vmem:[#allocation7 + $0x1a0] sm:$0xf] }
 0x7ce   :  { %v640_v33 = vmul.f32 %v5609_v58, %v5609_v58  ;;  %v5065_v47 = vld [vmem:[#allocation7 + $0x1dc] sm:$0xf0] }
 0x7cf   :  { %1142 = vmatpush.bf16.msrb.mxu3 %v4082_v49  ;;  %1181 = vmatpush.bf16.msra.mxu1 %v4094_v60  ;;  %v4099_v49 = vld [vmem:[#allocation7 + $0x1e0] sm:$0xf0]  ;;  %v4098_v56 = vor.u32 %v5065_v47, %v4097_v46  ;;  %v5043_v47 = vld [vmem:[#allocation7 + $0x134] sm:$0xf] }
 0x7d0   :  { %v641_v59 = vsel %vm153_vm0, %v640_v33, 0.0  ;;  %v4017_v33 = vld [vmem:[#allocation7 + $0x110] sm:$0xf]  ;;  %v4102_v57 = vor.u32 %v5057_v48, %v4099_v49  ;;  %v4051_v48 = vld [vmem:[#allocation7 + $0x170] sm:$0xf0] }
 0x7d1   :  { %642 = vadd.xlane.f32.xlu1 %v641_v59  ;;  %v4018_v63 = vor.u32 %v5047_v61, %v4017_v33  ;;  %v4033_v33 = vld [vmem:[#allocation7 + $0x120] sm:$0xf]  ;;  %v5041_v61 = vld [vmem:[#allocation7 + $0x124] sm:$0xf]  ;;  %v4057_v49 = vld [vmem:[#allocation7 + $0x138] sm:$0xf] }
 0x7d2   :  { %v4038_v3 = vor.u32 %v5041_v61, %v4035_v62  ;;  %v3987_v61 = vld [vmem:[#allocation7 + $0xf0] sm:$0xf0]  ;;  %v3993_v62 = vld [vmem:[#allocation7 + $0xb8] sm:$0xf] }
 0x7d3   :  { %1143 = vmatpush.bf16.msrb.mxu3 %v4018_v63  ;;  %1182 = vmatpush.bf16.msra.mxu1 %v4030_v8  ;;  %v5050_v63 = vld [vmem:[#allocation7 + $0x164] sm:$0xf0]  ;;  %v5025_v8 = vld [vmem:[#allocation7 + $0xa4] sm:$0xf] }
 0x7d4   :  { %v4042_v6 = vor.u32 %v5050_v63, %v4041_v41  ;;  %v3974_v15 = vor.u32 %v5025_v8, %v3971_v9  ;;  %v5036_v41 = vld [vmem:[#allocation7 + $0xf4] sm:$0xf0]  ;;  %v5028_v63 = vld [vmem:[#allocation7 + $0xbc] sm:$0xf]  ;;  %v3923_v8 = vld [vmem:[#allocation7 + $0x70] sm:$0xf0] }
 0x7d5   :  { %v3929_v9 = vld [vmem:[#allocation7 + $0x38] sm:$0xf] }
 0x7d6   :  { %v3930_v17 = vor.u32 %v5020_v10, %v3929_v9 }
 0x7d7   :  { %1144 = vmatpush.bf16.msrb.mxu3 %v3954_v12  ;;  %1183 = vmatpush.bf16.msra.mxu1 %v3966_v21  ;;  %v5026_v12 = vld [vmem:[#allocation7 + $0xac] sm:$0xf]  ;;  %v3907_v21 = vld [vmem:[#allocation7 + $0x60] sm:$0xf0] }
 0x7d8   :  { %v3982_v19 = vor.u32 %v5026_v12, %v3979_v13  ;;  %v3910_v27 = vor.u32 %v5009_v20, %v3907_v21  ;;  %v3931_v12 = vld [vmem:[#allocation7 + $0x78] sm:$0xf0]  ;;  %v4347_v20 = vld [vmem:[#allocation7 + $0x3c8] sm:$0xf0]  ;;  %v4337_v21 = vld [vmem:[#allocation7 + $0x380] sm:$0xf] }
 0x7db   :  { %1145 = vmatpush.bf16.msrb.mxu3 %v3890_v28  ;;  %1184 = vmatpush.bf16.msra.mxu1 %v3902_v32  ;;  %v4113_v28 = vld [vmem:[#allocation7 + $0x1b0] sm:$0xf]  ;;  %v5059_v32 = vld [vmem:[#allocation7 + $0x1b4] sm:$0xf] }
 0x844   :  { %v643_v53 = vpop.xlane.xlu1 %642 }
 0x845   :  { %v644_v59 = vmul.f32 %v643_v53, %v5606_v40  ;;  %v5058_v53 = vld [vmem:[#allocation7 + $0x1ac] sm:$0xf] }
 0x846   :  { %v4110_v60 = vor.u32 %v5058_v53, %v4107_v54  ;;  %v4059_v53 = vld [vmem:[#allocation7 + $0x178] sm:$0xf0] }
 0x847   :  { %v645_v4 = vadd.f32 1e-05, %v644_v59  ;;  %v5049_v59 = vld [vmem:[#allocation7 + $0x15c] sm:$0xf0] }
 0x848   :  { %v4034_v2 = vor.u32 %v5049_v59, %v4033_v33  ;;  %v5035_v33 = vld [vmem:[#allocation7 + $0xec] sm:$0xf0] }
 0x849   :  { %5330 = vrsqrt.f32 %v645_v4  ;;  %vm652_vm8 = vweird.f32 %v645_v4 }
 0x84f   :  { %v5331_v31 = vpop.eup %5330 }
 0x850   :  { %v647_v34 = vmul.f32 %v5331_v31, %v645_v4  ;;  %vm653_vm7 = vweird.f32 %v5331_v31  ;;  %v3969_v4 = vld [vmem:[#allocation7 + $0xa0] sm:$0xf] }
 0x851   :  { %vm654_vm9 = vmor %vm652_vm8, %vm653_vm7  ;;  %v3970_v14 = vor.u32 %v5033_v5, %v3969_v4  ;;  %v5019_v4 = vld [vmem:[#allocation7 + $0x6c] sm:$0xf0]  ;;  %v3994_v5 = vor.u32 %v5036_v41, %v3993_v62  ;;  %v5128_v62 = vld [vmem:[#allocation7 + $0x3d4] sm:$0xf0] }
 0x852   :  { %v648_v35 = vmul.f32 %v5331_v31, %v647_v34  ;;  %v4115_v34 = vld [vmem:[#allocation7 + $0x1f0] sm:$0xf0]  ;;  %v5120_v41 = vld [vmem:[#allocation7 + $0x39c] sm:$0xf] }
 0x854   :  { %v649_v36 = vmul.f32 0.5, %v648_v35  ;;  %v4121_v35 = vld [vmem:[#allocation7 + $0x1b8] sm:$0xf] }
 0x856   :  { %v650_v37 = vsub.f32 1.5, %v649_v36  ;;  %v5068_v36 = vld [vmem:[#allocation7 + $0x1f4] sm:$0xf0] }
 0x858   :  { %v651_v38 = vmul.f32 %v5331_v31, %v650_v37  ;;  %v5060_v37 = vld [vmem:[#allocation7 + $0x1bc] sm:$0xf] }
 0x85a   :  { %v655_v42 = vsel %vm654_vm9, %v5331_v31, %v651_v38  ;;  %v3918_v31 = vor.u32 %v5010_v24, %v3915_v25  ;;  %v4123_v38 = vld [vmem:[#allocation7 + $0x1f8] sm:$0xf0]  ;;  %v4339_v24 = vld [vmem:[#allocation7 + $0x3c0] sm:$0xf0] }
 0x85b   :  { %v656_v44 = vmul.f32 %v655_v42, %v5609_v58  ;;  %v4106_v58 = vor.u32 %v5066_v52, %v4105_v50  ;;  %v4118_v42 = vor.u32 %v5059_v32, %v4115_v34  ;;  %v4126_v46 = vor.u32 %v5060_v37, %v4123_v38  ;;  %v5052_v50 = vld [vmem:[#allocation7 + $0x174] sm:$0xf0]  ;;  %v5044_v52 = vld [vmem:[#allocation7 + $0x13c] sm:$0xf]  ;;  %v4283_v32 = vld [vmem:[#allocation7 + $0x348] sm:$0xf0] }
 0x85c   :  { %v4058_v59 = vor.u32 %v5052_v50, %v4057_v49  ;;  %v4273_v34 = vld [vmem:[#allocation7 + $0x300] sm:$0xf]  ;;  %v4275_v37 = vld [vmem:[#allocation7 + $0x340] sm:$0xf0] }
 0x85d   :  { %v658_v45 = vmul.f32 %v5296_v39, %v656_v44  ;;  %v4114_v39 = vor.u32 %v5067_v29, %v4113_v28  ;;  %v5051_v44 = vld [vmem:[#allocation7 + $0x16c] sm:$0xf0]  ;;  %v4342_v28 = vor.u32 %v5117_v23, %v4339_v24  ;;  %v4281_v29 = vld [vmem:[#allocation7 + $0x308] sm:$0xf]  ;;  %v5093_v49 = vld [vmem:[#allocation7 + $0x2bc] sm:$0xf0] }
 0x85e   :  { %v5085_v50 = vld [vmem:[#allocation7 + $0x284] sm:$0xf] }
 0x85f   :  { %v5616_v51 = vadd.f32 %v5297_v43, %v658_v45  ;;  %v4049_v43 = vld [vmem:[#allocation7 + $0x130] sm:$0xf]  ;;  %v4122_v45 = vor.u32 %v5068_v36, %v4121_v35  ;;  %v5109_v35 = vld [vmem:[#allocation7 + $0x33c] sm:$0xf0]  ;;  %v5101_v36 = vld [vmem:[#allocation7 + $0x304] sm:$0xf] }
 0x860   :  { %v4050_v54 = vor.u32 %v5051_v44, %v4049_v43  ;;  %v4278_v43 = vor.u32 %v5101_v36, %v4275_v37  ;;  %v4217_v44 = vld [vmem:[#allocation7 + $0x288] sm:$0xf]  ;;  %v5087_v36 = vld [vmem:[#allocation7 + $0x294] sm:$0xf] }
 0x861   :  { %v5620_v55 = vpack.c.bf16 %v5616_v51, %v5616_v51 }
 0x863   :  { %4127 = vmatmul.msk.bf16.vlgmr.msra.gmra.mxu3 %vm153_vm0, %v5620_v55  ;;  %4128 = vmatmul.msk.bf16.vlgmr.msra.gmra.mxu2 %vm153_vm0, %v5620_v55 }
 0x864   :  { %4129 = vmatmul.msk.bf16.vlgmr.msrb.gmra.mxu0 %vm153_vm0, %v5620_v55  ;;  %4130 = vmatmul.msk.bf16.vlgmr.msrb.gmra.mxu1 %vm153_vm0, %v5620_v55 }
 0x865   :  { %1194 = vmatpush.bf16.msra.mxu3 %v4098_v56  ;;  %1207 = vmatpush.bf16.msra.mxu2 %v4102_v57  ;;  %v4054_v56 = vor.u32 %v5043_v47, %v4051_v48  ;;  %v3985_v57 = vld [vmem:[#allocation7 + $0xb0] sm:$0xf]  ;;  %v4219_v47 = vld [vmem:[#allocation7 + $0x2c8] sm:$0xf0]  ;;  %v4209_v48 = vld [vmem:[#allocation7 + $0x280] sm:$0xf] }
 0x866   :  { %1220 = vmatpush.bf16.msrb.mxu0 %v4106_v58  ;;  %1233 = vmatpush.bf16.msrb.mxu1 %v4110_v60  ;;  %v4062_v58 = vor.u32 %v5044_v52, %v4059_v53  ;;  %v5027_v60 = vld [vmem:[#allocation7 + $0xb4] sm:$0xf]  ;;  %v3986_v1 = vor.u32 %v5035_v33, %v3985_v57  ;;  %v4211_v52 = vld [vmem:[#allocation7 + $0x2c0] sm:$0xf0]  ;;  %v4153_v33 = vld [vmem:[#allocation7 + $0x208] sm:$0xf] }
 0x867   :  { %v4214_v57 = vor.u32 %v5085_v50, %v4211_v52  ;;  %v5071_v50 = vld [vmem:[#allocation7 + $0x214] sm:$0xf] }
 0x869   :  { %1195 = vmatpush.bf16.msra.mxu3 %v4034_v2  ;;  %1208 = vmatpush.bf16.msra.mxu2 %v4038_v3  ;;  %v3990_v2 = vor.u32 %v5027_v60, %v3987_v61  ;;  %v3921_v3 = vld [vmem:[#allocation7 + $0x30] sm:$0xf]  ;;  %v4155_v60 = vld [vmem:[#allocation7 + $0x248] sm:$0xf0]  ;;  %v4361_v61 = vld [vmem:[#allocation7 + $0x398] sm:$0xf] }
 0x86a   :  { %1221 = vmatpush.bf16.msrb.mxu0 %v4042_v6  ;;  %1234 = vmatpush.bf16.msrb.mxu1 %v4046_v7  ;;  %v3998_v6 = vor.u32 %v5028_v63, %v3995_v0  ;;  %v5011_v7 = vld [vmem:[#allocation7 + $0x34] sm:$0xf]  ;;  %v3922_v13 = vor.u32 %v5019_v4, %v3921_v3  ;;  %v4363_v63 = vld [vmem:[#allocation7 + $0x3d8] sm:$0xf0]  ;;  %v4145_v0 = vld [vmem:[#allocation7 + $0x200] sm:$0xf]  ;;  %v4362_v9 = vor.u32 %v5128_v62, %v4361_v61 }
 0x86b   :  { %v4147_v3 = vld [vmem:[#allocation7 + $0x240] sm:$0xf0]  ;;  %v4353_v4 = vld [vmem:[#allocation7 + $0x390] sm:$0xf]  ;;  %v4366_v10 = vor.u32 %v5120_v41, %v4363_v63  ;;  %v5130_v41 = vld [vmem:[#allocation7 + $0x3e4] sm:$0xf0] }
 0x86c   :  { %v5122_v63 = vld [vmem:[#allocation7 + $0x3ac] sm:$0xf] }
 0x86d   :  { %1196 = vmatpush.bf16.msra.mxu3 %v3970_v14  ;;  %1209 = vmatpush.bf16.msra.mxu2 %v3974_v15  ;;  %v3926_v14 = vor.u32 %v5011_v7, %v3923_v8  ;;  %v4345_v15 = vld [vmem:[#allocation7 + $0x388] sm:$0xf]  ;;  %v5119_v7 = vld [vmem:[#allocation7 + $0x394] sm:$0xf] }
 0x86e   :  { %1222 = vmatpush.bf16.msrb.mxu0 %v3978_v18  ;;  %1235 = vmatpush.bf16.msrb.mxu1 %v3982_v19  ;;  %v3934_v18 = vor.u32 %v5012_v11, %v3931_v12  ;;  %v5118_v19 = vld [vmem:[#allocation7 + $0x38c] sm:$0xf]  ;;  %v4346_v25 = vor.u32 %v5126_v16, %v4345_v15  ;;  %v4355_v8 = vld [vmem:[#allocation7 + $0x3d0] sm:$0xf0]  ;;  %v4297_v15 = vld [vmem:[#allocation7 + $0x318] sm:$0xf] }
 0x86f   :  { %v5112_v16 = vld [vmem:[#allocation7 + $0x354] sm:$0xf0] }
 0x870   :  { %v4298_v23 = vor.u32 %v5112_v16, %v4297_v15  ;;  %v4371_v15 = vld [vmem:[#allocation7 + $0x3e0] sm:$0xf0] }
 0x871   :  { %1197 = vmatpush.bf16.msra.mxu3 %v3906_v26  ;;  %1210 = vmatpush.bf16.msra.mxu2 %v3910_v27  ;;  %v4350_v26 = vor.u32 %v5118_v19, %v4347_v20  ;;  %v4338_v27 = vor.u32 %v5125_v22, %v4337_v21  ;;  %v4289_v19 = vld [vmem:[#allocation7 + $0x310] sm:$0xf]  ;;  %v5103_v21 = vld [vmem:[#allocation7 + $0x314] sm:$0xf] }
 0x872   :  { %1223 = vmatpush.bf16.msrb.mxu0 %v3914_v30  ;;  %1236 = vmatpush.bf16.msrb.mxu1 %v3918_v31  ;;  %v5110_v30 = vld [vmem:[#allocation7 + $0x344] sm:$0xf0]  ;;  %v5102_v31 = vld [vmem:[#allocation7 + $0x30c] sm:$0xf]  ;;  %v5111_v20 = vld [vmem:[#allocation7 + $0x34c] sm:$0xf0] }
 0x873   :  { %4131 = vmatmul.msk.bf16.vlgmr.msrb.gmra.mxu3 %vm153_vm0, %v5620_v55  ;;  %4132 = vmatmul.msk.bf16.vlgmr.msrb.gmra.mxu2 %vm153_vm0, %v5620_v55  ;;  %v4282_v38 = vor.u32 %v5110_v30, %v4281_v29  ;;  %v4291_v22 = vld [vmem:[#allocation7 + $0x350] sm:$0xf0]  ;;  %v5088_v29 = vld [vmem:[#allocation7 + $0x29c] sm:$0xf] }
 0x874   :  { %4133 = vmatmul.msk.bf16.vlgmr.msra.gmra.mxu0 %vm153_vm0, %v5620_v55  ;;  %4134 = vmatmul.msk.bf16.vlgmr.msra.gmra.mxu1 %vm153_vm0, %v5620_v55  ;;  %v4235_v30 = vld [vmem:[#allocation7 + $0x2d8] sm:$0xf0] }
 0x875   :  { %1246 = vmatpush.bf16.msrb.mxu3 %v4114_v39  ;;  %1259 = vmatpush.bf16.msrb.mxu2 %v4118_v42  ;;  %v4286_v39 = vor.u32 %v5102_v31, %v4283_v32  ;;  %v4274_v42 = vor.u32 %v5109_v35, %v4273_v34  ;;  %v4238_v32 = vor.u32 %v5088_v29, %v4235_v30  ;;  %v4225_v34 = vld [vmem:[#allocation7 + $0x290] sm:$0xf] }
 0x876   :  { %1272 = vmatpush.bf16.msra.mxu0 %v4122_v45  ;;  %1285 = vmatpush.bf16.msra.mxu1 %v4126_v46  ;;  %v5094_v45 = vld [vmem:[#allocation7 + $0x2c4] sm:$0xf0]  ;;  %v5086_v46 = vld [vmem:[#allocation7 + $0x28c] sm:$0xf]  ;;  %v5095_v35 = vld [vmem:[#allocation7 + $0x2cc] sm:$0xf0] }
 0x877   :  { %v4218_v53 = vor.u32 %v5094_v45, %v4217_v44  ;;  %v4226_v37 = vor.u32 %v5095_v35, %v4225_v34  ;;  %v5072_v44 = vld [vmem:[#allocation7 + $0x21c] sm:$0xf]  ;;  %v4305_v35 = vld [vmem:[#allocation7 + $0x320] sm:$0xf] }
 0x879   :  { %1247 = vmatpush.bf16.msrb.mxu3 %v4050_v54  ;;  %1260 = vmatpush.bf16.msrb.mxu2 %v4054_v56  ;;  %v4222_v54 = vor.u32 %v5086_v46, %v4219_v47  ;;  %v4210_v56 = vor.u32 %v5093_v49, %v4209_v48  ;;  %v4171_v46 = vld [vmem:[#allocation7 + $0x258] sm:$0xf0]  ;;  %v4161_v48 = vld [vmem:[#allocation7 + $0x210] sm:$0xf] }
 0x87a   :  { %1273 = vmatpush.bf16.msra.mxu0 %v4058_v59  ;;  %1286 = vmatpush.bf16.msra.mxu1 %v4062_v58  ;;  %v5078_v59 = vld [vmem:[#allocation7 + $0x244] sm:$0xf0]  ;;  %v5070_v58 = vld [vmem:[#allocation7 + $0x20c] sm:$0xf]  ;;  %v4174_v47 = vor.u32 %v5072_v44, %v4171_v46  ;;  %v5079_v49 = vld [vmem:[#allocation7 + $0x24c] sm:$0xf0] }
 0x87b   :  { %v4162_v52 = vor.u32 %v5079_v49, %v4161_v48  ;;  %v5098_v48 = vld [vmem:[#allocation7 + $0x2e4] sm:$0xf0]  ;;  %v5090_v49 = vld [vmem:[#allocation7 + $0x2ac] sm:$0xf] }
 0x87d   :  { %1248 = vmatpush.bf16.msrb.mxu3 %v3986_v1  ;;  %1261 = vmatpush.bf16.msrb.mxu2 %v3990_v2  ;;  %v5077_v1 = vld [vmem:[#allocation7 + $0x23c] sm:$0xf0]  ;;  %v5069_v2 = vld [vmem:[#allocation7 + $0x204] sm:$0xf] }
 0x87e   :  { %1274 = vmatpush.bf16.msra.mxu0 %v3994_v5  ;;  %1287 = vmatpush.bf16.msra.mxu1 %v3998_v6  ;;  %v4154_v5 = vor.u32 %v5078_v59, %v4153_v33  ;;  %v4158_v6 = vor.u32 %v5070_v58, %v4155_v60  ;;  %v4146_v11 = vor.u32 %v5077_v1, %v4145_v0  ;;  %v4377_v60 = vld [vmem:[#allocation7 + $0x3a8] sm:$0xf]  ;;  %v4379_v0 = vld [vmem:[#allocation7 + $0x3e8] sm:$0xf0] }
 0x87f   :  { %v4150_v12 = vor.u32 %v5069_v2, %v4147_v3 }
 0x881   :  { %1249 = vmatpush.bf16.msrb.mxu3 %v3922_v13  ;;  %1262 = vmatpush.bf16.msrb.mxu2 %v3926_v14  ;;  %v4358_v14 = vor.u32 %v5119_v7, %v4355_v8 }
 0x882   :  { %1275 = vmatpush.bf16.msra.mxu0 %v3930_v17  ;;  %1288 = vmatpush.bf16.msra.mxu1 %v3934_v18  ;;  %v5104_v17 = vld [vmem:[#allocation7 + $0x31c] sm:$0xf] }
 0x883   :  { %4135 = vmatmul.msk.bf16.vlgmr.msra.gmra.mxu3 %vm153_vm0, %v5620_v55  ;;  %4136 = vmatmul.msk.bf16.vlgmr.msra.gmra.mxu2 %vm153_vm0, %v5620_v55  ;;  %v4299_v18 = vld [vmem:[#allocation7 + $0x358] sm:$0xf0] }
 0x884   :  { %4137 = vmatmul.msk.bf16.vlgmr.msrb.gmra.mxu0 %vm153_vm0, %v5620_v55  ;;  %4138 = vmatmul.msk.bf16.vlgmr.msrb.gmra.mxu1 %vm153_vm0, %v5620_v55  ;;  %v4302_v24 = vor.u32 %v5104_v17, %v4299_v18 }
 0x885   :  { %1716 = vmatpush.bf16.xpose.msra.mxu3 %v4338_v27  ;;  %1729 = vmatpush.bf16.xpose.msra.mxu2 %v4342_v28  ;;  %v4233_v27 = vld [vmem:[#allocation7 + $0x298] sm:$0xf] }
 0x886   :  { %1742 = vmatpush.bf16.xpose.msrb.mxu0 %v4346_v25  ;;  %1755 = vmatpush.bf16.xpose.msrb.mxu1 %v4350_v26  ;;  %v4290_v25 = vor.u32 %v5111_v20, %v4289_v19  ;;  %v4294_v26 = vor.u32 %v5103_v21, %v4291_v22  ;;  %v5096_v28 = vld [vmem:[#allocation7 + $0x2d4] sm:$0xf0]  ;;  %v4313_v20 = vld [vmem:[#allocation7 + $0x328] sm:$0xf] }
 0x887   :  { %v4234_v31 = vor.u32 %v5096_v28, %v4233_v27 }
 0x88d   :  { %1717 = vmatpush.bf16.xpose.msra.mxu3 %v4274_v42  ;;  %1730 = vmatpush.bf16.xpose.msra.mxu2 %v4278_v43  ;;  %v4169_v42 = vld [vmem:[#allocation7 + $0x218] sm:$0xf] }
 0x88e   :  { %1743 = vmatpush.bf16.xpose.msrb.mxu0 %v4282_v38  ;;  %1756 = vmatpush.bf16.xpose.msrb.mxu1 %v4286_v39  ;;  %v4227_v38 = vld [vmem:[#allocation7 + $0x2d0] sm:$0xf0]  ;;  %v5080_v43 = vld [vmem:[#allocation7 + $0x254] sm:$0xf0] }
 0x88f   :  { %v4230_v39 = vor.u32 %v5087_v36, %v4227_v38  ;;  %v4170_v45 = vor.u32 %v5080_v43, %v4169_v42  ;;  %v5113_v36 = vld [vmem:[#allocation7 + $0x35c] sm:$0xf0]  ;;  %v4307_v38 = vld [vmem:[#allocation7 + $0x360] sm:$0xf0]  ;;  %v4249_v43 = vld [vmem:[#allocation7 + $0x2a8] sm:$0xf] }
 0x890   :  { %v4306_v46 = vor.u32 %v5113_v36, %v4305_v35  ;;  %v4387_v35 = vld [vmem:[#allocation7 + $0x3f0] sm:$0xf0] }
 0x893   :  { %4139 = vmatmul.msk.bf16.vlgmr.msrb.gmra.mxu3 %vm153_vm0, %v5620_v55  ;;  %4140 = vmatmul.msk.bf16.vlgmr.msrb.gmra.mxu2 %vm153_vm0, %v5620_v55 }
 0x894   :  { %4141 = vmatmul.msk.bf16.vlgmr.msra.gmra.mxu0 %vm153_vm0, %v5620_v55  ;;  %4142 = vmatmul.msk.bf16.vlgmr.msra.gmra.mxu1 %vm153_vm0, %v5620_v55  ;;  %v5127_v55 = vld [vmem:[#allocation7 + $0x3cc] sm:$0xf0] }
 0x895   :  { %1718 = vmatpush.bf16.xpose.msra.mxu3 %v4210_v56  ;;  %1731 = vmatpush.bf16.xpose.msra.mxu2 %v4214_v57  ;;  %v4354_v13 = vor.u32 %v5127_v55, %v4353_v4  ;;  %v5654_v56 = vld [vmem:[#allocation4] ss:$2 sm:$0xff] }
 0x896   :  { %1744 = vmatpush.bf16.xpose.msrb.mxu0 %v4218_v53  ;;  %1757 = vmatpush.bf16.xpose.msrb.mxu1 %v4222_v54  ;;  %v4163_v53 = vld [vmem:[#allocation7 + $0x250] sm:$0xf0]  ;;  %v733_v57 = vperm.slane %v5654_v56, 2  ;;  %v734_v33 = vperm.slane %v5654_v56, 3  ;;  %v731_v1 = vperm.slane %v5654_v56, 0  ;;  %v732_v2 = vperm.slane %v5654_v56, 1 }
 0x897   :  { %v4166_v54 = vor.u32 %v5071_v50, %v4163_v53  ;;  %v738_v34 = vperm.slane %v5654_v56, 7  ;;  %v4251_v50 = vld [vmem:[#allocation7 + $0x2e8] sm:$0xf0]  ;;  %v736_v53 = vperm.slane %v5654_v56, 5 }
 0x89d   :  { %1719 = vmatpush.bf16.xpose.msra.mxu3 %v4146_v11  ;;  %1732 = vmatpush.bf16.xpose.msra.mxu2 %v4150_v12 }
 0x89e   :  { %1745 = vmatpush.bf16.xpose.msrb.mxu0 %v4154_v5  ;;  %1758 = vmatpush.bf16.xpose.msrb.mxu1 %v4158_v6  ;;  %v4378_v5 = vor.u32 %v5130_v41, %v4377_v60  ;;  %v4382_v6 = vor.u32 %v5122_v63, %v4379_v0  ;;  %v4241_v41 = vld [vmem:[#allocation7 + $0x2a0] sm:$0xf] }
 0x8a5   :  { %1768 = vmatpush.bf16.xpose.msrb.mxu3 %v4354_v13  ;;  %1781 = vmatpush.bf16.xpose.msrb.mxu2 %v4358_v14  ;;  %v5129_v13 = vld [vmem:[#allocation7 + $0x3dc] sm:$0xf0]  ;;  %v5121_v14 = vld [vmem:[#allocation7 + $0x3a4] sm:$0xf] }
 0x8a6   :  { %1794 = vmatpush.bf16.xpose.msra.mxu0 %v4362_v9  ;;  %1807 = vmatpush.bf16.xpose.msra.mxu1 %v4366_v10  ;;  %v4369_v10 = vld [vmem:[#allocation7 + $0x3a0] sm:$0xf]  ;;  %v4374_v22 = vor.u32 %v5121_v14, %v4371_v15 }
 0x8a7   :  { %v4370_v21 = vor.u32 %v5129_v13, %v4369_v10  ;;  %v5132_v13 = vld [vmem:[#allocation7 + $0x3f4] sm:$0xf0] }
 0x8ad   :  { %1769 = vmatpush.bf16.xpose.msrb.mxu3 %v4290_v25  ;;  %1782 = vmatpush.bf16.xpose.msrb.mxu2 %v4294_v26  ;;  %v4315_v25 = vld [vmem:[#allocation7 + $0x368] sm:$0xf0] }
 0x8ae   :  { %1795 = vmatpush.bf16.xpose.msra.mxu0 %v4298_v23  ;;  %1808 = vmatpush.bf16.xpose.msra.mxu1 %v4302_v24  ;;  %v5114_v23 = vld [vmem:[#allocation7 + $0x364] sm:$0xf0]  ;;  %v5106_v24 = vld [vmem:[#allocation7 + $0x32c] sm:$0xf] }
 0x8af   :  { %v4314_v28 = vor.u32 %v5114_v23, %v4313_v20  ;;  %v4318_v29 = vor.u32 %v5106_v24, %v4315_v25 }
 0x8b5   :  { %1770 = vmatpush.bf16.xpose.msrb.mxu3 %v4226_v37  ;;  %1783 = vmatpush.bf16.xpose.msrb.mxu2 %v4230_v39  ;;  %v5105_v37 = vld [vmem:[#allocation7 + $0x324] sm:$0xf] }
 0x8b6   :  { %1796 = vmatpush.bf16.xpose.msra.mxu0 %v4234_v31  ;;  %1809 = vmatpush.bf16.xpose.msra.mxu1 %v4238_v32  ;;  %v737_v32 = vperm.slane %v5654_v56, 6 }
 0x8bd   :  { %1771 = vmatpush.bf16.xpose.msrb.mxu3 %v4162_v52  ;;  %1784 = vmatpush.bf16.xpose.msrb.mxu2 %v4166_v54  ;;  %v735_v52 = vperm.slane %v5654_v56, 4 }
 0x8be   :  { %1797 = vmatpush.bf16.xpose.msra.mxu0 %v4170_v45  ;;  %1810 = vmatpush.bf16.xpose.msra.mxu1 %v4174_v47  ;;  %v4310_v47 = vor.u32 %v5105_v37, %v4307_v38 }
 0x8e1   :  { %v1121_v59 = vpop.f32.mrf.mxu0  ;;  %v1134_v58 = vpop.f32.mrf.mxu1 }
 0x8e2   :  { %v1122_v61 = vadd.f32 %v1121_v59, %v733_v57  ;;  %v1135_v62 = vadd.f32 %v1134_v58, %v734_v33  ;;  %v4250_v33 = vor.u32 %v5098_v48, %v4249_v43  ;;  %v4254_v59 = vor.u32 %v5090_v49, %v4251_v50  ;;  %v5108_v50 = vld [vmem:[#allocation7 + $0x33c] sm:$0xf] }
 0x8e4   :  { %v1296_v3 = vmax.f32 %v1122_v61, 0.0  ;;  %v1297_v4 = vmax.f32 %v1135_v62, 0.0 }
 0x8e6   :  { %v1312_v55 = vpack.c.bf16 %v1296_v3, %v1296_v3  ;;  %v1313_v7 = vpack.c.bf16 %v1297_v4, %v1297_v4  ;;  %v1095_v8 = vpop.f32.mrf.mxu3  ;;  %v1108_v9 = vpop.f32.mrf.mxu2  ;;  %v4243_v3 = vld [vmem:[#allocation7 + $0x2e0] sm:$0xf0]  ;;  %v4185_v4 = vld [vmem:[#allocation7 + $0x228] sm:$0xf] }
 0x8e7   :  { %v1096_v11 = vadd.f32 %v1095_v8, %v731_v1  ;;  %v1109_v12 = vadd.f32 %v1108_v9, %v732_v2  ;;  %v5097_v1 = vld [vmem:[#allocation7 + $0x2dc] sm:$0xf0]  ;;  %v5089_v2 = vld [vmem:[#allocation7 + $0x2a4] sm:$0xf]  ;;  %v5074_v8 = vld [vmem:[#allocation7 + $0x22c] sm:$0xf] }
 0x8e8   :  { %1746 = vmatmul.bf16.vlgmr.msrb.gmra.mxu0 %v1312_v55  ;;  %1759 = vmatmul.bf16.vlgmr.msrb.gmra.mxu1 %v1313_v7  ;;  %v5082_v7 = vld [vmem:[#allocation7 + $0x264] sm:$0xf0]  ;;  %v4242_v9 = vor.u32 %v5097_v1, %v4241_v41  ;;  %v4246_v10 = vor.u32 %v5089_v2, %v4243_v3  ;;  %v5107_v1 = vld [vmem:[#allocation7 + $0x334] sm:$0xf] }
 0x8e9   :  { %v1294_v16 = vmax.f32 %v1096_v11, 0.0  ;;  %v1295_v17 = vmax.f32 %v1109_v12, 0.0  ;;  %1846 = vmatpush.bf16.xpose.msrb.mxu0 %v4378_v5  ;;  %1859 = vmatpush.bf16.xpose.msrb.mxu1 %v4382_v6  ;;  %v1123_v18 = vpop.f32.mrf.mxu0  ;;  %v1136_v19 = vpop.f32.mrf.mxu1  ;;  %v4187_v11 = vld [vmem:[#allocation7 + $0x268] sm:$0xf0]  ;;  %v4393_v12 = vld [vmem:[#allocation7 + $0x3b8] sm:$0xf] }
 0x8ea   :  { %v4395_v18 = vld [vmem:[#allocation7 + $0x3f8] sm:$0xf0]  ;;  %v4186_v19 = vor.u32 %v5082_v7, %v4185_v4  ;;  %v4190_v20 = vor.u32 %v5074_v8, %v4187_v11  ;;  %v4394_v25 = vor.u32 %v5132_v13, %v4393_v12  ;;  %v4323_v2 = vld [vmem:[#allocation7 + $0x370] sm:$0xf0] }
 0x8eb   :  { %v1310_v26 = vpack.c.bf16 %v1294_v16, %v1294_v16  ;;  %v1311_v27 = vpack.c.bf16 %v1295_v17, %v1295_v17  ;;  %v5664_v16 = vld [vmem:[#allocation4 + $0x10] ss:$2 sm:$0xff] }
 0x8ec   :  { %v5124_v17 = vld [vmem:[#allocation7 + $0x3bc] sm:$0xf]  ;;  %v741_v23 = vperm.slane %v5664_v16, 2  ;;  %v742_v24 = vperm.slane %v5664_v16, 3 }
 0x8ed   :  { %1720 = vmatmul.bf16.vlgmr.msra.gmra.mxu3 %v1310_v26  ;;  %1733 = vmatmul.bf16.vlgmr.msra.gmra.mxu2 %v1311_v27  ;;  %v4398_v26 = vor.u32 %v5124_v17, %v4395_v18  ;;  %v4177_v27 = vld [vmem:[#allocation7 + $0x220] sm:$0xf]  ;;  %v5092_v11 = vld [vmem:[#allocation7 + $0x2bc] sm:$0xf]  ;;  %v4257_v18 = vld [vmem:[#allocation7 + $0x2b0] sm:$0xf] }
 0x8ee   :  { %1820 = vmatpush.bf16.xpose.msra.mxu3 %v4370_v21  ;;  %1833 = vmatpush.bf16.xpose.msra.mxu2 %v4374_v22  ;;  %v1097_v30 = vpop.f32.mrf.mxu3  ;;  %v1110_v31 = vpop.f32.mrf.mxu2  ;;  %v4267_v12 = vld [vmem:[#allocation7 + $0x2f8] sm:$0xf0] }
 0x8ef   :  { %v4179_v30 = vld [vmem:[#allocation7 + $0x260] sm:$0xf0]  ;;  %v4385_v31 = vld [vmem:[#allocation7 + $0x3b0] sm:$0xf]  ;;  %v4270_v17 = vor.u32 %v5092_v11, %v4267_v12 }
 0x8f1   :  { %1847 = vmatpush.bf16.xpose.msrb.mxu0 %v4314_v28  ;;  %1860 = vmatpush.bf16.xpose.msrb.mxu1 %v4318_v29  ;;  %v1173_v39 = vpop.f32.mrf.mxu0  ;;  %v1186_v42 = vpop.f32.mrf.mxu1  ;;  %v5081_v28 = vld [vmem:[#allocation7 + $0x25c] sm:$0xf0]  ;;  %v5073_v29 = vld [vmem:[#allocation7 + $0x224] sm:$0xf] }
 0x8f2   :  { %v1174_v44 = vadd.f32 %v1173_v39, %v737_v32  ;;  %v1187_v45 = vadd.f32 %v1186_v42, %v738_v34  ;;  %v5131_v32 = vld [vmem:[#allocation7 + $0x3ec] sm:$0xf0]  ;;  %v5123_v34 = vld [vmem:[#allocation7 + $0x3b4] sm:$0xf]  ;;  %v4178_v38 = vor.u32 %v5081_v28, %v4177_v27  ;;  %v4182_v43 = vor.u32 %v5073_v29, %v4179_v30  ;;  %v5084_v29 = vld [vmem:[#allocation7 + $0x274] sm:$0xf0] }
 0x8f3   :  { %v4386_v48 = vor.u32 %v5131_v32, %v4385_v31  ;;  %v4390_v49 = vor.u32 %v5123_v34, %v4387_v35  ;;  %v5076_v30 = vld [vmem:[#allocation7 + $0x23c] sm:$0xf] }
 0x8f4   :  { %v1300_v54 = vmax.f32 %v1174_v44, 0.0  ;;  %v1301_v57 = vmax.f32 %v1187_v45, 0.0  ;;  %v4329_v44 = vld [vmem:[#allocation7 + $0x338] sm:$0xf]  ;;  %v4203_v31 = vld [vmem:[#allocation7 + $0x278] sm:$0xf0] }
 0x8f5   :  { %v5116_v45 = vld [vmem:[#allocation7 + $0x374] sm:$0xf0] }
 0x8f6   :  { %v1316_v58 = vpack.c.bf16 %v1300_v54, %v1300_v54  ;;  %v1317_v60 = vpack.c.bf16 %v1301_v57, %v1301_v57  ;;  %1821 = vmatpush.bf16.xpose.msra.mxu3 %v4306_v46  ;;  %1834 = vmatpush.bf16.xpose.msra.mxu2 %v4310_v47  ;;  %v1147_v61 = vpop.f32.mrf.mxu3  ;;  %v1160_v62 = vpop.f32.mrf.mxu2  ;;  %v739_v46 = vperm.slane %v5664_v16, 0  ;;  %v740_v47 = vperm.slane %v5664_v16, 1 }
 0x8f7   :  { %v1148_v63 = vadd.f32 %v1147_v61, %v735_v52  ;;  %v1161_v0 = vadd.f32 %v1160_v62, %v736_v53  ;;  %v4331_v52 = vld [vmem:[#allocation7 + $0x378] sm:$0xf0]  ;;  %v4330_v57 = vor.u32 %v5116_v45, %v4329_v44  ;;  %v5083_v44 = vld [vmem:[#allocation7 + $0x26c] sm:$0xf0]  ;;  %v5075_v45 = vld [vmem:[#allocation7 + $0x234] sm:$0xf] }
 0x8f8   :  { %1798 = vmatmul.bf16.vlgmr.msra.gmra.mxu0 %v1316_v58  ;;  %1811 = vmatmul.bf16.vlgmr.msra.gmra.mxu1 %v1317_v60  ;;  %v4334_v61 = vor.u32 %v5108_v50, %v4331_v52 }
 0x8f9   :  { %v1298_v56 = vmax.f32 %v1148_v63, 0.0  ;;  %v1299_v5 = vmax.f32 %v1161_v0, 0.0  ;;  %1848 = vmatpush.bf16.xpose.msrb.mxu0 %v4250_v33  ;;  %1861 = vmatpush.bf16.xpose.msrb.mxu1 %v4254_v59  ;;  %v1175_v6 = vpop.f32.mrf.mxu0  ;;  %v1188_v55 = vpop.f32.mrf.mxu1  ;;  %v4321_v63 = vld [vmem:[#allocation7 + $0x330] sm:$0xf] }
 0x8fa   :  { %v5115_v0 = vld [vmem:[#allocation7 + $0x36c] sm:$0xf0]  ;;  %v4265_v6 = vld [vmem:[#allocation7 + $0x2b8] sm:$0xf] }
 0x8fb   :  { %v1314_v14 = vpack.c.bf16 %v1298_v56, %v1298_v56  ;;  %v1315_v15 = vpack.c.bf16 %v1299_v5, %v1299_v5  ;;  %v4322_v8 = vor.u32 %v5115_v0, %v4321_v63 }
 0x8fd   :  { %1772 = vmatmul.bf16.vlgmr.msrb.gmra.mxu3 %v1314_v14  ;;  %1785 = vmatmul.bf16.vlgmr.msrb.gmra.mxu2 %v1315_v15 }
 0x8fe   :  { %1822 = vmatpush.bf16.xpose.msra.mxu3 %v4242_v9  ;;  %1835 = vmatpush.bf16.xpose.msra.mxu2 %v4246_v10  ;;  %v1149_v21 = vpop.f32.mrf.mxu3  ;;  %v1162_v22 = vpop.f32.mrf.mxu2  ;;  %v4326_v9 = vor.u32 %v5107_v1, %v4323_v2  ;;  %v5100_v10 = vld [vmem:[#allocation7 + $0x2f4] sm:$0xf0] }
 0x8ff   :  { %v4266_v15 = vor.u32 %v5100_v10, %v4265_v6  ;;  %v4259_v21 = vld [vmem:[#allocation7 + $0x2f0] sm:$0xf0] }
 0x901   :  { %1849 = vmatpush.bf16.xpose.msrb.mxu0 %v4186_v19  ;;  %1862 = vmatpush.bf16.xpose.msrb.mxu1 %v4190_v20  ;;  %v1225_v36 = vpop.f32.mrf.mxu0  ;;  %v1238_v37 = vpop.f32.mrf.mxu1  ;;  %v5099_v19 = vld [vmem:[#allocation7 + $0x2ec] sm:$0xf0]  ;;  %v5091_v20 = vld [vmem:[#allocation7 + $0x2b4] sm:$0xf] }
 0x902   :  { %v1226_v39 = vadd.f32 %v1225_v36, %v741_v23  ;;  %v1239_v42 = vadd.f32 %v1238_v37, %v742_v24  ;;  %v745_v24 = vperm.slane %v5664_v16, 6  ;;  %v4258_v27 = vor.u32 %v5099_v19, %v4257_v18 }
 0x903   :  { %v4262_v28 = vor.u32 %v5091_v20, %v4259_v21  ;;  %v4206_v36 = vor.u32 %v5076_v30, %v4203_v31 }
 0x904   :  { %v1304_v53 = vmax.f32 %v1226_v39, 0.0  ;;  %v1305_v54 = vmax.f32 %v1239_v42, 0.0  ;;  %v743_v39 = vperm.slane %v5664_v16, 4  ;;  %v744_v42 = vperm.slane %v5664_v16, 5 }
 0x906   :  { %v1320_v33 = vpack.c.bf16 %v1304_v53, %v1304_v53  ;;  %v1321_v59 = vpack.c.bf16 %v1305_v54, %v1305_v54  ;;  %1823 = vmatpush.bf16.xpose.msra.mxu3 %v4178_v38  ;;  %1836 = vmatpush.bf16.xpose.msra.mxu2 %v4182_v43  ;;  %v1199_v58 = vpop.f32.mrf.mxu3  ;;  %v1212_v60 = vpop.f32.mrf.mxu2  ;;  %v4193_v43 = vld [vmem:[#allocation7 + $0x230] sm:$0xf] }
 0x907   :  { %v1200_v62 = vadd.f32 %v1199_v58, %v739_v46  ;;  %v1213_v41 = vadd.f32 %v1212_v60, %v740_v47  ;;  %v4195_v46 = vld [vmem:[#allocation7 + $0x270] sm:$0xf0]  ;;  %v4194_v52 = vor.u32 %v5083_v44, %v4193_v43 }
 0x908   :  { %1850 = vmatmul.bf16.vlgmr.msrb.gmra.mxu0 %v1320_v33  ;;  %1863 = vmatmul.bf16.vlgmr.msrb.gmra.mxu1 %v1321_v59  ;;  %v4198_v53 = vor.u32 %v5075_v45, %v4195_v46 }
 0x909   :  { %1898 = vmatpush.bf16.xpose.msra.mxu0 %v4394_v25  ;;  %1911 = vmatpush.bf16.xpose.msra.mxu1 %v4398_v26  ;;  %v1302_v3 = vmax.f32 %v1200_v62, 0.0  ;;  %v1303_v4 = vmax.f32 %v1213_v41, 0.0  ;;  %v1227_v56 = vpop.f32.mrf.mxu0  ;;  %v1240_v5 = vpop.f32.mrf.mxu1  ;;  %v746_v25 = vperm.slane %v5664_v16, 7  ;;  %v4201_v26 = vld [vmem:[#allocation7 + $0x238] sm:$0xf] }
 0x90a   :  { %v4202_v35 = vor.u32 %v5084_v29, %v4201_v26 }
 0x90b   :  { %v1318_v55 = vpack.c.bf16 %v1302_v3, %v1302_v3  ;;  %v1319_v7 = vpack.c.bf16 %v1303_v4, %v1303_v4 }
 0x90d   :  { %1824 = vmatmul.bf16.vlgmr.msra.gmra.mxu3 %v1318_v55  ;;  %1837 = vmatmul.bf16.vlgmr.msra.gmra.mxu2 %v1319_v7  ;;  %v5298_v7 = vld [vmem:[#allocation2 + $0xb] ss:$0 sm:$0xff] }
 0x90e   :  { %1872 = vmatpush.bf16.xpose.msrb.mxu3 %v4386_v48  ;;  %1885 = vmatpush.bf16.xpose.msrb.mxu2 %v4390_v49  ;;  %v1201_v13 = vpop.f32.mrf.mxu3  ;;  %v1214_v14 = vpop.f32.mrf.mxu2 }
 0x911   :  { %1899 = vmatpush.bf16.xpose.msra.mxu0 %v4330_v57  ;;  %1912 = vmatpush.bf16.xpose.msra.mxu1 %v4334_v61  ;;  %v1277_v22 = vpop.f32.mrf.mxu0  ;;  %v1290_v23 = vpop.f32.mrf.mxu1 }
 0x912   :  { %v1278_v37 = vadd.f32 %v1277_v22, %v745_v24  ;;  %v1291_v38 = vadd.f32 %v1290_v23, %v746_v25 }
 0x914   :  { %v1308_v49 = vmax.f32 %v1278_v37, 0.0  ;;  %v1309_v50 = vmax.f32 %v1291_v38, 0.0 }
 0x916   :  { %1873 = vmatpush.bf16.xpose.msrb.mxu3 %v4322_v8  ;;  %1886 = vmatpush.bf16.xpose.msrb.mxu2 %v4326_v9  ;;  %v1251_v32 = vpop.f32.mrf.mxu3  ;;  %v1264_v34 = vpop.f32.mrf.mxu2  ;;  %v1324_v58 = vpack.c.bf16 %v1308_v49, %v1308_v49  ;;  %v1325_v16 = vpack.c.bf16 %v1309_v50, %v1309_v50 }
 0x917   :  { %v1252_v54 = vadd.f32 %v1251_v32, %v743_v39  ;;  %v1265_v57 = vadd.f32 %v1264_v34, %v744_v42 }
 0x919   :  { %1900 = vmatpush.bf16.xpose.msra.mxu0 %v4266_v15  ;;  %1913 = vmatpush.bf16.xpose.msra.mxu1 %v4270_v17  ;;  %v1279_v47 = vpop.f32.mrf.mxu0  ;;  %v1292_v48 = vpop.f32.mrf.mxu1  ;;  %v1306_v60 = vmax.f32 %v1252_v54, 0.0  ;;  %v1307_v61 = vmax.f32 %v1265_v57, 0.0 }
 0x91b   :  { %v1322_v62 = vpack.c.bf16 %v1306_v60, %v1306_v60  ;;  %v1323_v41 = vpack.c.bf16 %v1307_v61, %v1307_v61  ;;  %v5139_v60 = vld [vmem:[#allocation6 + $0x74] sm:$0xf] }
 0x91e   :  { %1874 = vmatpush.bf16.xpose.msrb.mxu3 %v4258_v27  ;;  %1887 = vmatpush.bf16.xpose.msrb.mxu2 %v4262_v28  ;;  %v1253_v33 = vpop.f32.mrf.mxu3  ;;  %v1266_v59 = vpop.f32.mrf.mxu2 }
 0x921   :  { %1901 = vmatpush.bf16.xpose.msra.mxu0 %v4202_v35  ;;  %1914 = vmatpush.bf16.xpose.msra.mxu1 %v4206_v36 }
 0x926   :  { %1875 = vmatpush.bf16.xpose.msrb.mxu3 %v4194_v52  ;;  %1888 = vmatpush.bf16.xpose.msrb.mxu2 %v4198_v53 }
 0x928   :  { %1902 = vmatmul.bf16.vlgmr.msra.gmra.mxu0 %v1324_v58  ;;  %1915 = vmatmul.bf16.vlgmr.msra.gmra.mxu1 %v1325_v16  ;;  %v4425_v58 = vld [vmem:[#allocation6 + $0x70] sm:$0xf]  ;;  %v5140_v16 = vld [vmem:[#allocation6 + $0x74] sm:$0xf0] }
 0x929   :  { %v4426_v61 = vor.u32 %v5140_v16, %v4425_v58 }
 0x92d   :  { %1876 = vmatmul.bf16.vlgmr.msrb.gmra.mxu3 %v1322_v62  ;;  %1889 = vmatmul.bf16.vlgmr.msrb.gmra.mxu2 %v1323_v41  ;;  %v4427_v62 = vld [vmem:[#allocation6 + $0x78] sm:$0xf0] }
 0x92e   :  { %v4430_v41 = vor.u32 %v5139_v60, %v4427_v62  ;;  %2006 = vmatpush.bf16.msra.mxu3 %v4426_v61 }
 0x930   :  { %2019 = vmatpush.bf16.msra.mxu2 %v4430_v41 }
 0x965   :  { %v1747_v63 = vpop.f32.mrf.mxu0  ;;  %v1760_v0 = vpop.f32.mrf.mxu1 }
 0x96d   :  { %v1749_v1 = vpop.f32.mrf.mxu0  ;;  %v1762_v2 = vpop.f32.mrf.mxu1 }
 0x96e   :  { %v4419_v2 = vld [vmem:[#allocation6 + $0x68] sm:$0xf0] }
 0x970   :  { %v1721_v3 = vpop.f32.mrf.mxu3  ;;  %v1734_v4 = vpop.f32.mrf.mxu2 }
 0x971   :  { %v1722_v10 = vadd.f32 %v5298_v7, %v1721_v3 }
 0x973   :  { %v1735_v13 = vadd.f32 %v1734_v4, %v1722_v10  ;;  %v4409_v4 = vld [vmem:[#allocation6 + $0x50] sm:$0xf]  ;;  %v5133_v10 = vld [vmem:[#allocation6 + $0x44] sm:$0xf] }
 0x975   :  { %v1799_v56 = vpop.f32.mrf.mxu0  ;;  %v1812_v5 = vpop.f32.mrf.mxu1  ;;  %v1748_v17 = vadd.f32 %v1747_v63, %v1735_v13  ;;  %v5138_v63 = vld [vmem:[#allocation6 + $0x64] sm:$0xf0] }
 0x977   :  { %v1761_v20 = vadd.f32 %v1760_v0, %v1748_v17  ;;  %v5137_v0 = vld [vmem:[#allocation6 + $0x64] sm:$0xf] }
 0x978   :  { %v1723_v6 = vpop.f32.mrf.mxu3  ;;  %v1736_v55 = vpop.f32.mrf.mxu2  ;;  %v4422_v3 = vor.u32 %v5137_v0, %v4419_v2 }
 0x979   :  { %v4411_v55 = vld [vmem:[#allocation6 + $0x58] sm:$0xf0] }
 0x97a   :  { %2020 = vmatpush.bf16.msra.mxu2 %v4422_v3 }
 0x97d   :  { %v1801_v8 = vpop.f32.mrf.mxu0  ;;  %v1814_v9 = vpop.f32.mrf.mxu1 }
 0x97e   :  { %v4401_v8 = vld [vmem:[#allocation6 + $0x40] sm:$0xf]  ;;  %v5134_v9 = vld [vmem:[#allocation6 + $0x44] sm:$0xf0] }
 0x980   :  { %v1773_v11 = vpop.f32.mrf.mxu3  ;;  %v1786_v12 = vpop.f32.mrf.mxu2 }
 0x981   :  { %v1774_v23 = vadd.f32 %v1773_v11, %v1761_v20  ;;  %v4402_v11 = vor.u32 %v5134_v9, %v4401_v8  ;;  %v5142_v8 = vld [vmem:[#allocation6 + $0x58] sm:$0xf0] }
 0x983   :  { %v1787_v26 = vadd.f32 %v1786_v12, %v1774_v23  ;;  %v4403_v12 = vld [vmem:[#allocation6 + $0x48] sm:$0xf0] }
 0x984   :  { %v4406_v13 = vor.u32 %v5133_v10, %v4403_v12  ;;  %v4446_v10 = vld [vmem:[#allocation6 + $0x44] sm:$0xf] }
 0x985   :  { %v1851_v14 = vpop.f32.mrf.mxu0  ;;  %v1864_v15 = vpop.f32.mrf.mxu1  ;;  %v1800_v27 = vadd.f32 %v1799_v56, %v1787_v26  ;;  %v5136_v56 = vld [vmem:[#allocation6 + $0x54] sm:$0xf0] }
 0x986   :  { %v4410_v6 = vor.u32 %v5136_v56, %v4409_v4 }
 0x987   :  { %v1813_v30 = vadd.f32 %v1812_v5, %v1800_v27  ;;  %v5135_v5 = vld [vmem:[#allocation6 + $0x54] sm:$0xf]  ;;  %v5300_v27 = vld [vmem:[#allocation2 + $0xa] ss:$0 sm:$0xff] }
 0x988   :  { %v1775_v18 = vpop.f32.mrf.mxu3  ;;  %v1788_v19 = vpop.f32.mrf.mxu2  ;;  %v4414_v7 = vor.u32 %v5135_v5, %v4411_v55 }
 0x98a   :  { %2021 = vmatpush.bf16.msra.mxu2 %v4414_v7  ;;  %v4441_v7 = vld [vmem:[#allocation6 + $0x54] sm:$0xf] }
 0x98b   :  { %v4442_v9 = vor.u32 %v5142_v8, %v4441_v7 }
 0x98d   :  { %v1853_v21 = vpop.f32.mrf.mxu0  ;;  %v1866_v22 = vpop.f32.mrf.mxu1 }
 0x98e   :  { %2022 = vmatpush.bf16.msra.mxu2 %v4406_v13 }
 0x990   :  { %v1825_v24 = vpop.f32.mrf.mxu3  ;;  %v1838_v25 = vpop.f32.mrf.mxu2 }
 0x991   :  { %v1826_v31 = vadd.f32 %v1825_v24, %v1813_v30 }
 0x993   :  { %v1839_v35 = vadd.f32 %v1838_v25, %v1826_v31  ;;  %v5299_v25 = vld [vmem:[#allocation2 + $0x9] ss:$0 sm:$0xff] }
 0x995   :  { %v1852_v36 = vadd.f32 %v1851_v14, %v1839_v35  ;;  %v5301_v14 = vld [vmem:[#allocation2 + $0xd] ss:$0 sm:$0xff] }
 0x996   :  { %2034 = vrot.lane.b32.xlu1 %v5301_v14, %s5463_s22 }
 0x997   :  { %v1865_v39 = vadd.f32 %v1864_v15, %v1852_v36 }
 0x998   :  { %v1827_v28 = vpop.f32.mrf.mxu3  ;;  %v1840_v29 = vpop.f32.mrf.mxu2 }
 0x9a5   :  { %v1903_v32 = vpop.f32.mrf.mxu0  ;;  %v1916_v34 = vpop.f32.mrf.mxu1 }
 0x9ad   :  { %v1905_v37 = vpop.f32.mrf.mxu0  ;;  %v1918_v38 = vpop.f32.mrf.mxu1 }
 0x9b0   :  { %v1877_v42 = vpop.f32.mrf.mxu3  ;;  %v1890_v43 = vpop.f32.mrf.mxu2 }
 0x9b1   :  { %v1878_v44 = vadd.f32 %v1877_v42, %v1865_v39 }
 0x9b3   :  { %v1891_v45 = vadd.f32 %v1890_v43, %v1878_v44 }
 0x9b5   :  { %v1904_v46 = vadd.f32 %v1903_v32, %v1891_v45  ;;  %v5302_v32 = vld [vmem:[#allocation2 + $0xc] ss:$0 sm:$0xff] }
 0x9b7   :  { %v1917_v47 = vadd.f32 %v1916_v34, %v1904_v46  ;;  %v5303_v34 = vld [vmem:[#allocation2 + $0xe] ss:$0 sm:$0xff] }
 0x9b8   :  { %v1879_v48 = vpop.f32.mrf.mxu3  ;;  %v1892_v49 = vpop.f32.mrf.mxu2 }
 0x9b9   :  { %v1920_v50 = vadd.f32 %v1917_v47, %v5616_v51  ;;  %v4417_v51 = vld [vmem:[#allocation6 + $0x60] sm:$0xf] }
 0x9ba   :  { %v4418_v1 = vor.u32 %v5138_v63, %v4417_v51 }
 0x9bb   :  { %v1923_v52 = vsel %vm153_vm0, %v1920_v50, 0.0 }
 0x9bc   :  { %1924 = vadd.xlane.f32.xlu2 %v1923_v52  ;;  %2007 = vmatpush.bf16.msra.mxu3 %v4418_v1 }
 0x9c0   :  { %2008 = vmatpush.bf16.msra.mxu3 %v4410_v6 }
 0x9c4   :  { %2009 = vmatpush.bf16.msra.mxu3 %v4402_v11  ;;  %v5141_v11 = vld [vmem:[#allocation6 + $0x48] sm:$0xf0] }
 0x9c5   :  { %v4447_v12 = vor.u32 %v5141_v11, %v4446_v10 }
 0xa08   :  { %v2035_v35 = vpop.permute.xlu1 %2034 }
 0xa2f   :  { %v1925_v53 = vpop.xlane.xlu2 %1924 }
 0xa30   :  { %v1926_v54 = vmul.f32 %v1925_v53, %v5606_v40 }
 0xa32   :  { %v1927_v57 = vsub.f32 %v1920_v50, %v1926_v54 }
 0xa34   :  { %v1928_v33 = vmul.f32 %v1927_v57, %v1927_v57 }
 0xa36   :  { %v1929_v59 = vsel %vm153_vm0, %v1928_v33, 0.0 }
 0xa37   :  { %1930 = vadd.xlane.f32.xlu0 %v1929_v59 }
 0xaaa   :  { %v1931_v15 = vpop.xlane.xlu0 %1930 }
 0xaab   :  { %v1932_v17 = vmul.f32 %v1931_v15, %v5606_v40 }
 0xaad   :  { %v1933_v18 = vadd.f32 1e-05, %v1932_v17 }
 0xaaf   :  { %5332 = vrsqrt.f32 %v1933_v18  ;;  %vm1940_vm11 = vweird.f32 %v1933_v18 }
 0xab5   :  { %v5333_v19 = vpop.eup %5332 }
 0xab6   :  { %v1935_v20 = vmul.f32 %v5333_v19, %v1933_v18  ;;  %vm1941_vm10 = vweird.f32 %v5333_v19 }
 0xab7   :  { %vm1942_vm12 = vmor %vm1940_vm11, %vm1941_vm10 }
 0xab8   :  { %v1936_v21 = vmul.f32 %v5333_v19, %v1935_v20 }
 0xaba   :  { %v1937_v22 = vmul.f32 0.5, %v1936_v21 }
 0xabc   :  { %v1938_v23 = vsub.f32 1.5, %v1937_v22 }
 0xabe   :  { %v1939_v24 = vmul.f32 %v5333_v19, %v1938_v23 }
 0xac0   :  { %v1943_v26 = vsel %vm1942_vm12, %v5333_v19, %v1939_v24 }
 0xac1   :  { %v1944_v28 = vmul.f32 %v1943_v26, %v1927_v57 }
 0xac3   :  { %v1946_v29 = vmul.f32 %v5299_v25, %v1944_v28  ;;  %v5144_v28 = vld [vmem:[#allocation6 + $0x78] sm:$0xf0] }
 0xac5   :  { %v5680_v30 = vadd.f32 %v5300_v27, %v1946_v29  ;;  %v4462_v27 = vld [vmem:[#allocation6 + $0x74] sm:$0xf] }
 0xac6   :  { %v4463_v29 = vor.u32 %v5144_v28, %v4462_v27 }
 0xac7   :  { %v1949_v31 = vpack.c.bf16 %v5680_v30, %v5680_v30 }
 0xac9   :  { %4431 = vmatmul.msk.bf16.vlgmr.msra.gmra.mxu3 %vm153_vm0, %v1949_v31  ;;  %4432 = vmatmul.msk.bf16.vlgmr.msra.gmra.mxu2 %vm153_vm0, %v1949_v31 }
 0xb4c   :  { %v2011_v36 = vpop.f32.mrf.mxu3  ;;  %v2024_v37 = vpop.f32.mrf.mxu2 }
 0xb4d   :  { %v2030_v38 = vadd.f32 %v5302_v32, %v2011_v36  ;;  %v2037_v39 = vadd.f32 %v2035_v35, %v2011_v36  ;;  %v2040_v42 = vadd.f32 %v5303_v34, %v2024_v37  ;;  %v4454_v34 = vld [vmem:[#allocation6 + $0x64] sm:$0xf]  ;;  %v5143_v35 = vld [vmem:[#allocation6 + $0x68] sm:$0xf0] }
 0xb4e   :  { %v4455_v36 = vor.u32 %v5143_v35, %v4454_v34 }
 0xb4f   :  { %2120 = vmatpush.msrb.mxu1 %v2040_v42  ;;  %2128 = vrot.lane.b32.xlu0 %v2037_v39, %s5468_s27 }
 0xb50   :  { %2050 = vrot.lane.b32.xlu2 %v2037_v39, %s5463_s22  ;;  %2126 = vrot.lane.b32.xlu1 %v2030_v38, %s5465_s1 }
 0xb54   :  { %v2013_v43 = vpop.f32.mrf.mxu3  ;;  %v2026_v44 = vpop.f32.mrf.mxu2 }
 0xb57   :  { %2257 = vrot.lane.b32.xlu0 %v2037_v39, %s5470_s29 }
 0xb58   :  { %2255 = vrot.lane.b32.xlu2 %v2030_v38, %s5467_s26 }
 0xbaa   :  { %v2051_v45 = vpop.permute.xlu2 %2050 }
 0xbab   :  { %4433 = vmatpush.xpose.msk.msrb.mxu0 %vm207_vm1, %v2051_v45 }
 0xbae   :  { %4434 = vmatmul.msk.f32.vlgmr.msrb.gmra.mxu0 %vm207_vm1, %v2030_v38 }
 0xbb2   :  { %v2256_v49 = vpop.permute.xlu2 %2255 }
 0xbc1   :  { %v2129_v46 = vpop.permute.xlu0 %2128 }
 0xbc2   :  { %4436 = vmatpush.xpose.msk.msra.mxu0 %vm207_vm1, %v2129_v46  ;;  %v2127_v47 = vpop.permute.xlu1 %2126 }
 0xbc5   :  { %4437 = vmatmul.msk.f32.vlgmr.msra.gmra.mxu0 %vm207_vm1, %v2127_v47 }
 0xbc9   :  { %v2258_v48 = vpop.permute.xlu0 %2257 }
 0xbca   :  { %4449 = vmatpush.xpose.msk.msrb.mxu0 %vm207_vm1, %v2258_v48 }
 0xbcd   :  { %4450 = vmatmul.msk.f32.vlgmr.msrb.gmra.mxu0 %vm207_vm1, %v2256_v49 }
 0xc2b   :  { %v2074_v50 = vpop.f32.mrf.mxu0 }
 0xc2c   :  { %v2077_v52 = vmul.f32 0.25, %v2074_v50 }
 0xc2e   :  { %v2078_v53 = vsel %vm234_vm2, %v2077_v52, -inf }
 0xc2f   :  { %2079 = vmax.xlane.f32.xlu1 %v2078_v53 }
 0xc42   :  { %v2151_v54 = vpop.f32.mrf.mxu0 }
 0xc43   :  { %v2154_v57 = vmul.f32 0.25, %v2151_v54 }
 0xc45   :  { %v2155_v33 = vsel %vm234_vm2, %v2154_v57, -inf }
 0xc46   :  { %2156 = vmax.xlane.f32.xlu0 %v2155_v33 }
 0xc4a   :  { %v2280_v59 = vpop.f32.mrf.mxu0 }
 0xc4b   :  { %v2283_v58 = vmul.f32 0.25, %v2280_v59 }
 0xc4d   :  { %v2284_v16 = vsel %vm234_vm2, %v2283_v58, -inf }
 0xc4e   :  { %2285 = vmax.xlane.f32.xlu2 %v2284_v16 }
 0xc5a   :  { %2308 = vrot.lane.b32.xlu0 %v2040_v42, %s5467_s26 }
 0xca2   :  { %v2080_v60 = vpop.xlane.xlu1 %2079 }
 0xca3   :  { %v2081_v61 = vsub.f32 %v2077_v52, %v2080_v60 }
 0xca5   :  { %v2082_v62 = vmul.f32 1.442695, %v2081_v61 }
 0xca7   :  { %5334 = vpow2.f32 %v2082_v62 }
 0xcad   :  { %v5335_v41 = vpop.eup %5334 }
 0xcae   :  { %v2084_v51 = vsel %vm234_vm2, %v5335_v41, 0.0 }
 0xcaf   :  { %2085 = vadd.xlane.f32.xlu1 %v2084_v51 }
 0xcb9   :  { %v2157_v63 = vpop.xlane.xlu0 %2156 }
 0xcba   :  { %v2158_v0 = vsub.f32 %v2154_v57, %v2157_v63 }
 0xcbc   :  { %v2159_v1 = vmul.f32 1.442695, %v2158_v0 }
 0xcbe   :  { %5336 = vpow2.f32 %v2159_v1 }
 0xcc1   :  { %v2286_v2 = vpop.xlane.xlu2 %2285 }
 0xcc2   :  { %v2287_v3 = vsub.f32 %v2283_v58, %v2286_v2 }
 0xcc4   :  { %v5702_v4 = vpop.eup %5336  ;;  %v2288_v56 = vmul.f32 1.442695, %v2287_v3 }
 0xcc5   :  { %v2161_v5 = vsel %vm234_vm2, %v5702_v4, 0.0 }
 0xcc6   :  { %5338 = vpow2.f32 %v2288_v56  ;;  %2162 = vadd.xlane.f32.xlu0 %v2161_v5 }
 0xcc8   :  { %2180 = vrot.lane.b32.xlu1 %v2040_v42, %s5465_s1 }
 0xccc   :  { %v5707_v6 = vpop.eup %5338  ;;  %v2309_v22 = vpop.permute.xlu0 %2308 }
 0xccd   :  { %v2290_v55 = vsel %vm234_vm2, %v5707_v6, 0.0 }
 0xcce   :  { %2291 = vadd.xlane.f32.xlu2 %v2290_v55 }
 0xcda   :  { %2360 = vrot.lane.b32.xlu0 %v2030_v38, %s5469_s28 }
 0xce2   :  { %2212 = vrot.lane.b32.xlu0 %v4442_v9, %s5463_s22 }
 0xce6   :  { %2362 = vrot.lane.b32.xlu2 %v2037_v39, %s5466_s2 }
 0xcea   :  { %2413 = vrot.lane.b32.xlu0 %v2040_v42, %s5469_s28 }
 0xcf2   :  { %2236 = vrot.lane.b32.xlu0 %v4447_v12, %s5463_s22 }
 0xcfa   :  { %2445 = vrot.lane.b32.xlu0 %v4463_v29, %s5463_s22 }
 0xd02   :  { %2340 = vrot.lane.b32.xlu0 %v4455_v36, %s5463_s22 }
 0xd22   :  { %v2086_v13 = vpop.xlane.xlu1 %2085 }
 0xd23   :  { %5340 = vrcp.f32 %v2086_v13  ;;  %v2098_v18 = vand.u32 2147483648, %v2086_v13  ;;  %v2096_v20 = vand.u32 2147483647, %v2086_v13  ;;  %vm2092_vm14 = vweird.f32 %v2086_v13 }
 0xd25   :  { %v2099_v23 = vor.u32 1.1754944e-38, %v2098_v18  ;;  %vm2097_vm3 = vcmp.eq.f32.partialorder %v2096_v20, 8.507059e+37 }
 0xd29   :  { %v5341_v14 = vpop.eup %5340 }
 0xd2a   :  { %v2088_v15 = vmul.f32 %v5341_v14, %v2086_v13  ;;  %vm2093_vm13 = vweird.f32 %v5341_v14 }
 0xd2b   :  { %vm2094_vm15 = vmor %vm2092_vm14, %vm2093_vm13 }
 0xd2c   :  { %v2089_v17 = vsub.f32 1.0, %v2088_v15 }
 0xd2e   :  { %v2090_v19 = vmul.f32 %v5341_v14, %v2089_v17 }
 0xd30   :  { %v2091_v21 = vadd.f32 %v5341_v14, %v2090_v19 }
 0xd32   :  { %v2095_v24 = vsel %vm2094_vm15, %v5341_v14, %v2091_v21 }
 0xd33   :  { %v2100_v25 = vsel %vm2097_vm3, %v2099_v23, %v2095_v24 }
 0xd34   :  { %v2101_v26 = vmul.f32 %v5335_v41, %v2100_v25 }
 0xd36   :  { %4435 = vmatmul.msk.f32.vlgmr.msrb.gmra.mxu1 %vm234_vm2, %v2101_v26 }
 0xd39   :  { %v2163_v31 = vpop.xlane.xlu0 %2162 }
 0xd3a   :  { %5342 = vrcp.f32 %v2163_v31  ;;  %v2181_v32 = vpop.permute.xlu1 %2180  ;;  %v2175_v43 = vand.u32 2147483648, %v2163_v31  ;;  %v2173_v45 = vand.u32 2147483647, %v2163_v31  ;;  %vm2169_vm5 = vweird.f32 %v2163_v31 }
 0xd3b   :  { %2201 = vmatpush.msra.mxu1 %v2181_v32 }
 0xd3c   :  { %v2176_v48 = vor.u32 1.1754944e-38, %v2175_v43  ;;  %vm2174_vm7 = vcmp.eq.f32.partialorder %v2173_v45, 8.507059e+37  ;;  %v5304_v43 = vld [vmem:[#allocation2 + $0xf] ss:$0 sm:$0xff] }
 0xd3d   :  { %2329 = vmatpush.msrb.mxu1 %v2309_v22 }
 0xd40   :  { %v5343_v37 = vpop.eup %5342 }
 0xd41   :  { %v2165_v38 = vmul.f32 %v5343_v37, %v2163_v31  ;;  %v2292_v39 = vpop.xlane.xlu2 %2291  ;;  %vm2170_vm4 = vweird.f32 %v5343_v37 }
 0xd42   :  { %5344 = vrcp.f32 %v2292_v39  ;;  %vm2171_vm6 = vmor %vm2169_vm5, %vm2170_vm4  ;;  %v2304_v57 = vand.u32 2147483648, %v2292_v39  ;;  %v2302_v58 = vand.u32 2147483647, %v2292_v39  ;;  %vm2298_vm9 = vweird.f32 %v2292_v39 }
 0xd43   :  { %v2166_v42 = vsub.f32 1.0, %v2165_v38 }
 0xd44   :  { %v2305_v61 = vor.u32 1.1754944e-38, %v2304_v57  ;;  %vm2303_vm11 = vcmp.eq.f32.partialorder %v2302_v58, 8.507059e+37  ;;  %v5193_v58 = vld [vmem:[#allocation7 + $0x584] sm:$0xf] }
 0xd45   :  { %v2167_v44 = vmul.f32 %v5343_v37, %v2166_v42 }
 0xd47   :  { %v2168_v46 = vadd.f32 %v5343_v37, %v2167_v44 }
 0xd48   :  { %v5345_v47 = vpop.eup %5344 }
 0xd49   :  { %v2172_v49 = vsel %vm2171_vm6, %v5343_v37, %v2168_v46  ;;  %v2294_v50 = vmul.f32 %v5345_v47, %v2292_v39  ;;  %vm2299_vm8 = vweird.f32 %v5345_v47  ;;  %v2363_v16 = vpop.permute.xlu2 %2362 }
 0xd4a   :  { %v2177_v52 = vsel %vm2174_vm7, %v2176_v48, %v2172_v49  ;;  %vm2300_vm10 = vmor %vm2298_vm9, %vm2299_vm8  ;;  %vm3796_vm7 = vcmask 7168  }
 0xd4b   :  { %v2295_v53 = vsub.f32 1.0, %v2294_v50  ;;  %v2178_v54 = vmul.f32 %v5702_v4, %v2177_v52 }
 0xd4c   :  { %v2361_v33 = vpop.permute.xlu0 %2360 }
 0xd4d   :  { %v2296_v59 = vmul.f32 %v5345_v47, %v2295_v53  ;;  %4438 = vmatmul.msk.f32.vlgmr.msra.gmra.mxu1 %vm234_vm2, %v2178_v54 }
 0xd4e   :  { %4457 = vmatpush.xpose.msk.msra.mxu1 %vm207_vm1, %v2363_v16 }
 0xd4f   :  { %v2297_v60 = vadd.f32 %v5345_v47, %v2296_v59  ;;  %v5201_v59 = vld [vmem:[#allocation7 + $0x5bc] sm:$0xf0] }
 0xd51   :  { %v2301_v62 = vsel %vm2300_vm10, %v5345_v47, %v2297_v60  ;;  %v4667_v60 = vld [vmem:[#allocation7 + $0x588] sm:$0xf] }
 0xd52   :  { %v2306_v41 = vsel %vm2303_vm11, %v2305_v61, %v2301_v62  ;;  %v5202_v61 = vld [vmem:[#allocation7 + $0x5c4] sm:$0xf0] }
 0xd53   :  { %v2307_v51 = vmul.f32 %v5707_v6, %v2306_v41  ;;  %v4668_v41 = vor.u32 %v5202_v61, %v4667_v60  ;;  %v4619_v61 = vld [vmem:[#allocation7 + $0x518] sm:$0xf] }
 0xd54   :  { %v2213_v63 = vpop.permute.xlu0 %2212 }
 0xd55   :  { %4451 = vmatmul.msk.f32.vlgmr.msrb.gmra.mxu1 %vm234_vm2, %v2307_v51  ;;  %2225 = vmatpush.bf16.msrb.mxu3 %v2213_v63  ;;  %v5194_v51 = vld [vmem:[#allocation7 + $0x58c] sm:$0xf] }
 0xd56   :  { %v4669_v63 = vld [vmem:[#allocation7 + $0x5c8] sm:$0xf0] }
 0xd5c   :  { %v2414_v0 = vpop.permute.xlu0 %2413 }
 0xd5d   :  { %4458 = vmatmul.msk.f32.vlgmr.msra.gmra.mxu1 %vm207_vm1, %v2361_v33  ;;  %2434 = vmatpush.msra.mxu3 %v2414_v0  ;;  %v4659_v33 = vld [vmem:[#allocation7 + $0x580] sm:$0xf]  ;;  %v4672_v0 = vor.u32 %v5194_v51, %v4669_v63 }
 0xd5e   :  { %v4660_v16 = vor.u32 %v5201_v59, %v4659_v33  ;;  %v5187_v59 = vld [vmem:[#allocation7 + $0x54c] sm:$0xf0] }
 0xd64   :  { %v2237_v1 = vpop.permute.xlu0 %2236 }
 0xd65   :  { %2249 = vmatpush.bf16.msrb.mxu2 %v2237_v1  ;;  %v4595_v1 = vld [vmem:[#allocation7 + $0x500] sm:$0xf] }
 0xd6c   :  { %v2446_v2 = vpop.permute.xlu0 %2445 }
 0xd6d   :  { %2458 = vmatpush.bf16.msra.mxu2 %v2446_v2  ;;  %v5185_v2 = vld [vmem:[#allocation7 + $0x53c] sm:$0xf0] }
 0xd74   :  { %v2341_v3 = vpop.permute.xlu0 %2340 }
 0xd75   :  { %2353 = vmatpush.bf16.msra.mxu0 %v2341_v3  ;;  %v5177_v3 = vld [vmem:[#allocation7 + $0x504] sm:$0xf] }
 0xd79   :  { %2928 = vmatpush.bf16.msrb.mxu0 %v4660_v16  ;;  %v4613_v16 = vld [vmem:[#allocation7 + $0x550] sm:$0xf0] }
 0xdb3   :  { %v2122_v4 = vpop.f32.mrf.mxu1 }
 0xdb4   :  { %v2125_v56 = vpack.c.bf16 %v2122_v4, %v2122_v4  ;;  %v4596_v4 = vor.u32 %v5185_v2, %v4595_v1  ;;  %v4547_v1 = vld [vmem:[#allocation7 + $0x490] sm:$0xf] }
 0xdb6   :  { %4448 = vmatmul.msk.bf16.vlgmr.msrb.gmra.mxu2 %vm207_vm1, %v2125_v56  ;;  %v4597_v56 = vld [vmem:[#allocation7 + $0x540] sm:$0xf0]  ;;  %2929 = vmatpush.bf16.msrb.mxu0 %v4596_v4  ;;  %v5163_v4 = vld [vmem:[#allocation7 + $0x494] sm:$0xf] }
 0xdb7   :  { %2967 = vmatpush.bf16.msrb.mxu2 %v4672_v0  ;;  %v4621_v0 = vld [vmem:[#allocation7 + $0x558] sm:$0xf0] }
 0xdca   :  { %v2203_v5 = vpop.f32.mrf.mxu1 }
 0xdcb   :  { %v2206_v6 = vpack.c.bf16 %v2203_v5, %v2203_v5  ;;  %v4603_v5 = vld [vmem:[#allocation7 + $0x508] sm:$0xf] }
 0xdcd   :  { %4443 = vmatmul.msk.bf16.vlgmr.msrb.gmra.mxu3 %vm207_vm1, %v2206_v6  ;;  %v5186_v6 = vld [vmem:[#allocation7 + $0x544] sm:$0xf0] }
 0xdce   :  { %2954 = vmatpush.bf16.msrb.mxu3 %v4668_v41  ;;  %v5180_v41 = vld [vmem:[#allocation7 + $0x51c] sm:$0xf] }
 0xdcf   :  { %v4624_v2 = vor.u32 %v5180_v41, %v4621_v0 }
 0xdd2   :  { %v2331_v55 = vpop.f32.mrf.mxu1 }
 0xdd3   :  { %v2334_v7 = vpack.c.bf16 %v2331_v55, %v2331_v55  ;;  %v4600_v55 = vor.u32 %v5177_v3, %v4597_v56  ;;  %v5171_v3 = vld [vmem:[#allocation7 + $0x4cc] sm:$0xf0]  ;;  %v4549_v56 = vld [vmem:[#allocation7 + $0x4d0] sm:$0xf0] }
 0xdd5   :  { %4456 = vmatmul.msk.bf16.vlgmr.msra.gmra.mxu0 %vm207_vm1, %v2334_v7  ;;  %v4604_v7 = vor.u32 %v5186_v6, %v4603_v5  ;;  %v4548_v5 = vor.u32 %v5171_v3, %v4547_v1  ;;  %v4555_v6 = vld [vmem:[#allocation7 + $0x498] sm:$0xf]  ;;  %v4565_v3 = vld [vmem:[#allocation7 + $0x4e0] sm:$0xf0] }
 0xdd7   :  { %2955 = vmatpush.bf16.msrb.mxu3 %v4604_v7  ;;  %v5164_v7 = vld [vmem:[#allocation7 + $0x49c] sm:$0xf] }
 0xdda   :  { %v2385_v8 = vpop.f32.mrf.mxu1 }
 0xddb   :  { %v2388_v9 = vmul.f32 0.25, %v2385_v8  ;;  %v5178_v8 = vld [vmem:[#allocation7 + $0x50c] sm:$0xf] }
 0xddd   :  { %v2389_v10 = vsel %vm234_vm2, %v2388_v9, -inf }
 0xdde   :  { %2390 = vmax.xlane.f32.xlu1 %v2389_v10 }
 0xe39   :  { %v2251_v11 = vpop.f32.mrf.mxu2 }
 0xe41   :  { %v2253_v12 = vpop.f32.mrf.mxu2 }
 0xe42   :  { %v5169_v12 = vld [vmem:[#allocation7 + $0x4bc] sm:$0xf0] }
 0xe50   :  { %v2227_v13 = vpop.f32.mrf.mxu3 }
 0xe51   :  { %v2252_v14 = vadd.f32 %v2251_v11, %v2227_v13  ;;  %v2391_v15 = vpop.xlane.xlu1 %2390  ;;  %v4531_v11 = vld [vmem:[#allocation7 + $0x480] sm:$0xf]  ;;  %v5161_v13 = vld [vmem:[#allocation7 + $0x484] sm:$0xf] }
 0xe52   :  { %v2392_v17 = vsub.f32 %v2388_v9, %v2391_v15  ;;  %v2355_v18 = vpop.f32.mrf.mxu0  ;;  %v4605_v9 = vld [vmem:[#allocation7 + $0x548] sm:$0xf0]  ;;  %v4533_v15 = vld [vmem:[#allocation7 + $0x4c0] sm:$0xf0] }
 0xe53   :  { %v2359_v19 = vadd.f32 %v2355_v18, %v2252_v14  ;;  %v4608_v10 = vor.u32 %v5178_v8, %v4605_v9  ;;  %v4532_v14 = vor.u32 %v5169_v12, %v4531_v11  ;;  %v5170_v18 = vld [vmem:[#allocation7 + $0x4c4] sm:$0xf0]  ;;  %v4552_v8 = vor.u32 %v5163_v4, %v4549_v56  ;;  %v4483_v11 = vld [vmem:[#allocation7 + $0x410] sm:$0xf] }
 0xe54   :  { %v2393_v20 = vmul.f32 1.442695, %v2392_v17  ;;  %v4539_v17 = vld [vmem:[#allocation7 + $0x488] sm:$0xf]  ;;  %v5155_v12 = vld [vmem:[#allocation7 + $0x44c] sm:$0xf0] }
 0xe55   :  { %2968 = vmatpush.bf16.msrb.mxu2 %v4608_v10  ;;  %2930 = vmatpush.bf16.msrb.mxu0 %v4532_v14  ;;  %v4557_v10 = vld [vmem:[#allocation7 + $0x4d8] sm:$0xf0]  ;;  %v5147_v14 = vld [vmem:[#allocation7 + $0x414] sm:$0xf]  ;;  %v4571_v4 = vld [vmem:[#allocation7 + $0x4a8] sm:$0xf] }
 0xe56   :  { %5346 = vpow2.f32 %v2393_v20  ;;  %v4540_v20 = vor.u32 %v5170_v18, %v4539_v17  ;;  %v4491_v17 = vld [vmem:[#allocation7 + $0x418] sm:$0xf]  ;;  %v5174_v56 = vld [vmem:[#allocation7 + $0x4e4] sm:$0xf0] }
 0xe57   :  { %v5156_v18 = vld [vmem:[#allocation7 + $0x454] sm:$0xf0] }
 0xe58   :  { %v2229_v21 = vpop.f32.mrf.mxu3  ;;  %2956 = vmatpush.bf16.msrb.mxu3 %v4540_v20  ;;  %v4493_v20 = vld [vmem:[#allocation7 + $0x458] sm:$0xf0] }
 0xe59   :  { %v5162_v21 = vld [vmem:[#allocation7 + $0x48c] sm:$0xf] }
 0xe5a   :  { %v2357_v22 = vpop.f32.mrf.mxu0 }
 0xe5b   :  { %v4541_v22 = vld [vmem:[#allocation7 + $0x4c8] sm:$0xf0] }
 0xe5c   :  { %v5347_v23 = vpop.eup %5346 }
 0xe5d   :  { %v2395_v24 = vsel %vm234_vm2, %v5347_v23, 0.0 }
 0xe5e   :  { %2396 = vadd.xlane.f32.xlu2 %v2395_v24  ;;  %v4467_v24 = vld [vmem:[#allocation7 + $0x400] sm:$0xf] }
 0xed1   :  { %v2397_v25 = vpop.xlane.xlu2 %2396 }
 0xed2   :  { %5348 = vrcp.f32 %v2397_v25  ;;  %v2409_v29 = vand.u32 2147483648, %v2397_v25  ;;  %v2407_v32 = vand.u32 2147483647, %v2397_v25  ;;  %vm2403_vm13 = vweird.f32 %v2397_v25 }
 0xed4   :  { %v2410_v35 = vor.u32 1.1754944e-38, %v2409_v29  ;;  %vm2408_vm15 = vcmp.eq.f32.partialorder %v2407_v32, 8.507059e+37  ;;  %v4475_v29 = vld [vmem:[#allocation7 + $0x408] sm:$0xf] }
 0xed8   :  { %v5349_v26 = vpop.eup %5348 }
 0xed9   :  { %v2399_v27 = vmul.f32 %v5349_v26, %v2397_v25  ;;  %vm2404_vm12 = vweird.f32 %v5349_v26  ;;  %v5153_v25 = vld [vmem:[#allocation7 + $0x43c] sm:$0xf0] }
 0xeda   :  { %vm2405_vm14 = vmor %vm2403_vm13, %vm2404_vm12 }
 0xedb   :  { %v2400_v28 = vsub.f32 1.0, %v2399_v27  ;;  %v4468_v27 = vor.u32 %v5153_v25, %v4467_v24 }
 0xedd   :  { %v2401_v31 = vmul.f32 %v5349_v26, %v2400_v28  ;;  %v4469_v28 = vld [vmem:[#allocation7 + $0x440] sm:$0xf0]  ;;  %2931 = vmatpush.bf16.msrb.mxu0 %v4468_v27 }
 0xedf   :  { %v2402_v34 = vadd.f32 %v5349_v26, %v2401_v31  ;;  %v5154_v31 = vld [vmem:[#allocation7 + $0x444] sm:$0xf0] }
 0xee1   :  { %v2406_v36 = vsel %vm2405_vm14, %v5349_v26, %v2402_v34  ;;  %v5145_v26 = vld [vmem:[#allocation7 + $0x404] sm:$0xf]  ;;  %v4476_v34 = vor.u32 %v5154_v31, %v4475_v29 }
 0xee2   :  { %v2411_v37 = vsel %vm2408_vm15, %v2410_v35, %v2406_v36  ;;  %v4472_v32 = vor.u32 %v5145_v26, %v4469_v28  ;;  %v5146_v35 = vld [vmem:[#allocation7 + $0x40c] sm:$0xf] }
 0xee3   :  { %v2412_v38 = vmul.f32 %v5347_v23, %v2411_v37  ;;  %v4544_v23 = vor.u32 %v5162_v21, %v4541_v22  ;;  %v4477_v36 = vld [vmem:[#allocation7 + $0x448] sm:$0xf0]  ;;  %2957 = vmatpush.bf16.msrb.mxu3 %v4476_v34  ;;  %v4484_v21 = vor.u32 %v5155_v12, %v4483_v11  ;;  %v5149_v12 = vld [vmem:[#allocation7 + $0x424] sm:$0xf] }
 0xee4   :  { %v4480_v37 = vor.u32 %v5146_v35, %v4477_v36  ;;  %v5306_v35 = vld [vmem:[#allocation2 + $0x11] ss:$0 sm:$0xff] }
 0xee5   :  { %4459 = vmatmul.msk.f32.vlgmr.msra.gmra.mxu3 %vm234_vm2, %v2412_v38  ;;  %2969 = vmatpush.bf16.msrb.mxu2 %v4544_v23  ;;  %v4675_v38 = vld [vmem:[#allocation7 + $0x590] sm:$0xf]  ;;  %v4492_v23 = vor.u32 %v5156_v18, %v4491_v17  ;;  %v5150_v17 = vld [vmem:[#allocation7 + $0x42c] sm:$0xf] }
 0xee6   :  { %v4509_v18 = vld [vmem:[#allocation7 + $0x468] sm:$0xf0] }
 0xee9   :  { %2970 = vmatpush.bf16.msrb.mxu2 %v4480_v37 }
 0xf68   :  { %v2436_v39 = vpop.f32.mrf.mxu3 }
 0xf69   :  { %v2439_v42 = vpack.c.bf16 %v2436_v39, %v2436_v39  ;;  %v5203_v39 = vld [vmem:[#allocation7 + $0x5cc] sm:$0xf0] }
 0xf6b   :  { %4464 = vmatmul.msk.bf16.vlgmr.msra.gmra.mxu2 %vm207_vm1, %v2439_v42  ;;  %v5195_v42 = vld [vmem:[#allocation7 + $0x594] sm:$0xf] }
 0xfee   :  { %v2460_v44 = vpop.f32.mrf.mxu2 }
 0xfef   :  { %v2464_v45 = vadd.f32 %v2460_v44, %v2359_v19  ;;  %v4536_v19 = vor.u32 %v5161_v13, %v4533_v15  ;;  %v4677_v44 = vld [vmem:[#allocation7 + $0x5d0] sm:$0xf0]  ;;  %v4560_v13 = vor.u32 %v5164_v7, %v4557_v10  ;;  %v4572_v10 = vor.u32 %v5174_v56, %v4571_v4  ;;  %v5160_v4 = vld [vmem:[#allocation7 + $0x474] sm:$0xf0]  ;;  %v5152_v56 = vld [vmem:[#allocation7 + $0x43c] sm:$0xf] }
 0xff0   :  { %v4485_v15 = vld [vmem:[#allocation7 + $0x450] sm:$0xf0] }
 0xff1   :  { %v2467_v46 = vadd.f32 %v5304_v43, %v2464_v45  ;;  %v4676_v43 = vor.u32 %v5203_v39, %v4675_v38  ;;  %v4683_v45 = vld [vmem:[#allocation7 + $0x598] sm:$0xf]  ;;  %v4488_v22 = vor.u32 %v5147_v14, %v4485_v15  ;;  %v4691_v38 = vld [vmem:[#allocation7 + $0x5a0] sm:$0xf]  ;;  %v4507_v14 = vld [vmem:[#allocation7 + $0x428] sm:$0xf] }
 0xff2   :  { %v5205_v39 = vld [vmem:[#allocation7 + $0x5dc] sm:$0xf0]  ;;  %v5158_v15 = vld [vmem:[#allocation7 + $0x464] sm:$0xf0] }
 0xff3   :  { %v2468_v47 = vadd.f32 %v2467_v46, %v5680_v30  ;;  %v4661_v30 = vld [vmem:[#allocation7 + $0x5c0] sm:$0xf0]  ;;  %v5204_v46 = vld [vmem:[#allocation7 + $0x5d4] sm:$0xf0]  ;;  %2980 = vmatpush.bf16.msra.mxu0 %v4676_v43 }
 0xff4   :  { %v4664_v62 = vor.u32 %v5193_v58, %v4661_v30  ;;  %v5179_v58 = vld [vmem:[#allocation7 + $0x514] sm:$0xf]  ;;  %v4693_v43 = vld [vmem:[#allocation7 + $0x5e0] sm:$0xf0] }
 0xff5   :  { %v2471_v48 = vsel %vm153_vm0, %v2468_v47, 0.0  ;;  %v4616_v60 = vor.u32 %v5179_v58, %v4613_v16  ;;  %v4629_v58 = vld [vmem:[#allocation7 + $0x560] sm:$0xf0]  ;;  %v4635_v16 = vld [vmem:[#allocation7 + $0x528] sm:$0xf] }
 0xff6   :  { %2472 = vadd.xlane.f32.xlu2 %v2471_v48  ;;  %v2462_v49 = vpop.f32.mrf.mxu2  ;;  %2941 = vmatpush.bf16.msrb.mxu1 %v4664_v62  ;;  %v4680_v48 = vor.u32 %v5195_v42, %v4677_v44  ;;  %v5188_v62 = vld [vmem:[#allocation7 + $0x554] sm:$0xf0]  ;;  %v5197_v42 = vld [vmem:[#allocation7 + $0x5a4] sm:$0xf]  ;;  %v4699_v44 = vld [vmem:[#allocation7 + $0x5a8] sm:$0xf] }
 0xff7   :  { %v4684_v49 = vor.u32 %v5204_v46, %v4683_v45  ;;  %v4620_v63 = vor.u32 %v5188_v62, %v4619_v61  ;;  %v5206_v46 = vld [vmem:[#allocation7 + $0x5e4] sm:$0xf0]  ;;  %v4637_v61 = vld [vmem:[#allocation7 + $0x568] sm:$0xf0] }
 0xff9   :  { %3006 = vmatpush.bf16.msra.mxu3 %v4684_v49 }
 0xffa   :  { %2942 = vmatpush.bf16.msrb.mxu1 %v4600_v55  ;;  %v5172_v55 = vld [vmem:[#allocation7 + $0x4d4] sm:$0xf0] }
 0xffb   :  { %v4556_v9 = vor.u32 %v5172_v55, %v4555_v6  ;;  %v4573_v6 = vld [vmem:[#allocation7 + $0x4e8] sm:$0xf0] }
 0xffd   :  { %3007 = vmatpush.bf16.msra.mxu3 %v4620_v63  ;;  %v5173_v63 = vld [vmem:[#allocation7 + $0x4dc] sm:$0xf0] }
 0xffe   :  { %2943 = vmatpush.bf16.msrb.mxu1 %v4536_v19  ;;  %v5148_v19 = vld [vmem:[#allocation7 + $0x41c] sm:$0xf] }
 0xfff   :  { %v4496_v25 = vor.u32 %v5148_v19, %v4493_v20 }
0x1001   :  { %3008 = vmatpush.bf16.msra.mxu3 %v4556_v9  ;;  %v5157_v9 = vld [vmem:[#allocation7 + $0x45c] sm:$0xf0] }
0x1002   :  { %2944 = vmatpush.bf16.msrb.mxu1 %v4472_v32  ;;  %v5305_v32 = vld [vmem:[#allocation2 + $0x10] ss:$0 sm:$0xff] }
0x1005   :  { %3009 = vmatpush.bf16.msra.mxu3 %v4492_v23  ;;  %v4508_v23 = vor.u32 %v5158_v15, %v4507_v14  ;;  %v5266_v14 = vld [vmem:[#allocation7 + $0x7c4] sm:$0xf0]  ;;  %v5258_v15 = vld [vmem:[#allocation7 + $0x78c] sm:$0xf] }
0x1006   :  { %2993 = vmatpush.bf16.msra.mxu1 %v4680_v48  ;;  %v4701_v48 = vld [vmem:[#allocation7 + $0x5e8] sm:$0xf0] }
0x100a   :  { %2994 = vmatpush.bf16.msra.mxu1 %v4616_v60  ;;  %v5182_v60 = vld [vmem:[#allocation7 + $0x52c] sm:$0xf] }
0x100b   :  { %v4640_v1 = vor.u32 %v5182_v60, %v4637_v61  ;;  %v4589_v60 = vld [vmem:[#allocation7 + $0x4f8] sm:$0xf0] }
0x100e   :  { %2995 = vmatpush.bf16.msra.mxu1 %v4552_v8  ;;  %v4499_v8 = vld [vmem:[#allocation7 + $0x420] sm:$0xf] }
0x100f   :  { %v4500_v19 = vor.u32 %v5157_v9, %v4499_v8  ;;  %v5265_v8 = vld [vmem:[#allocation7 + $0x7bc] sm:$0xf0] }
0x1012   :  { %2996 = vmatpush.bf16.msra.mxu1 %v4488_v22  ;;  %v5207_v22 = vld [vmem:[#allocation7 + $0x5ec] sm:$0xf0] }
0x1069   :  { %v2473_v50 = vpop.xlane.xlu2 %2472 }
0x106a   :  { %v2474_v52 = vmul.f32 %v2473_v50, %v5606_v40  ;;  %v5196_v50 = vld [vmem:[#allocation7 + $0x59c] sm:$0xf] }
0x106c   :  { %v5735_v53 = vsub.f32 %v2468_v47, %v2474_v52  ;;  %v4685_v52 = vld [vmem:[#allocation7 + $0x5d8] sm:$0xf0] }
0x106d   :  { %v4688_v33 = vor.u32 %v5196_v50, %v4685_v52  ;;  %v4692_v50 = vor.u32 %v5205_v39, %v4691_v38  ;;  %v4696_v52 = vor.u32 %v5197_v42, %v4693_v43  ;;  %v5183_v39 = vld [vmem:[#allocation7 + $0x534] sm:$0xf]  ;;  %v4651_v43 = vld [vmem:[#allocation7 + $0x538] sm:$0xf] }
0x106e   :  { %v2476_v54 = vmul.f32 %v5735_v53, %v5735_v53  ;;  %v4645_v42 = vld [vmem:[#allocation7 + $0x570] sm:$0xf0] }
0x106f   :  { %3019 = vmatpush.bf16.msra.mxu2 %v4688_v33 }
0x1070   :  { %v2477_v57 = vsel %vm153_vm0, %v2476_v54, 0.0  ;;  %v4611_v54 = vld [vmem:[#allocation7 + $0x510] sm:$0xf] }
0x1071   :  { %2478 = vadd.xlane.f32.xlu1 %v2477_v57  ;;  %v4612_v30 = vor.u32 %v5187_v59, %v4611_v54  ;;  %v4627_v54 = vld [vmem:[#allocation7 + $0x520] sm:$0xf]  ;;  %v5181_v59 = vld [vmem:[#allocation7 + $0x524] sm:$0xf] }
0x1072   :  { %v4632_v41 = vor.u32 %v5181_v59, %v4629_v58  ;;  %v4581_v59 = vld [vmem:[#allocation7 + $0x4f0] sm:$0xf0]  ;;  %v4587_v58 = vld [vmem:[#allocation7 + $0x4b8] sm:$0xf] }
0x1073   :  { %2981 = vmatpush.bf16.msra.mxu0 %v4612_v30  ;;  %3020 = vmatpush.bf16.msra.mxu2 %v4624_v2  ;;  %v5190_v30 = vld [vmem:[#allocation7 + $0x564] sm:$0xf0]  ;;  %v5165_v2 = vld [vmem:[#allocation7 + $0x4a4] sm:$0xf] }
0x1074   :  { %v4636_v0 = vor.u32 %v5190_v30, %v4635_v16  ;;  %v4568_v7 = vor.u32 %v5165_v2, %v4565_v3  ;;  %v5176_v16 = vld [vmem:[#allocation7 + $0x4f4] sm:$0xf0]  ;;  %v5168_v30 = vld [vmem:[#allocation7 + $0x4bc] sm:$0xf]  ;;  %v4517_v2 = vld [vmem:[#allocation7 + $0x470] sm:$0xf0] }
0x1075   :  { %v4523_v3 = vld [vmem:[#allocation7 + $0x438] sm:$0xf] }
0x1076   :  { %v4524_v9 = vor.u32 %v5160_v4, %v4523_v3 }
0x1077   :  { %2982 = vmatpush.bf16.msra.mxu0 %v4548_v5  ;;  %3021 = vmatpush.bf16.msra.mxu2 %v4560_v13  ;;  %v5166_v5 = vld [vmem:[#allocation7 + $0x4ac] sm:$0xf]  ;;  %v4501_v13 = vld [vmem:[#allocation7 + $0x460] sm:$0xf0] }
0x1078   :  { %v4576_v11 = vor.u32 %v5166_v5, %v4573_v6  ;;  %v4504_v20 = vor.u32 %v5149_v12, %v4501_v13  ;;  %v4525_v5 = vld [vmem:[#allocation7 + $0x478] sm:$0xf0]  ;;  %v4933_v12 = vld [vmem:[#allocation7 + $0x7c0] sm:$0xf0]  ;;  %v4939_v13 = vld [vmem:[#allocation7 + $0x788] sm:$0xf] }
0x107b   :  { %2983 = vmatpush.bf16.msra.mxu0 %v4484_v21  ;;  %3022 = vmatpush.bf16.msra.mxu2 %v4496_v25  ;;  %v4707_v21 = vld [vmem:[#allocation7 + $0x5b0] sm:$0xf]  ;;  %v5199_v25 = vld [vmem:[#allocation7 + $0x5b4] sm:$0xf] }
0x10e4   :  { %v2479_v47 = vpop.xlane.xlu1 %2478 }
0x10e5   :  { %v2480_v57 = vmul.f32 %v2479_v47, %v5606_v40  ;;  %v5198_v47 = vld [vmem:[#allocation7 + $0x5ac] sm:$0xf] }
0x10e6   :  { %v4704_v33 = vor.u32 %v5198_v47, %v4701_v48  ;;  %v4653_v47 = vld [vmem:[#allocation7 + $0x578] sm:$0xf0] }
0x10e7   :  { %v2481_v51 = vadd.f32 1e-05, %v2480_v57  ;;  %v5189_v57 = vld [vmem:[#allocation7 + $0x55c] sm:$0xf0] }
0x10e8   :  { %v4628_v62 = vor.u32 %v5189_v57, %v4627_v54  ;;  %v5175_v54 = vld [vmem:[#allocation7 + $0x4ec] sm:$0xf0] }
0x10e9   :  { %5350 = vrsqrt.f32 %v2481_v51  ;;  %vm2488_vm2 = vweird.f32 %v2481_v51 }
0x10ef   :  { %v5351_v24 = vpop.eup %5350 }
0x10f0   :  { %v2483_v26 = vmul.f32 %v5351_v24, %v2481_v51  ;;  %vm2489_vm1 = vweird.f32 %v5351_v24  ;;  %v4563_v51 = vld [vmem:[#allocation7 + $0x4a0] sm:$0xf] }
0x10f1   :  { %vm2490_vm3 = vmor %vm2488_vm2, %vm2489_vm1  ;;  %v4564_v55 = vor.u32 %v5173_v63, %v4563_v51  ;;  %v5159_v51 = vld [vmem:[#allocation7 + $0x46c] sm:$0xf0]  ;;  %v4588_v63 = vor.u32 %v5176_v16, %v4587_v58  ;;  %v5259_v16 = vld [vmem:[#allocation7 + $0x794] sm:$0xf] }
0x10f2   :  { %v2484_v27 = vmul.f32 %v5351_v24, %v2483_v26  ;;  %v4709_v26 = vld [vmem:[#allocation7 + $0x5f0] sm:$0xf0]  ;;  %v5267_v58 = vld [vmem:[#allocation7 + $0x7cc] sm:$0xf0] }
0x10f4   :  { %v2485_v28 = vmul.f32 0.5, %v2484_v27  ;;  %v4715_v27 = vld [vmem:[#allocation7 + $0x5b8] sm:$0xf] }
0x10f6   :  { %v2486_v29 = vsub.f32 1.5, %v2485_v28  ;;  %v5208_v28 = vld [vmem:[#allocation7 + $0x5f4] sm:$0xf0] }
0x10f8   :  { %v2487_v31 = vmul.f32 %v5351_v24, %v2486_v29  ;;  %v5200_v29 = vld [vmem:[#allocation7 + $0x5bc] sm:$0xf] }
0x10fa   :  { %v2491_v34 = vsel %vm2490_vm3, %v5351_v24, %v2487_v31  ;;  %v4512_v24 = vor.u32 %v5150_v17, %v4509_v18  ;;  %v4717_v31 = vld [vmem:[#allocation7 + $0x5f8] sm:$0xf0]  ;;  %v4941_v17 = vld [vmem:[#allocation7 + $0x7c8] sm:$0xf0] }
0x10fb   :  { %v2492_v36 = vmul.f32 %v2491_v34, %v5735_v53  ;;  %v4700_v53 = vor.u32 %v5206_v46, %v4699_v44  ;;  %v4712_v34 = vor.u32 %v5199_v25, %v4709_v26  ;;  %v4720_v38 = vor.u32 %v5200_v29, %v4717_v31  ;;  %v5192_v44 = vld [vmem:[#allocation7 + $0x574] sm:$0xf0]  ;;  %v5184_v46 = vld [vmem:[#allocation7 + $0x53c] sm:$0xf]  ;;  %v4869_v25 = vld [vmem:[#allocation7 + $0x740] sm:$0xf0] }
0x10fc   :  { %v4652_v57 = vor.u32 %v5192_v44, %v4651_v43  ;;  %v4875_v26 = vld [vmem:[#allocation7 + $0x708] sm:$0xf]  ;;  %v4877_v29 = vld [vmem:[#allocation7 + $0x748] sm:$0xf0] }
0x10fd   :  { %v2494_v37 = vmul.f32 %v5305_v32, %v2492_v36  ;;  %v4708_v32 = vor.u32 %v5207_v22, %v4707_v21  ;;  %v5191_v36 = vld [vmem:[#allocation7 + $0x56c] sm:$0xf0]  ;;  %v4944_v21 = vor.u32 %v5258_v15, %v4941_v17  ;;  %v4867_v22 = vld [vmem:[#allocation7 + $0x700] sm:$0xf]  ;;  %v5234_v43 = vld [vmem:[#allocation7 + $0x6c4] sm:$0xf0] }
0x10fe   :  { %v5226_v44 = vld [vmem:[#allocation7 + $0x68c] sm:$0xf] }
0x10ff   :  { %v5742_v45 = vadd.f32 %v5306_v35, %v2494_v37  ;;  %v4643_v35 = vld [vmem:[#allocation7 + $0x530] sm:$0xf]  ;;  %v4716_v37 = vor.u32 %v5208_v28, %v4715_v27  ;;  %v5250_v27 = vld [vmem:[#allocation7 + $0x744] sm:$0xf0]  ;;  %v5242_v28 = vld [vmem:[#allocation7 + $0x70c] sm:$0xf] }
0x1100   :  { %v4644_v48 = vor.u32 %v5191_v36, %v4643_v35  ;;  %v4880_v35 = vor.u32 %v5242_v28, %v4877_v29  ;;  %v4803_v36 = vld [vmem:[#allocation7 + $0x680] sm:$0xf]  ;;  %v5228_v28 = vld [vmem:[#allocation7 + $0x69c] sm:$0xf] }
0x1101   :  { %v5746_v49 = vpack.c.bf16 %v5742_v45, %v5742_v45 }
0x1103   :  { %4721 = vmatmul.msk.bf16.vlgmr.msrb.gmra.mxu0 %vm153_vm0, %v5746_v49  ;;  %4722 = vmatmul.msk.bf16.vlgmr.msrb.gmra.mxu1 %vm153_vm0, %v5746_v49 }
0x1104   :  { %4723 = vmatmul.msk.bf16.vlgmr.msrb.gmra.mxu3 %vm153_vm0, %v5746_v49  ;;  %4724 = vmatmul.msk.bf16.vlgmr.msrb.gmra.mxu2 %vm153_vm0, %v5746_v49 }
0x1105   :  { %3032 = vmatpush.bf16.msrb.mxu0 %v4692_v50  ;;  %3045 = vmatpush.bf16.msrb.mxu1 %v4696_v52  ;;  %v4648_v50 = vor.u32 %v5183_v39, %v4645_v42  ;;  %v4579_v52 = vld [vmem:[#allocation7 + $0x4b0] sm:$0xf]  ;;  %v4805_v39 = vld [vmem:[#allocation7 + $0x6c0] sm:$0xf0]  ;;  %v4811_v42 = vld [vmem:[#allocation7 + $0x688] sm:$0xf] }
0x1106   :  { %3058 = vmatpush.bf16.msrb.mxu3 %v4700_v53  ;;  %3071 = vmatpush.bf16.msrb.mxu2 %v4704_v33  ;;  %v4656_v53 = vor.u32 %v5184_v46, %v4653_v47  ;;  %v5167_v33 = vld [vmem:[#allocation7 + $0x4b4] sm:$0xf]  ;;  %v4580_v61 = vor.u32 %v5175_v54, %v4579_v52  ;;  %v4813_v46 = vld [vmem:[#allocation7 + $0x6c8] sm:$0xf0]  ;;  %v4739_v54 = vld [vmem:[#allocation7 + $0x600] sm:$0xf] }
0x1107   :  { %v4816_v52 = vor.u32 %v5226_v44, %v4813_v46  ;;  %v5212_v44 = vld [vmem:[#allocation7 + $0x61c] sm:$0xf] }
0x1109   :  { %3033 = vmatpush.bf16.msrb.mxu0 %v4628_v62  ;;  %3046 = vmatpush.bf16.msrb.mxu1 %v4632_v41  ;;  %v4584_v62 = vor.u32 %v5167_v33, %v4581_v59  ;;  %v4515_v41 = vld [vmem:[#allocation7 + $0x430] sm:$0xf]  ;;  %v4741_v33 = vld [vmem:[#allocation7 + $0x640] sm:$0xf0] }
0x110a   :  { %3059 = vmatpush.bf16.msrb.mxu3 %v4636_v0  ;;  %3072 = vmatpush.bf16.msrb.mxu2 %v4640_v1  ;;  %v4592_v0 = vor.u32 %v5168_v30, %v4589_v60  ;;  %v5151_v1 = vld [vmem:[#allocation7 + $0x434] sm:$0xf]  ;;  %v4516_v6 = vor.u32 %v5159_v51, %v4515_v41  ;;  %v4947_v59 = vld [vmem:[#allocation7 + $0x790] sm:$0xf]  ;;  %v4747_v60 = vld [vmem:[#allocation7 + $0x608] sm:$0xf] }
0x110b   :  { %v4949_v30 = vld [vmem:[#allocation7 + $0x7d0] sm:$0xf0]  ;;  %v4749_v41 = vld [vmem:[#allocation7 + $0x648] sm:$0xf0]  ;;  %v4955_v51 = vld [vmem:[#allocation7 + $0x798] sm:$0xf]  ;;  %v4948_v3 = vor.u32 %v5267_v58, %v4947_v59 }
0x110c   :  { %v4952_v4 = vor.u32 %v5259_v16, %v4949_v30  ;;  %v5269_v16 = vld [vmem:[#allocation7 + $0x7dc] sm:$0xf0]  ;;  %v5261_v30 = vld [vmem:[#allocation7 + $0x7a4] sm:$0xf] }
0x110d   :  { %3034 = vmatpush.bf16.msrb.mxu0 %v4564_v55  ;;  %3047 = vmatpush.bf16.msrb.mxu1 %v4568_v7  ;;  %v4520_v55 = vor.u32 %v5151_v1, %v4517_v2  ;;  %v4931_v7 = vld [vmem:[#allocation7 + $0x780] sm:$0xf]  ;;  %v5260_v1 = vld [vmem:[#allocation7 + $0x79c] sm:$0xf] }
0x110e   :  { %3060 = vmatpush.bf16.msrb.mxu3 %v4572_v10  ;;  %3073 = vmatpush.bf16.msrb.mxu2 %v4576_v11  ;;  %v4528_v10 = vor.u32 %v5152_v56, %v4525_v5  ;;  %v5257_v11 = vld [vmem:[#allocation7 + $0x784] sm:$0xf]  ;;  %v4932_v18 = vor.u32 %v5265_v8, %v4931_v7  ;;  %v4957_v2 = vld [vmem:[#allocation7 + $0x7d8] sm:$0xf0]  ;;  %v4883_v7 = vld [vmem:[#allocation7 + $0x710] sm:$0xf] }
0x110f   :  { %v5251_v8 = vld [vmem:[#allocation7 + $0x74c] sm:$0xf0] }
0x1110   :  { %v4884_v15 = vor.u32 %v5251_v8, %v4883_v7  ;;  %v5262_v8 = vld [vmem:[#allocation7 + $0x7ac] sm:$0xf] }
0x1111   :  { %3035 = vmatpush.bf16.msrb.mxu0 %v4500_v19  ;;  %3048 = vmatpush.bf16.msrb.mxu1 %v4504_v20  ;;  %v4936_v19 = vor.u32 %v5257_v11, %v4933_v12  ;;  %v4940_v20 = vor.u32 %v5266_v14, %v4939_v13  ;;  %v4891_v11 = vld [vmem:[#allocation7 + $0x718] sm:$0xf]  ;;  %v5244_v13 = vld [vmem:[#allocation7 + $0x71c] sm:$0xf] }
0x1112   :  { %3061 = vmatpush.bf16.msrb.mxu3 %v4508_v23  ;;  %3074 = vmatpush.bf16.msrb.mxu2 %v4512_v24  ;;  %v5249_v23 = vld [vmem:[#allocation7 + $0x73c] sm:$0xf0]  ;;  %v5241_v24 = vld [vmem:[#allocation7 + $0x704] sm:$0xf]  ;;  %v5252_v12 = vld [vmem:[#allocation7 + $0x754] sm:$0xf0] }
0x1113   :  { %4725 = vmatmul.msk.bf16.vlgmr.msra.gmra.mxu0 %vm153_vm0, %v5746_v49  ;;  %4726 = vmatmul.msk.bf16.vlgmr.msra.gmra.mxu1 %vm153_vm0, %v5746_v49  ;;  %v4868_v31 = vor.u32 %v5249_v23, %v4867_v22  ;;  %v4893_v14 = vld [vmem:[#allocation7 + $0x758] sm:$0xf0]  ;;  %v5227_v22 = vld [vmem:[#allocation7 + $0x694] sm:$0xf] }
0x1114   :  { %4727 = vmatmul.msk.bf16.vlgmr.msra.gmra.mxu3 %vm153_vm0, %v5746_v49  ;;  %4728 = vmatmul.msk.bf16.vlgmr.msra.gmra.mxu2 %vm153_vm0, %v5746_v49  ;;  %v4821_v23 = vld [vmem:[#allocation7 + $0x6d0] sm:$0xf0] }
0x1115   :  { %3084 = vmatpush.bf16.msra.mxu0 %v4708_v32  ;;  %3097 = vmatpush.bf16.msra.mxu1 %v4712_v34  ;;  %v4872_v32 = vor.u32 %v5241_v24, %v4869_v25  ;;  %v4876_v34 = vor.u32 %v5250_v27, %v4875_v26  ;;  %v4824_v25 = vor.u32 %v5227_v22, %v4821_v23  ;;  %v4827_v26 = vld [vmem:[#allocation7 + $0x698] sm:$0xf] }
0x1116   :  { %3110 = vmatpush.bf16.msra.mxu3 %v4716_v37  ;;  %3123 = vmatpush.bf16.msra.mxu2 %v4720_v38  ;;  %v5233_v37 = vld [vmem:[#allocation7 + $0x6bc] sm:$0xf0]  ;;  %v5225_v38 = vld [vmem:[#allocation7 + $0x684] sm:$0xf]  ;;  %v5236_v27 = vld [vmem:[#allocation7 + $0x6d4] sm:$0xf0] }
0x1117   :  { %v4804_v47 = vor.u32 %v5233_v37, %v4803_v36  ;;  %v4828_v29 = vor.u32 %v5236_v27, %v4827_v26  ;;  %v5211_v36 = vld [vmem:[#allocation7 + $0x614] sm:$0xf]  ;;  %v4907_v27 = vld [vmem:[#allocation7 + $0x728] sm:$0xf] }
0x1119   :  { %3085 = vmatpush.bf16.msra.mxu0 %v4644_v48  ;;  %3098 = vmatpush.bf16.msra.mxu1 %v4648_v50  ;;  %v4808_v48 = vor.u32 %v5225_v38, %v4805_v39  ;;  %v4812_v50 = vor.u32 %v5234_v43, %v4811_v42  ;;  %v4757_v38 = vld [vmem:[#allocation7 + $0x650] sm:$0xf0]  ;;  %v4763_v42 = vld [vmem:[#allocation7 + $0x618] sm:$0xf] }
0x111a   :  { %3111 = vmatpush.bf16.msra.mxu3 %v4652_v57  ;;  %3124 = vmatpush.bf16.msra.mxu2 %v4656_v53  ;;  %v5217_v57 = vld [vmem:[#allocation7 + $0x63c] sm:$0xf0]  ;;  %v5209_v53 = vld [vmem:[#allocation7 + $0x604] sm:$0xf]  ;;  %v4760_v39 = vor.u32 %v5211_v36, %v4757_v38  ;;  %v5220_v43 = vld [vmem:[#allocation7 + $0x654] sm:$0xf0] }
0x111b   :  { %v4764_v46 = vor.u32 %v5220_v43, %v4763_v42  ;;  %v5237_v38 = vld [vmem:[#allocation7 + $0x6dc] sm:$0xf0]  ;;  %v4837_v42 = vld [vmem:[#allocation7 + $0x6e0] sm:$0xf0] }
0x111d   :  { %3086 = vmatpush.bf16.msra.mxu0 %v4580_v61  ;;  %3099 = vmatpush.bf16.msra.mxu1 %v4584_v62  ;;  %v5218_v61 = vld [vmem:[#allocation7 + $0x644] sm:$0xf0]  ;;  %v5210_v62 = vld [vmem:[#allocation7 + $0x60c] sm:$0xf] }
0x111e   :  { %3112 = vmatpush.bf16.msra.mxu3 %v4588_v63  ;;  %3125 = vmatpush.bf16.msra.mxu2 %v4592_v0  ;;  %v4740_v63 = vor.u32 %v5217_v57, %v4739_v54  ;;  %v4744_v0 = vor.u32 %v5209_v53, %v4741_v33  ;;  %v4748_v56 = vor.u32 %v5218_v61, %v4747_v60  ;;  %v4963_v33 = vld [vmem:[#allocation7 + $0x7a0] sm:$0xf]  ;;  %v4965_v60 = vld [vmem:[#allocation7 + $0x7e0] sm:$0xf0] }
0x111f   :  { %v4752_v5 = vor.u32 %v5210_v62, %v4749_v41 }
0x1121   :  { %3087 = vmatpush.bf16.msra.mxu0 %v4516_v6  ;;  %3100 = vmatpush.bf16.msra.mxu1 %v4520_v55  ;;  %v4960_v55 = vor.u32 %v5260_v1, %v4957_v2 }
0x1122   :  { %3113 = vmatpush.bf16.msra.mxu3 %v4524_v9  ;;  %3126 = vmatpush.bf16.msra.mxu2 %v4528_v10  ;;  %v5243_v9 = vld [vmem:[#allocation7 + $0x714] sm:$0xf] }
0x1123   :  { %4729 = vmatmul.msk.bf16.vlgmr.msrb.gmra.mxu0 %vm153_vm0, %v5746_v49  ;;  %4730 = vmatmul.msk.bf16.vlgmr.msrb.gmra.mxu1 %vm153_vm0, %v5746_v49  ;;  %v4885_v10 = vld [vmem:[#allocation7 + $0x750] sm:$0xf0] }
0x1124   :  { %4731 = vmatmul.msk.bf16.vlgmr.msrb.gmra.mxu3 %vm153_vm0, %v5746_v49  ;;  %4732 = vmatmul.msk.bf16.vlgmr.msrb.gmra.mxu2 %vm153_vm0, %v5746_v49  ;;  %v4888_v17 = vor.u32 %v5243_v9, %v4885_v10  ;;  %v4973_v9 = vld [vmem:[#allocation7 + $0x7e8] sm:$0xf0]  ;;  %v4899_v10 = vld [vmem:[#allocation7 + $0x720] sm:$0xf] }
0x1125   :  { %3554 = vmatpush.bf16.xpose.msrb.mxu0 %v4932_v18  ;;  %3567 = vmatpush.bf16.xpose.msrb.mxu1 %v4936_v19  ;;  %v4892_v18 = vor.u32 %v5252_v12, %v4891_v11  ;;  %v4896_v19 = vor.u32 %v5244_v13, %v4893_v14  ;;  %v5253_v11 = vld [vmem:[#allocation7 + $0x75c] sm:$0xf0]  ;;  %v5245_v12 = vld [vmem:[#allocation7 + $0x724] sm:$0xf] }
0x1126   :  { %3580 = vmatpush.bf16.xpose.msrb.mxu3 %v4940_v20  ;;  %3593 = vmatpush.bf16.xpose.msrb.mxu2 %v4944_v21  ;;  %v4819_v20 = vld [vmem:[#allocation7 + $0x690] sm:$0xf]  ;;  %v4901_v13 = vld [vmem:[#allocation7 + $0x760] sm:$0xf0] }
0x1127   :  { %v5235_v21 = vld [vmem:[#allocation7 + $0x6cc] sm:$0xf0]  ;;  %v4904_v22 = vor.u32 %v5245_v12, %v4901_v13 }
0x1128   :  { %v4820_v24 = vor.u32 %v5235_v21, %v4819_v20  ;;  %v4900_v21 = vor.u32 %v5253_v11, %v4899_v10 }
0x112d   :  { %3555 = vmatpush.bf16.xpose.msrb.mxu0 %v4868_v31  ;;  %3568 = vmatpush.bf16.xpose.msrb.mxu1 %v4872_v32  ;;  %v4829_v31 = vld [vmem:[#allocation7 + $0x6d8] sm:$0xf0] }
0x112e   :  { %3581 = vmatpush.bf16.xpose.msrb.mxu3 %v4876_v34  ;;  %3594 = vmatpush.bf16.xpose.msrb.mxu2 %v4880_v35  ;;  %v4832_v32 = vor.u32 %v5228_v28, %v4829_v31  ;;  %v4755_v34 = vld [vmem:[#allocation7 + $0x610] sm:$0xf]  ;;  %v5254_v31 = vld [vmem:[#allocation7 + $0x764] sm:$0xf0] }
0x112f   :  { %v5219_v35 = vld [vmem:[#allocation7 + $0x64c] sm:$0xf0] }
0x1130   :  { %v4756_v37 = vor.u32 %v5219_v35, %v4755_v34  ;;  %v4909_v34 = vld [vmem:[#allocation7 + $0x768] sm:$0xf0] }
0x1133   :  { %4733 = vmatmul.msk.bf16.vlgmr.msra.gmra.mxu0 %vm153_vm0, %v5746_v49  ;;  %4734 = vmatmul.msk.bf16.vlgmr.msra.gmra.mxu1 %vm153_vm0, %v5746_v49 }
0x1134   :  { %4735 = vmatmul.msk.bf16.vlgmr.msra.gmra.mxu3 %vm153_vm0, %v5746_v49  ;;  %4736 = vmatmul.msk.bf16.vlgmr.msra.gmra.mxu2 %vm153_vm0, %v5746_v49  ;;  %v5268_v49 = vld [vmem:[#allocation7 + $0x7d4] sm:$0xf0] }
0x1135   :  { %3556 = vmatpush.bf16.xpose.msrb.mxu0 %v4804_v47  ;;  %3569 = vmatpush.bf16.xpose.msrb.mxu1 %v4808_v48  ;;  %v4956_v6 = vor.u32 %v5268_v49, %v4955_v51  ;;  %v4765_v47 = vld [vmem:[#allocation7 + $0x658] sm:$0xf0] }
0x1136   :  { %3582 = vmatpush.bf16.xpose.msrb.mxu3 %v4812_v50  ;;  %3595 = vmatpush.bf16.xpose.msrb.mxu2 %v4816_v52  ;;  %v4768_v48 = vor.u32 %v5212_v44, %v4765_v47  ;;  %v5780_v50 = vld [vmem:[#allocation4 + $0x1] ss:$2 sm:$0xff] }
0x1137   :  { %v2569_v52 = vperm.slane %v5780_v50, 0  ;;  %v2570_v54 = vperm.slane %v5780_v50, 1  ;;  %v2571_v41 = vperm.slane %v5780_v50, 2  ;;  %v2572_v51 = vperm.slane %v5780_v50, 3 }
0x1138   :  { %v2573_v23 = vperm.slane %v5780_v50, 4 }
0x113d   :  { %3557 = vmatpush.bf16.xpose.msrb.mxu0 %v4740_v63  ;;  %3570 = vmatpush.bf16.xpose.msrb.mxu1 %v4744_v0  ;;  %v4964_v63 = vor.u32 %v5269_v16, %v4963_v33  ;;  %v4968_v0 = vor.u32 %v5261_v30, %v4965_v60  ;;  %v4843_v16 = vld [vmem:[#allocation7 + $0x6a8] sm:$0xf] }
0x113e   :  { %3583 = vmatpush.bf16.xpose.msrb.mxu3 %v4748_v56  ;;  %3596 = vmatpush.bf16.xpose.msrb.mxu2 %v4752_v5  ;;  %v5270_v56 = vld [vmem:[#allocation7 + $0x7e4] sm:$0xf0] }
0x113f   :  { %v5238_v30 = vld [vmem:[#allocation7 + $0x6e4] sm:$0xf0] }
0x1145   :  { %3606 = vmatpush.bf16.xpose.msra.mxu0 %v4948_v3  ;;  %3619 = vmatpush.bf16.xpose.msra.mxu1 %v4952_v4  ;;  %v4971_v4 = vld [vmem:[#allocation7 + $0x7a8] sm:$0xf] }
0x1146   :  { %3632 = vmatpush.bf16.xpose.msra.mxu3 %v4956_v6  ;;  %3645 = vmatpush.bf16.xpose.msra.mxu2 %v4960_v55 }
0x114d   :  { %3607 = vmatpush.bf16.xpose.msra.mxu0 %v4884_v15  ;;  %3620 = vmatpush.bf16.xpose.msra.mxu1 %v4888_v17  ;;  %v4972_v17 = vor.u32 %v5270_v56, %v4971_v4  ;;  %v5790_v4 = vld [vmem:[#allocation4 + $0x11] ss:$2 sm:$0xff] }
0x114e   :  { %3633 = vmatpush.bf16.xpose.msra.mxu3 %v4892_v18  ;;  %3646 = vmatpush.bf16.xpose.msra.mxu2 %v4896_v19  ;;  %v4976_v18 = vor.u32 %v5262_v8, %v4973_v9  ;;  %v4979_v56 = vld [vmem:[#allocation7 + $0x7b0] sm:$0xf]  ;;  %v4981_v8 = vld [vmem:[#allocation7 + $0x7f0] sm:$0xf0]  ;;  %v2577_v13 = vperm.slane %v5790_v4, 0 }
0x1155   :  { %3608 = vmatpush.bf16.xpose.msra.mxu0 %v4820_v24  ;;  %3621 = vmatpush.bf16.xpose.msra.mxu1 %v4824_v25  ;;  %v2574_v24 = vperm.slane %v5780_v50, 5 }
0x1156   :  { %3634 = vmatpush.bf16.xpose.msra.mxu3 %v4828_v29  ;;  %3647 = vmatpush.bf16.xpose.msra.mxu2 %v4832_v32  ;;  %v5246_v32 = vld [vmem:[#allocation7 + $0x72c] sm:$0xf] }
0x1157   :  { %v4912_v47 = vor.u32 %v5246_v32, %v4909_v34  ;;  %v4989_v32 = vld [vmem:[#allocation7 + $0x7f8] sm:$0xf0]  ;;  %v4915_v34 = vld [vmem:[#allocation7 + $0x730] sm:$0xf] }
0x115d   :  { %3609 = vmatpush.bf16.xpose.msra.mxu0 %v4756_v37  ;;  %3622 = vmatpush.bf16.xpose.msra.mxu1 %v4760_v39  ;;  %v4835_v37 = vld [vmem:[#allocation7 + $0x6a0] sm:$0xf]  ;;  %v5229_v39 = vld [vmem:[#allocation7 + $0x6a4] sm:$0xf] }
0x115e   :  { %3635 = vmatpush.bf16.xpose.msra.mxu3 %v4764_v46  ;;  %3648 = vmatpush.bf16.xpose.msra.mxu2 %v4768_v48  ;;  %v4908_v46 = vor.u32 %v5254_v31, %v4907_v27  ;;  %v2575_v48 = vperm.slane %v5780_v50, 6  ;;  %v4840_v33 = vor.u32 %v5229_v39, %v4837_v42  ;;  %v5264_v31 = vld [vmem:[#allocation7 + $0x7bc] sm:$0xf]  ;;  %v5247_v42 = vld [vmem:[#allocation7 + $0x734] sm:$0xf] }
0x1180   :  { %v2933_v57 = vpop.f32.mrf.mxu0  ;;  %v2946_v53 = vpop.f32.mrf.mxu1 }
0x1181   :  { %v2934_v59 = vadd.f32 %v2933_v57, %v2569_v52  ;;  %v2947_v58 = vadd.f32 %v2946_v53, %v2570_v54  ;;  %v2576_v52 = vperm.slane %v5780_v50, 7  ;;  %v4836_v53 = vor.u32 %v5237_v38, %v4835_v37  ;;  %v5221_v50 = vld [vmem:[#allocation7 + $0x65c] sm:$0xf0] }
0x1183   :  { %v3132_v61 = vmax.f32 %v2934_v59, 0.0  ;;  %v3133_v62 = vmax.f32 %v2947_v58, 0.0 }
0x1185   :  { %v3148_v49 = vpack.c.bf16 %v3132_v61, %v3132_v61  ;;  %v3149_v1 = vpack.c.bf16 %v3133_v62, %v3133_v62 }
0x1187   :  { %v2959_v2 = vpop.f32.mrf.mxu3  ;;  %v2972_v3 = vpop.f32.mrf.mxu2  ;;  %3558 = vmatmul.bf16.vlgmr.msrb.gmra.mxu0 %v3148_v49  ;;  %3571 = vmatmul.bf16.vlgmr.msrb.gmra.mxu1 %v3149_v1  ;;  %v5213_v49 = vld [vmem:[#allocation7 + $0x624] sm:$0xf] }
0x1188   :  { %v2960_v5 = vadd.f32 %v2959_v2, %v2571_v41  ;;  %v2973_v6 = vadd.f32 %v2972_v3, %v2572_v51  ;;  %3658 = vmatpush.bf16.xpose.msrb.mxu0 %v4964_v63  ;;  %3671 = vmatpush.bf16.xpose.msrb.mxu1 %v4968_v0  ;;  %v2935_v55 = vpop.f32.mrf.mxu0  ;;  %v2948_v7 = vpop.f32.mrf.mxu1  ;;  %v5230_v51 = vld [vmem:[#allocation7 + $0x6ac] sm:$0xf]  ;;  %v4771_v0 = vld [vmem:[#allocation7 + $0x620] sm:$0xf]  ;;  %v4773_v1 = vld [vmem:[#allocation7 + $0x660] sm:$0xf0] }
0x1189   :  { %v4845_v63 = vld [vmem:[#allocation7 + $0x6e8] sm:$0xf0]  ;;  %v5271_v55 = vld [vmem:[#allocation7 + $0x7ec] sm:$0xf0]  ;;  %v5263_v7 = vld [vmem:[#allocation7 + $0x7b4] sm:$0xf]  ;;  %v4772_v11 = vor.u32 %v5221_v50, %v4771_v0  ;;  %v4776_v12 = vor.u32 %v5213_v49, %v4773_v1 }
0x118a   :  { %v3134_v14 = vmax.f32 %v2960_v5, 0.0  ;;  %v3135_v15 = vmax.f32 %v2973_v6, 0.0  ;;  %v4844_v5 = vor.u32 %v5238_v30, %v4843_v16  ;;  %v4848_v6 = vor.u32 %v5230_v51, %v4845_v63  ;;  %v4925_v51 = vld [vmem:[#allocation7 + $0x778] sm:$0xf0]  ;;  %v4851_v50 = vld [vmem:[#allocation7 + $0x6b0] sm:$0xf] }
0x118b   :  { %v5239_v49 = vld [vmem:[#allocation7 + $0x6ec] sm:$0xf0]  ;;  %v5231_v1 = vld [vmem:[#allocation7 + $0x6b4] sm:$0xf] }
0x118c   :  { %v3150_v19 = vpack.c.bf16 %v3134_v14, %v3134_v14  ;;  %v3151_v20 = vpack.c.bf16 %v3135_v15, %v3135_v15  ;;  %v2578_v14 = vperm.slane %v5790_v4, 1  ;;  %v4980_v15 = vor.u32 %v5271_v55, %v4979_v56 }
0x118d   :  { %v4852_v55 = vor.u32 %v5239_v49, %v4851_v50  ;;  %v5307_v50 = vld [vmem:[#allocation2 + $0x14] ss:$0 sm:$0xff] }
0x118e   :  { %3584 = vmatmul.bf16.vlgmr.msrb.gmra.mxu3 %v3150_v19  ;;  %3597 = vmatmul.bf16.vlgmr.msrb.gmra.mxu2 %v3151_v20  ;;  %v4779_v20 = vld [vmem:[#allocation7 + $0x628] sm:$0xf] }
0x118f   :  { %3684 = vmatpush.bf16.xpose.msrb.mxu3 %v4972_v17  ;;  %3697 = vmatpush.bf16.xpose.msrb.mxu2 %v4976_v18  ;;  %v2961_v25 = vpop.f32.mrf.mxu3  ;;  %v2974_v26 = vpop.f32.mrf.mxu2  ;;  %v4984_v17 = vor.u32 %v5263_v7, %v4981_v8 }
0x1190   :  { %3659 = vmatpush.bf16.xpose.msrb.mxu0 %v4900_v21  ;;  %3672 = vmatpush.bf16.xpose.msrb.mxu1 %v4904_v22  ;;  %v2985_v28 = vpop.f32.mrf.mxu0  ;;  %v2998_v29 = vpop.f32.mrf.mxu1  ;;  %v5222_v21 = vld [vmem:[#allocation7 + $0x664] sm:$0xf0]  ;;  %v4781_v25 = vld [vmem:[#allocation7 + $0x668] sm:$0xf0]  ;;  %v4987_v26 = vld [vmem:[#allocation7 + $0x7b8] sm:$0xf] }
0x1191   :  { %v2986_v35 = vadd.f32 %v2985_v28, %v2573_v23  ;;  %v2999_v36 = vadd.f32 %v2998_v29, %v2574_v24  ;;  %v5214_v24 = vld [vmem:[#allocation7 + $0x62c] sm:$0xf]  ;;  %v5272_v29 = vld [vmem:[#allocation7 + $0x7f4] sm:$0xf0]  ;;  %v4780_v38 = vor.u32 %v5222_v21, %v4779_v20  ;;  %v5223_v20 = vld [vmem:[#allocation7 + $0x66c] sm:$0xf0] }
0x1192   :  { %v4784_v39 = vor.u32 %v5214_v24, %v4781_v25  ;;  %v5215_v21 = vld [vmem:[#allocation7 + $0x634] sm:$0xf] }
0x1193   :  { %v3136_v43 = vmax.f32 %v2986_v35, 0.0  ;;  %v3137_v44 = vmax.f32 %v2999_v36, 0.0  ;;  %v5255_v35 = vld [vmem:[#allocation7 + $0x76c] sm:$0xf0] }
0x1195   :  { %v3152_v54 = vpack.c.bf16 %v3136_v43, %v3136_v43  ;;  %v3153_v57 = vpack.c.bf16 %v3137_v44, %v3137_v44  ;;  %v4917_v43 = vld [vmem:[#allocation7 + $0x770] sm:$0xf0]  ;;  %v2579_v44 = vperm.slane %v5790_v4, 2 }
0x1197   :  { %3685 = vmatpush.bf16.xpose.msrb.mxu3 %v4908_v46  ;;  %3698 = vmatpush.bf16.xpose.msrb.mxu2 %v4912_v47  ;;  %v3011_v59 = vpop.f32.mrf.mxu3  ;;  %v3024_v58 = vpop.f32.mrf.mxu2  ;;  %v2580_v46 = vperm.slane %v5790_v4, 3  ;;  %v4988_v47 = vor.u32 %v5272_v29, %v4987_v26 }
0x1198   :  { %v3012_v60 = vadd.f32 %v3011_v59, %v2575_v48  ;;  %v3025_v61 = vadd.f32 %v3024_v58, %v2576_v52  ;;  %3610 = vmatmul.bf16.vlgmr.msra.gmra.mxu0 %v3152_v54  ;;  %3623 = vmatmul.bf16.vlgmr.msra.gmra.mxu1 %v3153_v57  ;;  %v2987_v62 = vpop.f32.mrf.mxu0  ;;  %v3000_v41 = vpop.f32.mrf.mxu1  ;;  %v4992_v48 = vor.u32 %v5264_v31, %v4989_v32  ;;  %v2583_v32 = vperm.slane %v5790_v4, 6 }
0x1199   :  { %3660 = vmatpush.bf16.xpose.msrb.mxu0 %v4836_v53  ;;  %3673 = vmatpush.bf16.xpose.msrb.mxu1 %v4840_v33  ;;  %v4916_v57 = vor.u32 %v5255_v35, %v4915_v34  ;;  %v4920_v53 = vor.u32 %v5247_v42, %v4917_v43  ;;  %v5256_v62 = vld [vmem:[#allocation7 + $0x774] sm:$0xf0]  ;;  %v5248_v41 = vld [vmem:[#allocation7 + $0x73c] sm:$0xf]  ;;  %v2584_v34 = vperm.slane %v5790_v4, 7 }
0x119a   :  { %v3138_v2 = vmax.f32 %v3012_v60, 0.0  ;;  %v3139_v3 = vmax.f32 %v3025_v61, 0.0  ;;  %v4923_v61 = vld [vmem:[#allocation7 + $0x738] sm:$0xf]  ;;  %v4797_v42 = vld [vmem:[#allocation7 + $0x678] sm:$0xf0] }
0x119c   :  { %v3154_v9 = vpack.c.bf16 %v3138_v2, %v3138_v2  ;;  %v3155_v10 = vpack.c.bf16 %v3139_v3, %v3139_v3  ;;  %v4853_v2 = vld [vmem:[#allocation7 + $0x6f0] sm:$0xf0] }
0x119d   :  { %v4856_v7 = vor.u32 %v5231_v1, %v4853_v2 }
0x119e   :  { %3636 = vmatmul.bf16.vlgmr.msra.gmra.mxu3 %v3154_v9  ;;  %3649 = vmatmul.bf16.vlgmr.msra.gmra.mxu2 %v3155_v10 }
0x119f   :  { %3686 = vmatpush.bf16.xpose.msrb.mxu3 %v4844_v5  ;;  %3699 = vmatpush.bf16.xpose.msrb.mxu2 %v4848_v6  ;;  %v3013_v18 = vpop.f32.mrf.mxu3  ;;  %v3026_v19 = vpop.f32.mrf.mxu2  ;;  %v4924_v5 = vor.u32 %v5256_v62, %v4923_v61  ;;  %v4928_v6 = vor.u32 %v5248_v41, %v4925_v51 }
0x11a0   :  { %v3037_v22 = vpop.f32.mrf.mxu0  ;;  %v3050_v23 = vpop.f32.mrf.mxu1  ;;  %v2582_v18 = vperm.slane %v5790_v4, 5  ;;  %v4787_v19 = vld [vmem:[#allocation7 + $0x630] sm:$0xf] }
0x11a1   :  { %3661 = vmatpush.bf16.xpose.msrb.mxu0 %v4772_v11  ;;  %3674 = vmatpush.bf16.xpose.msrb.mxu1 %v4776_v12  ;;  %v3038_v27 = vadd.f32 %v3037_v22, %v2577_v13  ;;  %v3051_v28 = vadd.f32 %v3050_v23, %v2578_v14  ;;  %v4859_v12 = vld [vmem:[#allocation7 + $0x6b8] sm:$0xf]  ;;  %v5232_v14 = vld [vmem:[#allocation7 + $0x6bc] sm:$0xf]  ;;  %v4789_v22 = vld [vmem:[#allocation7 + $0x670] sm:$0xf0]  ;;  %v4788_v25 = vor.u32 %v5223_v20, %v4787_v19 }
0x11a2   :  { %v5240_v13 = vld [vmem:[#allocation7 + $0x6f4] sm:$0xf0]  ;;  %v4792_v26 = vor.u32 %v5215_v21, %v4789_v22 }
0x11a3   :  { %v3140_v36 = vmax.f32 %v3038_v27, 0.0  ;;  %v3141_v37 = vmax.f32 %v3051_v28, 0.0  ;;  %v4860_v23 = vor.u32 %v5240_v13, %v4859_v12 }
0x11a5   :  { %v3156_v52 = vpack.c.bf16 %v3140_v36, %v3140_v36  ;;  %v3157_v54 = vpack.c.bf16 %v3141_v37, %v3141_v37  ;;  %v4795_v37 = vld [vmem:[#allocation7 + $0x638] sm:$0xf] }
0x11a7   :  { %3687 = vmatpush.bf16.xpose.msrb.mxu3 %v4780_v38  ;;  %3700 = vmatpush.bf16.xpose.msrb.mxu2 %v4784_v39  ;;  %v3063_v33 = vpop.f32.mrf.mxu3  ;;  %v3076_v59 = vpop.f32.mrf.mxu2  ;;  %v5224_v38 = vld [vmem:[#allocation7 + $0x674] sm:$0xf0]  ;;  %v5216_v39 = vld [vmem:[#allocation7 + $0x63c] sm:$0xf] }
0x11a8   :  { %v3064_v58 = vadd.f32 %v3063_v33, %v2579_v44  ;;  %v3077_v16 = vadd.f32 %v3076_v59, %v2580_v46  ;;  %v3039_v30 = vpop.f32.mrf.mxu0  ;;  %v3052_v60 = vpop.f32.mrf.mxu1  ;;  %3662 = vmatmul.bf16.vlgmr.msrb.gmra.mxu0 %v3156_v52  ;;  %3675 = vmatmul.bf16.vlgmr.msrb.gmra.mxu1 %v3157_v54  ;;  %v4796_v46 = vor.u32 %v5224_v38, %v4795_v37 }
0x11a9   :  { %3710 = vmatpush.bf16.xpose.msra.mxu0 %v4980_v15  ;;  %3723 = vmatpush.bf16.xpose.msra.mxu1 %v4984_v17  ;;  %v4861_v15 = vld [vmem:[#allocation7 + $0x6f8] sm:$0xf0]  ;;  %v2581_v17 = vperm.slane %v5790_v4, 4 }
0x11aa   :  { %v3142_v63 = vmax.f32 %v3064_v58, 0.0  ;;  %v3143_v0 = vmax.f32 %v3077_v16, 0.0  ;;  %v4864_v24 = vor.u32 %v5232_v14, %v4861_v15 }
0x11ac   :  { %v3158_v3 = vpack.c.bf16 %v3142_v63, %v3142_v63  ;;  %v3159_v56 = vpack.c.bf16 %v3143_v0, %v3143_v0 }
0x11ae   :  { %3688 = vmatmul.bf16.vlgmr.msrb.gmra.mxu3 %v3158_v3  ;;  %3701 = vmatmul.bf16.vlgmr.msrb.gmra.mxu2 %v3159_v56 }
0x11af   :  { %3736 = vmatpush.bf16.xpose.msra.mxu3 %v4988_v47  ;;  %3749 = vmatpush.bf16.xpose.msra.mxu2 %v4992_v48  ;;  %v3065_v8 = vpop.f32.mrf.mxu3  ;;  %v3078_v9 = vpop.f32.mrf.mxu2  ;;  %v4800_v47 = vor.u32 %v5216_v39, %v4797_v42 }
0x11b0   :  { %v3089_v10 = vpop.f32.mrf.mxu0  ;;  %v3102_v11 = vpop.f32.mrf.mxu1 }
0x11b1   :  { %3711 = vmatpush.bf16.xpose.msra.mxu0 %v4916_v57  ;;  %3724 = vmatpush.bf16.xpose.msra.mxu1 %v4920_v53  ;;  %v3090_v27 = vadd.f32 %v3089_v10, %v2581_v17  ;;  %v3103_v28 = vadd.f32 %v3102_v11, %v2582_v18 }
0x11b3   :  { %v3144_v43 = vmax.f32 %v3090_v27, 0.0  ;;  %v3145_v44 = vmax.f32 %v3103_v28, 0.0 }
0x11b5   :  { %v3160_v54 = vpack.c.bf16 %v3144_v43, %v3144_v43  ;;  %v3161_v57 = vpack.c.bf16 %v3145_v44, %v3145_v44 }
0x11b7   :  { %3737 = vmatpush.bf16.xpose.msra.mxu3 %v4924_v5  ;;  %3750 = vmatpush.bf16.xpose.msra.mxu2 %v4928_v6  ;;  %v3115_v29 = vpop.f32.mrf.mxu3  ;;  %v3128_v31 = vpop.f32.mrf.mxu2 }
0x11b8   :  { %v3091_v35 = vpop.f32.mrf.mxu0  ;;  %v3104_v36 = vpop.f32.mrf.mxu1  ;;  %v3116_v48 = vadd.f32 %v3115_v29, %v2583_v32  ;;  %v3129_v52 = vadd.f32 %v3128_v31, %v2584_v34 }
0x11b9   :  { %3712 = vmatpush.bf16.xpose.msra.mxu0 %v4852_v55  ;;  %3725 = vmatpush.bf16.xpose.msra.mxu1 %v4856_v7 }
0x11ba   :  { %v3146_v33 = vmax.f32 %v3116_v48, 0.0  ;;  %v3147_v59 = vmax.f32 %v3129_v52, 0.0 }
0x11bc   :  { %v3162_v58 = vpack.c.bf16 %v3146_v33, %v3146_v33  ;;  %v3163_v16 = vpack.c.bf16 %v3147_v59, %v3147_v59 }
0x11bf   :  { %3738 = vmatpush.bf16.xpose.msra.mxu3 %v4860_v23  ;;  %3751 = vmatpush.bf16.xpose.msra.mxu2 %v4864_v24  ;;  %v3117_v53 = vpop.f32.mrf.mxu3  ;;  %v3130_v4 = vpop.f32.mrf.mxu2 }
0x11c1   :  { %3713 = vmatpush.bf16.xpose.msra.mxu0 %v4788_v25  ;;  %3726 = vmatpush.bf16.xpose.msra.mxu1 %v4792_v26 }
0x11c7   :  { %3739 = vmatpush.bf16.xpose.msra.mxu3 %v4796_v46  ;;  %3752 = vmatpush.bf16.xpose.msra.mxu2 %v4800_v47 }
0x11c8   :  { %3714 = vmatmul.bf16.vlgmr.msra.gmra.mxu0 %v3160_v54  ;;  %3727 = vmatmul.bf16.vlgmr.msra.gmra.mxu1 %v3161_v57 }
0x11ce   :  { %3740 = vmatmul.bf16.vlgmr.msra.gmra.mxu3 %v3162_v58  ;;  %3753 = vmatmul.bf16.vlgmr.msra.gmra.mxu2 %v3163_v16 }
0x1204   :  { %v3559_v30 = vpop.f32.mrf.mxu0  ;;  %v3572_v60 = vpop.f32.mrf.mxu1 }
0x1205   :  { %v3560_v2 = vadd.f32 %v5307_v50, %v3559_v30 }
0x1207   :  { %v3573_v5 = vadd.f32 %v3572_v60, %v3560_v2 }
0x120c   :  { %v3561_v61 = vpop.f32.mrf.mxu0  ;;  %v3574_v62 = vpop.f32.mrf.mxu1 }
0x120d   :  { %v5308_v61 = vld [vmem:[#allocation2 + $0x12] ss:$0 sm:$0xff] }
0x1211   :  { %v3585_v41 = vpop.f32.mrf.mxu3  ;;  %v3598_v51 = vpop.f32.mrf.mxu2 }
0x1212   :  { %v3586_v7 = vadd.f32 %v3585_v41, %v3573_v5 }
0x1214   :  { %v3599_v10 = vadd.f32 %v3598_v51, %v3586_v7  ;;  %v5309_v51 = vld [vmem:[#allocation2 + $0x13] ss:$0 sm:$0xff] }
0x1215   :  { %v3611_v63 = vpop.f32.mrf.mxu0  ;;  %v3624_v0 = vpop.f32.mrf.mxu1 }
0x1216   :  { %v3612_v13 = vadd.f32 %v3611_v63, %v3599_v10 }
0x1218   :  { %v3625_v17 = vadd.f32 %v3624_v0, %v3612_v13  ;;  %v5310_v0 = vld [vmem:[#allocation2 + $0x1] ss:$0 sm:$0xff] }
0x1219   :  { %v3587_v49 = vpop.f32.mrf.mxu3  ;;  %v3600_v1 = vpop.f32.mrf.mxu2 }
0x121a   :  { %v5311_v1 = vld [vmem:[#allocation2 + $0x2] ss:$0 sm:$0xff] }
0x121d   :  { %v3613_v3 = vpop.f32.mrf.mxu0  ;;  %v3626_v56 = vpop.f32.mrf.mxu1 }
0x1221   :  { %v3637_v6 = vpop.f32.mrf.mxu3  ;;  %v3650_v55 = vpop.f32.mrf.mxu2 }
0x1222   :  { %v3638_v18 = vadd.f32 %v3637_v6, %v3625_v17 }
0x1224   :  { %v3651_v21 = vadd.f32 %v3650_v55, %v3638_v18 }
0x1225   :  { %v3663_v8 = vpop.f32.mrf.mxu0  ;;  %v3676_v9 = vpop.f32.mrf.mxu1 }
0x1226   :  { %v3664_v22 = vadd.f32 %v3663_v8, %v3651_v21 }
0x1228   :  { %v3677_v25 = vadd.f32 %v3676_v9, %v3664_v22 }
0x1229   :  { %v3639_v11 = vpop.f32.mrf.mxu3  ;;  %v3652_v12 = vpop.f32.mrf.mxu2 }
0x122d   :  { %v3665_v14 = vpop.f32.mrf.mxu0  ;;  %v3678_v15 = vpop.f32.mrf.mxu1 }
0x1231   :  { %v3689_v19 = vpop.f32.mrf.mxu3  ;;  %v3702_v20 = vpop.f32.mrf.mxu2 }
0x1232   :  { %v3690_v28 = vadd.f32 %v3689_v19, %v3677_v25 }
0x1234   :  { %v3703_v29 = vadd.f32 %v3702_v20, %v3690_v28 }
0x1239   :  { %v3691_v23 = vpop.f32.mrf.mxu3  ;;  %v3704_v24 = vpop.f32.mrf.mxu2 }
0x1245   :  { %v3715_v26 = vpop.f32.mrf.mxu0  ;;  %v3728_v27 = vpop.f32.mrf.mxu1 }
0x1246   :  { %v3716_v31 = vadd.f32 %v3715_v26, %v3703_v29 }
0x1248   :  { %v3729_v35 = vadd.f32 %v3728_v27, %v3716_v31 }
0x124d   :  { %v3717_v32 = vpop.f32.mrf.mxu0  ;;  %v3730_v34 = vpop.f32.mrf.mxu1 }
0x1251   :  { %v3741_v36 = vpop.f32.mrf.mxu3  ;;  %v3754_v37 = vpop.f32.mrf.mxu2 }
0x1252   :  { %v3742_v38 = vadd.f32 %v3741_v36, %v3729_v35 }
0x1254   :  { %v3755_v39 = vadd.f32 %v3754_v37, %v3742_v38 }
0x1256   :  { %v3758_v42 = vadd.f32 %v3755_v39, %v5742_v45 }
0x1258   :  { %v3761_v43 = vsel %vm153_vm0, %v3758_v42, 0.0 }
0x1259   :  { %v3743_v44 = vpop.f32.mrf.mxu3  ;;  %v3756_v46 = vpop.f32.mrf.mxu2  ;;  %3762 = vadd.xlane.f32.xlu0 %v3761_v43 }
0x12cc   :  { %v3763_v47 = vpop.xlane.xlu0 %3762 }
0x12cd   :  { %v3764_v48 = vmul.f32 %v3763_v47, %v5606_v40 }
0x12cf   :  { %v3765_v52 = vsub.f32 %v3758_v42, %v3764_v48 }
0x12d1   :  { %v3766_v54 = vmul.f32 %v3765_v52, %v3765_v52 }
0x12d3   :  { %v3767_v57 = vsel %vm153_vm0, %v3766_v54, 0.0 }
0x12d4   :  { %3768 = vadd.xlane.f32.xlu2 %v3767_v57 }
0x1347   :  { %v3769_v53 = vpop.xlane.xlu2 %3768 }
0x1348   :  { %v3770_v4 = vmul.f32 %v3769_v53, %v5606_v40 }
0x134a   :  { %v3771_v33 = vadd.f32 1e-05, %v3770_v4 }
0x134c   :  { %5352 = vrsqrt.f32 %v3771_v33  ;;  %vm3778_vm5 = vweird.f32 %v3771_v33 }
0x1352   :  { %v5353_v59 = vpop.eup %5352 }
0x1353   :  { %v3773_v45 = vmul.f32 %v5353_v59, %v3771_v33  ;;  %vm3779_vm4 = vweird.f32 %v5353_v59 }
0x1354   :  { %vm3780_vm6 = vmor %vm3778_vm5, %vm3779_vm4 }
0x1355   :  { %v3774_v58 = vmul.f32 %v5353_v59, %v3773_v45 }
0x1357   :  { %v3775_v16 = vmul.f32 0.5, %v3774_v58 }
0x1359   :  { %v3776_v30 = vsub.f32 1.5, %v3775_v16 }
0x135b   :  { %v3777_v60 = vmul.f32 %v5353_v59, %v3776_v30 }
0x135d   :  { %v3781_v62 = vsel %vm3780_vm6, %v5353_v59, %v3777_v60 }
0x135e   :  { %v3782_v41 = vmul.f32 %v3781_v62, %v3765_v52 }
0x1360   :  { %v3784_v63 = vmul.f32 %v5308_v61, %v3782_v41 }
0x1362   :  { %v3786_v50 = vadd.f32 %v5309_v51, %v3784_v63 }
0x1364   :  { %v3789_v49 = vmul.f32 %v5310_v0, %v3786_v50 }
0x1366   :  { %v3790_v40 = vsel %vm153_vm0, %v3789_v49, 0.0 }
0x1367   :  { %3791 = vadd.xlane.f32.xlu1 %v3790_v40 }
0x13da   :  { %v3792_v2 = vpop.xlane.xlu1 %3791 }
0x13db   :  { %v3795_v3 = vadd.f32 %v5311_v1, %v3792_v2 }
0x13dd   :  { %3797 = vst.msk [vmem:[%s5816_s7] sm:$0xff] %vm3796_vm7, %v3795_v3 }
0x13de   :  { %3802 = vsyncpa [#allocation3], 1 }
0x13df   :  { %3803 = vsyncpa [#allocation5], 1 }
0x13e0   :  { %3804 = vsyncpa [#allocation8], 1 }

</bundles_post_ra>
